<compile_context>
chip_gen: v5e
topology: v5e:2x2
jax: 0.10.0
libtpu: 0.0.40
codegen_flags: <defaults>
</compile_context>

<pallas_src>
import functools

import jax
import jax.numpy as jnp
from jax import lax
from jax.experimental import pallas as pl
from jax.experimental.pallas import tpu as pltpu


def _round_up(x, m):
    return (x + m - 1) // m * m


_TM_MAX = 512                       # keeps 2x-buffered A/out blocks << 64 MiB (v7x VMEM)
_VMEM_LIMIT = 32 * 1024 * 1024      # explicit scoped-VMEM budget, safe on v5e/v6e/v7x


# ----------------------------------------------------------------------------
# Pallas kernels
# ----------------------------------------------------------------------------
def _mm_kernel(*refs, has_bias, has_residual, apply_relu, dual_out, input_relu):
    """One M-tile of: out = act(maybe_relu(a) @ w [+ bias] [+ residual]).

    Refs (in order): a, w, [bias], [residual], out, [relu_out].
    bf16 operands, f32 MXU accumulation, f32 epilogue.  dual_out writes both x
    and relu(x) so consumers never need a standalone ReLU pass.
    """
    it = iter(refs)
    a_ref, w_ref = next(it), next(it)
    b_ref = next(it) if has_bias else None
    r_ref = next(it) if has_residual else None
    o_ref = next(it)
    o2_ref = next(it) if dual_out else None

    a = a_ref[...]
    if input_relu:                               # fused ReLU on the input activation
        a = jnp.maximum(a, 0)
    acc = jnp.dot(a, w_ref[...], preferred_element_type=jnp.float32)
    if has_bias:
        acc = acc + b_ref[...]
    if has_residual:
        acc = acc + r_ref[...]
    if dual_out:
        o_ref[...] = acc.astype(o_ref.dtype)
        o2_ref[...] = jnp.maximum(acc, 0.0).astype(o2_ref.dtype)
    else:
        if apply_relu:
            acc = jnp.maximum(acc, 0.0)
        o_ref[...] = acc.astype(o_ref.dtype)


def pallas_matmul(a, w, *, bias=None, residual=None, relu=False,
                  dual_relu_out=False, input_relu=False):
    """act(a @ w [+ bias] [+ residual]) on the MXU.

    a: (M, K), w: (K, N); inputs cast to bf16, accumulation / epilogue in f32.
    Returns (M, N) f32, or an (out, relu(out)) pair when dual_relu_out=True.
    Only real operands are streamed (no synthetic zero bias / residual).
    """
    M, K = a.shape
    K2, N = w.shape
    assert K == K2
    a = a.astype(jnp.bfloat16)
    w = w.astype(jnp.bfloat16)

    # Pad the contraction dim to a lane multiple (zeros are neutral).
    Kp = _round_up(K, 128)
    if Kp != K:
        a = jnp.pad(a, ((0, 0), (0, Kp - K)))
        w = jnp.pad(w, ((0, Kp - K), (0, 0)))

    # Large M tiles (these calls are memory / overhead bound), bounded for VMEM.
    TM = min(_TM_MAX, _round_up(M, 128))
    Mp = _round_up(M, TM)
    if Mp != M:
        a = jnp.pad(a, ((0, Mp - M), (0, 0)))
        if residual is not None:
            residual = jnp.pad(residual.astype(jnp.float32), ((0, Mp - M), (0, 0)))

    inputs = [a, w]
    in_specs = [
        pl.BlockSpec((TM, Kp), lambda i: (i, 0)),
        pl.BlockSpec((Kp, N), lambda i: (0, 0)),
    ]
    if bias is not None:
        inputs.append(bias.reshape(1, N).astype(jnp.float32))
        in_specs.append(pl.BlockSpec((1, N), lambda i: (0, 0)))
    if residual is not None:
        inputs.append(residual.astype(jnp.float32))
        in_specs.append(pl.BlockSpec((TM, N), lambda i: (i, 0)))

    out_block = pl.BlockSpec((TM, N), lambda i: (i, 0))
    if dual_relu_out:
        out_shape = (jax.ShapeDtypeStruct((Mp, N), jnp.float32),
                     jax.ShapeDtypeStruct((Mp, N), jnp.float32))
        out_specs = [out_block, out_block]
    else:
        out_shape = jax.ShapeDtypeStruct((Mp, N), jnp.float32)
        out_specs = out_block

    kernel = functools.partial(
        _mm_kernel, has_bias=bias is not None, has_residual=residual is not None,
        apply_relu=relu, dual_out=dual_relu_out, input_relu=input_relu)

    out = pl.pallas_call(
        kernel,
        out_shape=out_shape,
        grid_spec=pltpu.PrefetchScalarGridSpec(
            num_scalar_prefetch=0,
            grid=(Mp // TM,),
            in_specs=in_specs,
            out_specs=out_specs),
        compiler_params=pltpu.CompilerParams(
            dimension_semantics=("parallel",),
            vmem_limit_bytes=_VMEM_LIMIT),
    )(*inputs)

    if dual_relu_out:
        return out[0][:M], out[1][:M]
    return out[:M]


def _affine_bcast_kernel(s_ref, w_ref, b_ref, o_ref):
    # Outer-product affine on the VPU: o[m, n] = s[m] * w[n] + b[n].
    o_ref[...] = s_ref[...] * w_ref[...] + b_ref[...]


def pallas_linear_in1(scalars, w, b):
    """nn.Linear(1, N): y[m, n] = scalars[m] * w[n, 0] + b[n] as a VPU
    broadcast multiply-add (avoids a K=1 contraction padded to 128 on the MXU)."""
    M = scalars.shape[0]
    N = b.shape[0]
    Mp = _round_up(M, 8)
    s = scalars.reshape(M, 1).astype(jnp.float32)
    if Mp != M:
        s = jnp.pad(s, ((0, Mp - M), (0, 0)))
    out = pl.pallas_call(
        _affine_bcast_kernel,
        out_shape=jax.ShapeDtypeStruct((Mp, N), jnp.float32),
        grid_spec=pltpu.PrefetchScalarGridSpec(
            num_scalar_prefetch=0,
            grid=(1,),
            in_specs=[pl.BlockSpec((Mp, 1), lambda i: (0, 0)),
                      pl.BlockSpec((1, N), lambda i: (0, 0)),
                      pl.BlockSpec((1, N), lambda i: (0, 0))],
            out_specs=pl.BlockSpec((Mp, N), lambda i: (0, 0))),
        compiler_params=pltpu.CompilerParams(
            dimension_semantics=("arbitrary",),
            vmem_limit_bytes=_VMEM_LIMIT),
    )(s, w.reshape(1, N).astype(jnp.float32), b.reshape(1, N).astype(jnp.float32))
    return out[:M]


# ----------------------------------------------------------------------------
# Conv / ConvTranspose helpers (layout glue in XLA, hot path in Pallas)
# ----------------------------------------------------------------------------
def _im2col_valid(z, kD, kH, kW):
    """z: (B, Dp, Hp, Wp, C) -> (B*Do*Ho*Wo, kD*kH*kW*C), tap-major / channel-minor."""
    B, Dp, Hp, Wp, C = z.shape
    Do, Ho, Wo = Dp - kD + 1, Hp - kH + 1, Wp - kW + 1
    patches = []
    for kd in range(kD):
        for kh in range(kH):
            for kw_ in range(kW):
                patches.append(z[:, kd:kd + Do, kh:kh + Ho, kw_:kw_ + Wo, :])
    p = jnp.stack(patches, axis=-2)  # (B, Do, Ho, Wo, taps, C)
    return p.reshape(B * Do * Ho * Wo, kD * kH * kW * C), (B, Do, Ho, Wo)


def conv3d(x, w, b, padding, relu=False, dual_relu_out=False):
    """x: (B,D,H,W,Cin) channels-last; w: torch layout (Cout, Cin, kD, kH, kW)."""
    Cout, Cin, kD, kH, kW = w.shape
    xp = jnp.pad(x, ((0, 0), (padding,) * 2, (padding,) * 2, (padding,) * 2, (0, 0)))
    a, (B, Do, Ho, Wo) = _im2col_valid(xp, kD, kH, kW)
    wm = jnp.transpose(w, (2, 3, 4, 1, 0)).reshape(kD * kH * kW * Cin, Cout)
    out = pallas_matmul(a, wm, bias=b, relu=relu, dual_relu_out=dual_relu_out)
    shape = (B, Do, Ho, Wo, Cout)
    if dual_relu_out:
        return out[0].reshape(shape), out[1].reshape(shape)
    return out.reshape(shape)


def conv_transpose3d(x, w, b, stride, padding, output_padding, input_relu=False):
    """ConvTranspose3d via sub-pixel decomposition (stride 2, even kernel).

    x: (B,D,H,W,Cin) channels-last; w: torch layout (Cin, Cout, kD, kH, kW).
    One lane-dense matmul computes every input position's contribution to all
    kD*kH*kW taps (columns ordered (sd,sh,sw,pd,ph,pw,co) with k = 2*s + p);
    the col2im overlap-add / phase interleave / crop / bias is cheap XLA glue.
    Equivalent to torch's out[id*stride + k - padding] += x[id] * w[k].
    """
    Cin, Cout, kD, kH, kW = w.shape
    B, D, H, W, _ = x.shape
    s = stride
    assert s == 2 and kD % 2 == 0 and kH % 2 == 0 and kW % 2 == 0
    nd, nh, nw = kD // 2, kH // 2, kW // 2

    a = x.reshape(B * D * H * W, Cin)
    wr = w.reshape(Cin, Cout, nd, 2, nh, 2, nw, 2)          # (Cin,Cout,sd,pd,sh,ph,sw,pw)
    wr = jnp.transpose(wr, (0, 2, 4, 6, 3, 5, 7, 1))        # (Cin,sd,sh,sw,pd,ph,pw,Cout)
    wm = wr.reshape(Cin, kD * kH * kW * Cout)

    contrib = pallas_matmul(a, wm, input_relu=input_relu)   # (M, 64*Cout) lane-dense
    contrib = contrib.reshape(B, D, H, W, nd, nh, nw, 2, 2, 2, Cout)

    # Overlap-add: full[u, v, t, phase] += contrib[u-sd, v-sh, t-sw, sd, sh, sw, phase]
    full = jnp.zeros((B, D + nd - 1, H + nh - 1, W + nw - 1, 2, 2, 2, Cout),
                     jnp.float32)
    for sd in range(nd):
        for sh in range(nh):
            for sw in range(nw):
                full = full.at[:, sd:sd + D, sh:sh + H, sw:sw + W].add(
                    contrib[:, :, :, :, sd, sh, sw])

    # Interleave (grid, phase) -> full-resolution output, crop `padding`, add bias.
    full = jnp.transpose(full, (0, 1, 4, 2, 5, 3, 6, 7))
    full = full.reshape(B, 2 * (D + nd - 1), 2 * (H + nh - 1), 2 * (W + nw - 1), Cout)
    Do = (D - 1) * s - 2 * padding + kD + output_padding[0]
    Ho = (H - 1) * s - 2 * padding + kH + output_padding[1]
    Wo = (W - 1) * s - 2 * padding + kW + output_padding[2]
    out = full[:, padding:padding + Do, padding:padding + Ho, padding:padding + Wo, :]
    return out + b.astype(jnp.float32)


# ----------------------------------------------------------------------------
# Decoder_bev forward (Pallas path)
# ----------------------------------------------------------------------------
def decoder_bev_forward(params, inputs, img_shape, num_residual_layers,
                        num_hiddens, num_residual_hiddens, output_padding):
    """inputs: (B, in_channels, D, 1) float32 (torch NCDHW-like)."""
    B, Cin, D, _ = inputs.shape
    H4, W4 = img_shape[0] // 4, img_shape[1] // 4

    # Linear(1 -> H4*W4) as a VPU broadcast affine kernel.
    x = pallas_linear_in1(inputs.reshape(B * Cin * D), params["lin_w"], params["lin_b"])
    x = x.reshape(B, Cin, D, H4, W4)
    x = jnp.transpose(x, (0, 2, 3, 4, 1))          # channels-last (B, D, H4, W4, Cin)

    # conv_1 (3x3x3, pad 1, bias).  The ReLU the residual branch needs is fused
    # into the same matmul epilogue (dual x / relu(x) outputs).
    x, relu_x = conv3d(x, params["conv1_w"], params["conv1_b"], padding=1,
                       dual_relu_out=True)

    # ResidualStack_3d: x = x + conv1x1(relu(conv3x3(relu(x)))); final ReLU fused.
    for i in range(num_residual_layers):
        h = conv3d(relu_x, params[f"res{i}_w3"], None, padding=1, relu=True)
        hm = h.reshape(-1, num_residual_hiddens)
        w1 = params[f"res{i}_w1"].reshape(num_hiddens, num_residual_hiddens).T
        xf, rf = pallas_matmul(hm, w1, residual=x.reshape(-1, num_hiddens),
                               dual_relu_out=True)
        x, relu_x = xf.reshape(x.shape), rf.reshape(x.shape)

    # conv_trans_1 (k=4, s=2, p=1) on relu(x); its post-ReLU is fused into
    # conv_trans_2's kernel input (input_relu=True) -> no standalone ReLU pass.
    y = conv_transpose3d(relu_x, params["ct1_w"], params["ct1_b"],
                         stride=2, padding=1, output_padding=output_padding[:3])
    out = conv_transpose3d(y, params["ct2_w"], params["ct2_b"],
                           stride=2, padding=1, output_padding=output_padding[3:],
                           input_relu=True)

    # Back to torch NCDHW layout.
    return jnp.transpose(out, (0, 4, 1, 2, 3))


# ----------------------------------------------------------------------------
# Pure-JAX reference (lax.conv_general_dilated) used only as a numerical check.
# ----------------------------------------------------------------------------
def _ref_conv3d(x, w, b, pad):
    out = lax.conv_general_dilated(
        x, jnp.transpose(w, (2, 3, 4, 1, 0)),
        window_strides=(1, 1, 1), padding=[(pad, pad)] * 3,
        dimension_numbers=("NDHWC", "DHWIO", "NDHWC"))
    if b is not None:
        out = out + b
    return out


def _ref_convT3d(x, w, b, stride, pad, out_pad):
    kdims = w.shape[2:]
    wf = jnp.flip(w, (2, 3, 4))
    padding = [(k - 1 - pad, k - 1 - pad + op) for k, op in zip(kdims, out_pad)]
    out = lax.conv_general_dilated(
        x, jnp.transpose(wf, (2, 3, 4, 0, 1)),
        window_strides=(1, 1, 1), padding=padding,
        lhs_dilation=(stride,) * 3,
        dimension_numbers=("NDHWC", "DHWIO", "NDHWC"))
    return out + b


def decoder_bev_reference(params, inputs, img_shape, num_residual_layers, output_padding):
    B, Cin, D, _ = inputs.shape
    H4, W4 = img_shape[0] // 4, img_shape[1] // 4
    x = inputs @ params["lin_w"].T + params["lin_b"]
    x = x.reshape(B, Cin, D, H4, W4)
    x = jnp.transpose(x, (0, 2, 3, 4, 1))
    x = _ref_conv3d(x, params["conv1_w"], params["conv1_b"], 1)
    for i in range(num_residual_layers):
        h = jax.nn.relu(x)
        h = _ref_conv3d(h, params[f"res{i}_w3"], None, 1)
        h = jax.nn.relu(h)
        h = _ref_conv3d(h, params[f"res{i}_w1"], None, 0)
        x = x + h
    x = jax.nn.relu(x)
    x = jax.nn.relu(_ref_convT3d(x, params["ct1_w"], params["ct1_b"], 2, 1, output_padding[:3]))
    x = _ref_convT3d(x, params["ct2_w"], params["ct2_b"], 2, 1, output_padding[3:])
    return jnp.transpose(x, (0, 4, 1, 2, 3))


# ----------------------------------------------------------------------------
# Deterministic parameter init (synthetic, torch layouts)
# ----------------------------------------------------------------------------
def init_params(key, in_channels, num_hiddens, num_residual_layers,
                num_residual_hiddens, img_shape):
    H4, W4 = img_shape[0] // 4, img_shape[1] // 4
    keys = iter(jax.random.split(key, 8 + 2 * num_residual_layers))

    def nrm(shape, scale=0.05):
        return scale * jax.random.normal(next(keys), shape, dtype=jnp.float32)

    params = {
        "lin_w": nrm((H4 * W4, 1)),
        "lin_b": nrm((H4 * W4,)),
        "conv1_w": nrm((num_hiddens, in_channels, 3, 3, 3)),
        "conv1_b": nrm((num_hiddens,)),
        "ct1_w": nrm((num_hiddens, num_hiddens // 2, 4, 4, 4)),
        "ct1_b": nrm((num_hiddens // 2,)),
        "ct2_w": nrm((num_hiddens // 2, 3, 4, 4, 4)),
        "ct2_b": nrm((3,)),
    }
    for i in range(num_residual_layers):
        params[f"res{i}_w3"] = nrm((num_residual_hiddens, num_hiddens, 3, 3, 3))
        params[f"res{i}_w1"] = nrm((num_hiddens, num_residual_hiddens, 1, 1, 1))
    return params


if __name__ == "__main__":
    # Small, shape-consistent config.
    B, in_channels, D = 2, 4, 4
    num_hiddens, num_residual_layers, num_residual_hiddens = 32, 2, 16
    img_shape = (16, 16)
    output_padding = (0, 0, 0, 0, 0, 0)

    key = jax.random.PRNGKey(0)
    pkey, xkey = jax.random.split(key)
    params = init_params(pkey, in_channels, num_hiddens, num_residual_layers,
                         num_residual_hiddens, img_shape)
    inputs = jax.random.normal(xkey, (B, in_channels, D, 1), dtype=jnp.float32)

    fwd = jax.jit(functools.partial(
        decoder_bev_forward, img_shape=img_shape,
        num_residual_layers=num_residual_layers, num_hiddens=num_hiddens,
        num_residual_hiddens=num_residual_hiddens, output_padding=output_padding))
    out = jax.block_until_ready(fwd(params, inputs))

    expected_shape = (B, 3, 4 * D, img_shape[0], img_shape[1])
    assert out.shape == expected_shape, (out.shape, expected_shape)

    ref = decoder_bev_reference(params, inputs, img_shape, num_residual_layers,
                                output_padding)
    max_err = float(jnp.max(jnp.abs(out - ref)))
    assert max_err < 5e-3, f"max abs error vs f32 reference: {max_err}"

    print("KERNEL_OK")
</pallas_src>

<mosaic_0001>
module attributes {stable_mosaic.version = 11 : i64} {
  func.func @_affine_bcast_kernel(%arg0: i32, %arg1: memref<32x1xf32, #tpu.memory_space<vmem>>, %arg2: memref<1x16xf32, #tpu.memory_space<vmem>>, %arg3: memref<1x16xf32, #tpu.memory_space<vmem>>, %arg4: memref<32x16xf32, #tpu.memory_space<vmem>>) attributes {dimension_semantics = [#tpu.dimension_semantics<arbitrary>], iteration_bounds = array<i64: 1>, scalar_prefetch = 0 : i64, scratch_operands = 0 : i64, tpu.core_type = #tpu.core_type<tc>, window_params = [{pipeline_mode = #tpu.pipeline_mode<synchronous>, transform_indices = @transform_0, window_bounds = array<i64: 32, 1>}, {pipeline_mode = #tpu.pipeline_mode<synchronous>, transform_indices = @transform_1, window_bounds = array<i64: 1, 16>}, {pipeline_mode = #tpu.pipeline_mode<synchronous>, transform_indices = @transform_2, window_bounds = array<i64: 1, 16>}, {pipeline_mode = #tpu.pipeline_mode<synchronous>, transform_indices = @transform_3, window_bounds = array<i64: 32, 16>}]} {
    %c0 = arith.constant 0 : index
    %c0_0 = arith.constant 0 : index
    %0 = vector.load %arg1[%c0, %c0_0] : memref<32x1xf32, #tpu.memory_space<vmem>>, vector<32x1xf32>
    %c0_1 = arith.constant 0 : index
    %c0_2 = arith.constant 0 : index
    %1 = vector.load %arg2[%c0_1, %c0_2] : memref<1x16xf32, #tpu.memory_space<vmem>>, vector<1x16xf32>
    %2 = vector.broadcast %0 : vector<32x1xf32> to vector<32x16xf32>
    %3 = vector.broadcast %1 : vector<1x16xf32> to vector<32x16xf32>
    %4 = arith.mulf %2, %3 : vector<32x16xf32>
    %c0_3 = arith.constant 0 : index
    %c0_4 = arith.constant 0 : index
    %5 = vector.load %arg3[%c0_3, %c0_4] : memref<1x16xf32, #tpu.memory_space<vmem>>, vector<1x16xf32>
    %6 = vector.broadcast %5 : vector<1x16xf32> to vector<32x16xf32>
    %7 = arith.addf %4, %6 : vector<32x16xf32>
    %c0_5 = arith.constant 0 : index
    %c0_6 = arith.constant 0 : index
    %8 = vector.load %arg4[%c0_5, %c0_6] : memref<32x16xf32, #tpu.memory_space<vmem>>, vector<32x16xf32>
    tpu.vector_store %arg4[%c0_5, %c0_6], %7 {strides = array<i32>} : memref<32x16xf32, #tpu.memory_space<vmem>>, vector<32x16xf32>,
    return
  }
  func.func @transform_0(%arg0: i32) -> (i32, i32) {
    %c0_i32 = arith.constant 0 : i32
    %c0_i32_0 = arith.constant 0 : i32
    %c0_i32_1 = arith.constant 0 : i32
    return %c0_i32, %c0_i32_0 : i32, i32
  }
  func.func @transform_1(%arg0: i32) -> (i32, i32) {
    %c0_i32 = arith.constant 0 : i32
    %c0_i32_0 = arith.constant 0 : i32
    %c0_i32_1 = arith.constant 0 : i32
    return %c0_i32, %c0_i32_0 : i32, i32
  }
  func.func @transform_2(%arg0: i32) -> (i32, i32) {
    %c0_i32 = arith.constant 0 : i32
    %c0_i32_0 = arith.constant 0 : i32
    %c0_i32_1 = arith.constant 0 : i32
    return %c0_i32, %c0_i32_0 : i32, i32
  }
  func.func @transform_3(%arg0: i32) -> (i32, i32) {
    %c0_i32 = arith.constant 0 : i32
    %c0_i32_0 = arith.constant 0 : i32
    %c0_i32_1 = arith.constant 0 : i32
    return %c0_i32, %c0_i32_0 : i32, i32
  }
}

module attributes {stable_mosaic.version = 11 : i64} {
  func.func @_mm_kernel(%arg0: i32, %arg1: memref<128x128xbf16, #tpu.memory_space<vmem>>, %arg2: memref<128x32xbf16, #tpu.memory_space<vmem>>, %arg3: memref<1x32xf32, #tpu.memory_space<vmem>>, %arg4: memref<128x32xf32, #tpu.memory_space<vmem>>, %arg5: memref<128x32xf32, #tpu.memory_space<vmem>>) attributes {dimension_semantics = [#tpu.dimension_semantics<parallel>], iteration_bounds = array<i64: 1>, scalar_prefetch = 0 : i64, scratch_operands = 0 : i64, tpu.core_type = #tpu.core_type<tc>, window_params = [{transform_indices = @transform_0, window_bounds = array<i64: 128, 128>}, {pipeline_mode = #tpu.pipeline_mode<synchronous>, transform_indices = @transform_1, window_bounds = array<i64: 128, 32>}, {pipeline_mode = #tpu.pipeline_mode<synchronous>, transform_indices = @transform_2, window_bounds = array<i64: 1, 32>}, {transform_indices = @transform_3, window_bounds = array<i64: 128, 32>}, {transform_indices = @transform_4, window_bounds = array<i64: 128, 32>}]} {
    %c0 = arith.constant 0 : index
    %c0_0 = arith.constant 0 : index
    %0 = vector.load %arg1[%c0, %c0_0] : memref<128x128xbf16, #tpu.memory_space<vmem>>, vector<128x128xbf16>
    %c0_1 = arith.constant 0 : index
    %c0_2 = arith.constant 0 : index
    %1 = vector.load %arg2[%c0_1, %c0_2] : memref<128x32xbf16, #tpu.memory_space<vmem>>, vector<128x32xbf16>
    %cst = arith.constant dense<0.000000e+00> : vector<128x32xf32>
    %2 = tpu.matmul %0, %1, %cst {dimension_numbers = #tpu.dot_dimension_numbers<[1], [0], [0], [1], [0, 0, 1, 1], [], []>} : vector<128x128xbf16>, vector<128x32xbf16>, vector<128x32xf32> -> vector<128x32xf32>
    %c0_3 = arith.constant 0 : index
    %c0_4 = arith.constant 0 : index
    %3 = vector.load %arg3[%c0_3, %c0_4] : memref<1x32xf32, #tpu.memory_space<vmem>>, vector<1x32xf32>
    %4 = vector.broadcast %3 : vector<1x32xf32> to vector<128x32xf32>
    %5 = arith.addf %2, %4 : vector<128x32xf32>
    %c0_5 = arith.constant 0 : index
    %c0_6 = arith.constant 0 : index
    %6 = vector.load %arg4[%c0_5, %c0_6] : memref<128x32xf32, #tpu.memory_space<vmem>>, vector<128x32xf32>
    tpu.vector_store %arg4[%c0_5, %c0_6], %5 {strides = array<i32>} : memref<128x32xf32, #tpu.memory_space<vmem>>, vector<128x32xf32>,
    %cst_7 = arith.constant 0.000000e+00 : f32
    %7 = vector.broadcast %cst_7 : f32 to vector<128x32xf32>
    %8 = arith.maximumf %5, %7 : vector<128x32xf32>
    %c0_8 = arith.constant 0 : index
    %c0_9 = arith.constant 0 : index
    %9 = vector.load %arg5[%c0_8, %c0_9] : memref<128x32xf32, #tpu.memory_space<vmem>>, vector<128x32xf32>
    tpu.vector_store %arg5[%c0_8, %c0_9], %8 {strides = array<i32>} : memref<128x32xf32, #tpu.memory_space<vmem>>, vector<128x32xf32>,
    return
  }
  func.func @transform_0(%arg0: i32) -> (i32, i32) {
    %c0_i32 = arith.constant 0 : i32
    %c0_i32_0 = arith.constant 0 : i32
    return %arg0, %c0_i32 : i32, i32
  }
  func.func @transform_1(%arg0: i32) -> (i32, i32) {
    %c0_i32 = arith.constant 0 : i32
    %c0_i32_0 = arith.constant 0 : i32
    %c0_i32_1 = arith.constant 0 : i32
    return %c0_i32, %c0_i32_0 : i32, i32
  }
  func.func @transform_2(%arg0: i32) -> (i32, i32) {
    %c0_i32 = arith.constant 0 : i32
    %c0_i32_0 = arith.constant 0 : i32
    %c0_i32_1 = arith.constant 0 : i32
    return %c0_i32, %c0_i32_0 : i32, i32
  }
  func.func @transform_3(%arg0: i32) -> (i32, i32) {
    %c0_i32 = arith.constant 0 : i32
    %c0_i32_0 = arith.constant 0 : i32
    return %arg0, %c0_i32 : i32, i32
  }
  func.func @transform_4(%arg0: i32) -> (i32, i32) {
    %c0_i32 = arith.constant 0 : i32
    %c0_i32_0 = arith.constant 0 : i32
    return %arg0, %c0_i32 : i32, i32
  }
}

module attributes {stable_mosaic.version = 11 : i64} {
  func.func @_mm_kernel(%arg0: i32, %arg1: memref<128x896xbf16, #tpu.memory_space<vmem>>, %arg2: memref<896x16xbf16, #tpu.memory_space<vmem>>, %arg3: memref<128x16xf32, #tpu.memory_space<vmem>>) attributes {dimension_semantics = [#tpu.dimension_semantics<parallel>], iteration_bounds = array<i64: 1>, scalar_prefetch = 0 : i64, scratch_operands = 0 : i64, tpu.core_type = #tpu.core_type<tc>, window_params = [{transform_indices = @transform_0, window_bounds = array<i64: 128, 896>}, {pipeline_mode = #tpu.pipeline_mode<synchronous>, transform_indices = @transform_1, window_bounds = array<i64: 896, 16>}, {transform_indices = @transform_2, window_bounds = array<i64: 128, 16>}]} {
    %c0 = arith.constant 0 : index
    %c0_0 = arith.constant 0 : index
    %0 = vector.load %arg1[%c0, %c0_0] : memref<128x896xbf16, #tpu.memory_space<vmem>>, vector<128x896xbf16>
    %c0_1 = arith.constant 0 : index
    %c0_2 = arith.constant 0 : index
    %1 = vector.load %arg2[%c0_1, %c0_2] : memref<896x16xbf16, #tpu.memory_space<vmem>>, vector<896x16xbf16>
    %cst = arith.constant dense<0.000000e+00> : vector<128x16xf32>
    %2 = tpu.matmul %0, %1, %cst {dimension_numbers = #tpu.dot_dimension_numbers<[1], [0], [0], [1], [0, 0, 1, 1], [], []>} : vector<128x896xbf16>, vector<896x16xbf16>, vector<128x16xf32> -> vector<128x16xf32>
    %cst_3 = arith.constant 0.000000e+00 : f32
    %3 = vector.broadcast %cst_3 : f32 to vector<128x16xf32>
    %4 = arith.maximumf %2, %3 : vector<128x16xf32>
    %c0_4 = arith.constant 0 : index
    %c0_5 = arith.constant 0 : index
    %5 = vector.load %arg3[%c0_4, %c0_5] : memref<128x16xf32, #tpu.memory_space<vmem>>, vector<128x16xf32>
    tpu.vector_store %arg3[%c0_4, %c0_5], %4 {strides = array<i32>} : memref<128x16xf32, #tpu.memory_space<vmem>>, vector<128x16xf32>,
    return
  }
  func.func @transform_0(%arg0: i32) -> (i32, i32) {
    %c0_i32 = arith.constant 0 : i32
    %c0_i32_0 = arith.constant 0 : i32
    return %arg0, %c0_i32 : i32, i32
  }
  func.func @transform_1(%arg0: i32) -> (i32, i32) {
    %c0_i32 = arith.constant 0 : i32
    %c0_i32_0 = arith.constant 0 : i32
    %c0_i32_1 = arith.constant 0 : i32
    return %c0_i32, %c0_i32_0 : i32, i32
  }
  func.func @transform_2(%arg0: i32) -> (i32, i32) {
    %c0_i32 = arith.constant 0 : i32
    %c0_i32_0 = arith.constant 0 : i32
    return %arg0, %c0_i32 : i32, i32
  }
}

module attributes {stable_mosaic.version = 11 : i64} {
  func.func @_mm_kernel(%arg0: i32, %arg1: memref<128x128xbf16, #tpu.memory_space<vmem>>, %arg2: memref<128x32xbf16, #tpu.memory_space<vmem>>, %arg3: memref<128x32xf32, #tpu.memory_space<vmem>>, %arg4: memref<128x32xf32, #tpu.memory_space<vmem>>, %arg5: memref<128x32xf32, #tpu.memory_space<vmem>>) attributes {dimension_semantics = [#tpu.dimension_semantics<parallel>], iteration_bounds = array<i64: 1>, scalar_prefetch = 0 : i64, scratch_operands = 0 : i64, tpu.core_type = #tpu.core_type<tc>, window_params = [{transform_indices = @transform_0, window_bounds = array<i64: 128, 128>}, {pipeline_mode = #tpu.pipeline_mode<synchronous>, transform_indices = @transform_1, window_bounds = array<i64: 128, 32>}, {transform_indices = @transform_2, window_bounds = array<i64: 128, 32>}, {transform_indices = @transform_3, window_bounds = array<i64: 128, 32>}, {transform_indices = @transform_4, window_bounds = array<i64: 128, 32>}]} {
    %c0 = arith.constant 0 : index
    %c0_0 = arith.constant 0 : index
    %0 = vector.load %arg1[%c0, %c0_0] : memref<128x128xbf16, #tpu.memory_space<vmem>>, vector<128x128xbf16>
    %c0_1 = arith.constant 0 : index
    %c0_2 = arith.constant 0 : index
    %1 = vector.load %arg2[%c0_1, %c0_2] : memref<128x32xbf16, #tpu.memory_space<vmem>>, vector<128x32xbf16>
    %cst = arith.constant dense<0.000000e+00> : vector<128x32xf32>
    %2 = tpu.matmul %0, %1, %cst {dimension_numbers = #tpu.dot_dimension_numbers<[1], [0], [0], [1], [0, 0, 1, 1], [], []>} : vector<128x128xbf16>, vector<128x32xbf16>, vector<128x32xf32> -> vector<128x32xf32>
    %c0_3 = arith.constant 0 : index
    %c0_4 = arith.constant 0 : index
    %3 = vector.load %arg3[%c0_3, %c0_4] : memref<128x32xf32, #tpu.memory_space<vmem>>, vector<128x32xf32>
    %4 = arith.addf %2, %3 : vector<128x32xf32>
    %c0_5 = arith.constant 0 : index
    %c0_6 = arith.constant 0 : index
    %5 = vector.load %arg4[%c0_5, %c0_6] : memref<128x32xf32, #tpu.memory_space<vmem>>, vector<128x32xf32>
    tpu.vector_store %arg4[%c0_5, %c0_6], %4 {strides = array<i32>} : memref<128x32xf32, #tpu.memory_space<vmem>>, vector<128x32xf32>,
    %cst_7 = arith.constant 0.000000e+00 : f32
    %6 = vector.broadcast %cst_7 : f32 to vector<128x32xf32>
    %7 = arith.maximumf %4, %6 : vector<128x32xf32>
    %c0_8 = arith.constant 0 : index
    %c0_9 = arith.constant 0 : index
    %8 = vector.load %arg5[%c0_8, %c0_9] : memref<128x32xf32, #tpu.memory_space<vmem>>, vector<128x32xf32>
    tpu.vector_store %arg5[%c0_8, %c0_9], %7 {strides = array<i32>} : memref<128x32xf32, #tpu.memory_space<vmem>>, vector<128x32xf32>,
    return
  }
  func.func @transform_0(%arg0: i32) -> (i32, i32) {
    %c0_i32 = arith.constant 0 : i32
    %c0_i32_0 = arith.constant 0 : i32
    return %arg0, %c0_i32 : i32, i32
  }
  func.func @transform_1(%arg0: i32) -> (i32, i32) {
    %c0_i32 = arith.constant 0 : i32
    %c0_i32_0 = arith.constant 0 : i32
    %c0_i32_1 = arith.constant 0 : i32
    return %c0_i32, %c0_i32_0 : i32, i32
  }
  func.func @transform_2(%arg0: i32) -> (i32, i32) {
    %c0_i32 = arith.constant 0 : i32
    %c0_i32_0 = arith.constant 0 : i32
    return %arg0, %c0_i32 : i32, i32
  }
  func.func @transform_3(%arg0: i32) -> (i32, i32) {
    %c0_i32 = arith.constant 0 : i32
    %c0_i32_0 = arith.constant 0 : i32
    return %arg0, %c0_i32 : i32, i32
  }
  func.func @transform_4(%arg0: i32) -> (i32, i32) {
    %c0_i32 = arith.constant 0 : i32
    %c0_i32_0 = arith.constant 0 : i32
    return %arg0, %c0_i32 : i32, i32
  }
}

module attributes {stable_mosaic.version = 11 : i64} {
  func.func @_mm_kernel(%arg0: i32, %arg1: memref<128x128xbf16, #tpu.memory_space<vmem>>, %arg2: memref<128x32xbf16, #tpu.memory_space<vmem>>, %arg3: memref<128x32xf32, #tpu.memory_space<vmem>>, %arg4: memref<128x32xf32, #tpu.memory_space<vmem>>, %arg5: memref<128x32xf32, #tpu.memory_space<vmem>>) attributes {dimension_semantics = [#tpu.dimension_semantics<parallel>], iteration_bounds = array<i64: 1>, scalar_prefetch = 0 : i64, scratch_operands = 0 : i64, tpu.core_type = #tpu.core_type<tc>, window_params = [{transform_indices = @transform_0, window_bounds = array<i64: 128, 128>}, {pipeline_mode = #tpu.pipeline_mode<synchronous>, transform_indices = @transform_1, window_bounds = array<i64: 128, 32>}, {transform_indices = @transform_2, window_bounds = array<i64: 128, 32>}, {transform_indices = @transform_3, window_bounds = array<i64: 128, 32>}, {transform_indices = @transform_4, window_bounds = array<i64: 128, 32>}]} {
    %c0 = arith.constant 0 : index
    %c0_0 = arith.constant 0 : index
    %0 = vector.load %arg1[%c0, %c0_0] : memref<128x128xbf16, #tpu.memory_space<vmem>>, vector<128x128xbf16>
    %c0_1 = arith.constant 0 : index
    %c0_2 = arith.constant 0 : index
    %1 = vector.load %arg2[%c0_1, %c0_2] : memref<128x32xbf16, #tpu.memory_space<vmem>>, vector<128x32xbf16>
    %cst = arith.constant dense<0.000000e+00> : vector<128x32xf32>
    %2 = tpu.matmul %0, %1, %cst {dimension_numbers = #tpu.dot_dimension_numbers<[1], [0], [0], [1], [0, 0, 1, 1], [], []>} : vector<128x128xbf16>, vector<128x32xbf16>, vector<128x32xf32> -> vector<128x32xf32>
    %c0_3 = arith.constant 0 : index
    %c0_4 = arith.constant 0 : index
    %3 = vector.load %arg3[%c0_3, %c0_4] : memref<128x32xf32, #tpu.memory_space<vmem>>, vector<128x32xf32>
    %4 = arith.addf %2, %3 : vector<128x32xf32>
    %c0_5 = arith.constant 0 : index
    %c0_6 = arith.constant 0 : index
    %5 = vector.load %arg4[%c0_5, %c0_6] : memref<128x32xf32, #tpu.memory_space<vmem>>, vector<128x32xf32>
    tpu.vector_store %arg4[%c0_5, %c0_6], %4 {strides = array<i32>} : memref<128x32xf32, #tpu.memory_space<vmem>>, vector<128x32xf32>,
    %cst_7 = arith.constant 0.000000e+00 : f32
    %6 = vector.broadcast %cst_7 : f32 to vector<128x32xf32>
    %7 = arith.maximumf %4, %6 : vector<128x32xf32>
    %c0_8 = arith.constant 0 : index
    %c0_9 = arith.constant 0 : index
    %8 = vector.load %arg5[%c0_8, %c0_9] : memref<128x32xf32, #tpu.memory_space<vmem>>, vector<128x32xf32>
    tpu.vector_store %arg5[%c0_8, %c0_9], %7 {strides = array<i32>} : memref<128x32xf32, #tpu.memory_space<vmem>>, vector<128x32xf32>,
    return
  }
  func.func @transform_0(%arg0: i32) -> (i32, i32) {
    %c0_i32 = arith.constant 0 : i32
    %c0_i32_0 = arith.constant 0 : i32
    return %arg0, %c0_i32 : i32, i32
  }
  func.func @transform_1(%arg0: i32) -> (i32, i32) {
    %c0_i32 = arith.constant 0 : i32
    %c0_i32_0 = arith.constant 0 : i32
    %c0_i32_1 = arith.constant 0 : i32
    return %c0_i32, %c0_i32_0 : i32, i32
  }
  func.func @transform_2(%arg0: i32) -> (i32, i32) {
    %c0_i32 = arith.constant 0 : i32
    %c0_i32_0 = arith.constant 0 : i32
    return %arg0, %c0_i32 : i32, i32
  }
  func.func @transform_3(%arg0: i32) -> (i32, i32) {
    %c0_i32 = arith.constant 0 : i32
    %c0_i32_0 = arith.constant 0 : i32
    return %arg0, %c0_i32 : i32, i32
  }
  func.func @transform_4(%arg0: i32) -> (i32, i32) {
    %c0_i32 = arith.constant 0 : i32
    %c0_i32_0 = arith.constant 0 : i32
    return %arg0, %c0_i32 : i32, i32
  }
}

module attributes {stable_mosaic.version = 11 : i64} {
  func.func @_mm_kernel(%arg0: i32, %arg1: memref<128x128xbf16, #tpu.memory_space<vmem>>, %arg2: memref<128x1024xbf16, #tpu.memory_space<vmem>>, %arg3: memref<128x1024xf32, #tpu.memory_space<vmem>>) attributes {dimension_semantics = [#tpu.dimension_semantics<parallel>], iteration_bounds = array<i64: 1>, scalar_prefetch = 0 : i64, scratch_operands = 0 : i64, tpu.core_type = #tpu.core_type<tc>, window_params = [{transform_indices = @transform_0, window_bounds = array<i64: 128, 128>}, {pipeline_mode = #tpu.pipeline_mode<synchronous>, transform_indices = @transform_1, window_bounds = array<i64: 128, 1024>}, {transform_indices = @transform_2, window_bounds = array<i64: 128, 1024>}]} {
    %c0 = arith.constant 0 : index
    %c0_0 = arith.constant 0 : index
    %0 = vector.load %arg1[%c0, %c0_0] : memref<128x128xbf16, #tpu.memory_space<vmem>>, vector<128x128xbf16>
    %c0_1 = arith.constant 0 : index
    %c0_2 = arith.constant 0 : index
    %1 = vector.load %arg2[%c0_1, %c0_2] : memref<128x1024xbf16, #tpu.memory_space<vmem>>, vector<128x1024xbf16>
    %cst = arith.constant dense<0.000000e+00> : vector<128x1024xf32>
    %2 = tpu.matmul %0, %1, %cst {dimension_numbers = #tpu.dot_dimension_numbers<[1], [0], [0], [1], [0, 0, 1, 1], [], []>} : vector<128x128xbf16>, vector<128x1024xbf16>, vector<128x1024xf32> -> vector<128x1024xf32>
    %c0_3 = arith.constant 0 : index
    %c0_4 = arith.constant 0 : index
    %3 = vector.load %arg3[%c0_3, %c0_4] : memref<128x1024xf32, #tpu.memory_space<vmem>>, vector<128x1024xf32>
    tpu.vector_store %arg3[%c0_3, %c0_4], %2 {strides = array<i32>} : memref<128x1024xf32, #tpu.memory_space<vmem>>, vector<128x1024xf32>,
    return
  }
  func.func @transform_0(%arg0: i32) -> (i32, i32) {
    %c0_i32 = arith.constant 0 : i32
    %c0_i32_0 = arith.constant 0 : i32
    return %arg0, %c0_i32 : i32, i32
  }
  func.func @transform_1(%arg0: i32) -> (i32, i32) {
    %c0_i32 = arith.constant 0 : i32
    %c0_i32_0 = arith.constant 0 : i32
    %c0_i32_1 = arith.constant 0 : i32
    return %c0_i32, %c0_i32_0 : i32, i32
  }
  func.func @transform_2(%arg0: i32) -> (i32, i32) {
    %c0_i32 = arith.constant 0 : i32
    %c0_i32_0 = arith.constant 0 : i32
    return %arg0, %c0_i32 : i32, i32
  }
}

module attributes {stable_mosaic.version = 11 : i64} {
  func.func @_mm_kernel(%arg0: i32, %arg1: memref<512x128xbf16, #tpu.memory_space<vmem>>, %arg2: memref<128x192xbf16, #tpu.memory_space<vmem>>, %arg3: memref<512x192xf32, #tpu.memory_space<vmem>>) attributes {dimension_semantics = [#tpu.dimension_semantics<parallel>], iteration_bounds = array<i64: 2>, scalar_prefetch = 0 : i64, scratch_operands = 0 : i64, tpu.core_type = #tpu.core_type<tc>, window_params = [{transform_indices = @transform_0, window_bounds = array<i64: 512, 128>}, {pipeline_mode = #tpu.pipeline_mode<synchronous>, transform_indices = @transform_1, window_bounds = array<i64: 128, 192>}, {transform_indices = @transform_2, window_bounds = array<i64: 512, 192>}]} {
    %c0 = arith.constant 0 : index
    %c0_0 = arith.constant 0 : index
    %0 = vector.load %arg1[%c0, %c0_0] : memref<512x128xbf16, #tpu.memory_space<vmem>>, vector<512x128xbf16>
    %cst = arith.constant 0.000000e+00 : bf16
    %1 = vector.broadcast %cst : bf16 to vector<512x128xbf16>
    %2 = arith.maximumf %0, %1 : vector<512x128xbf16>
    %c0_1 = arith.constant 0 : index
    %c0_2 = arith.constant 0 : index
    %3 = vector.load %arg2[%c0_1, %c0_2] : memref<128x192xbf16, #tpu.memory_space<vmem>>, vector<128x192xbf16>
    %cst_3 = arith.constant dense<0.000000e+00> : vector<512x192xf32>
    %4 = tpu.matmul %2, %3, %cst_3 {dimension_numbers = #tpu.dot_dimension_numbers<[1], [0], [0], [1], [0, 0, 1, 1], [], []>} : vector<512x128xbf16>, vector<128x192xbf16>, vector<512x192xf32> -> vector<512x192xf32>
    %c0_4 = arith.constant 0 : index
    %c0_5 = arith.constant 0 : index
    %5 = vector.load %arg3[%c0_4, %c0_5] : memref<512x192xf32, #tpu.memory_space<vmem>>, vector<512x192xf32>
    tpu.vector_store %arg3[%c0_4, %c0_5], %4 {strides = array<i32>} : memref<512x192xf32, #tpu.memory_space<vmem>>, vector<512x192xf32>,
    return
  }
  func.func @transform_0(%arg0: i32) -> (i32, i32) {
    %c0_i32 = arith.constant 0 : i32
    %c0_i32_0 = arith.constant 0 : i32
    return %arg0, %c0_i32 : i32, i32
  }
  func.func @transform_1(%arg0: i32) -> (i32, i32) {
    %c0_i32 = arith.constant 0 : i32
    %c0_i32_0 = arith.constant 0 : i32
    %c0_i32_1 = arith.constant 0 : i32
    return %c0_i32, %c0_i32_0 : i32, i32
  }
  func.func @transform_2(%arg0: i32) -> (i32, i32) {
    %c0_i32 = arith.constant 0 : i32
    %c0_i32_0 = arith.constant 0 : i32
    return %arg0, %c0_i32 : i32, i32
  }
}

</mosaic_0001>

<bundles_post_ra>
// kernel: decoder_bev_forward.8
= control target key start
LH: loop header
LB: loop body
LE: loop exit
PB: predicated region body
PF: predicated region fallthrough
CT: control target
= control target key end

     0   :  { %8 = vsyncpa [#allocation3], 0  ;;  %s205_s0 = inlined_call_operand.vmem [shape: f32[32,1], index: 0, kind: input, shape index: {}]   ;;  %s206_s1 = inlined_call_operand.hbm [shape: f32[1,16], index: 1, kind: input, shape index: {}]   ;;  %s207_s2 = inlined_call_operand.hbm [shape: f32[1,16], index: 2, kind: input, shape index: {}]   ;;  %s208_s3 = inlined_call_operand.vmem [shape: f32[32,16], index: 3, kind: output, shape index: {}]  }
   0x1   :  { %s17_s14 = sshll.u32 %s206_s1, 4  ;;  %s18_s14 = int_to_ptr.hbm [resolvable:$true] %s17_s14 }
   0x2   :  { %9 = vsyncpa [#allocation5], 0  ;;  %s152_s15 = smov [#allocation2]   ;;  %s28_s19 = sshll.u32 %s207_s2, 4  ;;  %s29_s19 = int_to_ptr.hbm [resolvable:$true] %s28_s19 }
   0x3   :  { %s19_s16 = sshll.u32 %s152_s15, 4  ;;  %s153_s20 = smov [#allocation4]   ;;  %s20_s16 = int_to_ptr.vmem [resolvable:$true] %s19_s16 }
   0x4   :  { %22 = dma.hbm_to_vmem [thread:$0]  %s18_s14, 16, %s20_s16, [#allocation3]  }
   0x5   :  { %s30_s21 = sshll.u32 %s153_s20, 4  ;;  %s31_s21 = int_to_ptr.vmem [resolvable:$true] %s30_s21 }
   0x6   :  { %33 = dma.hbm_to_vmem [thread:$0]  %s29_s19, 16, %s31_s21, [#allocation5]  }
   0x7   :  { %148 = dma.done.wait [#allocation3], 16  }
   0x8   :  { %149 = vsyncadd [#allocation3], 4294967280 }
   0x9   :  { %150 = dma.done.wait [#allocation5], 16  }
   0xa   :  { %151 = vsyncadd [#allocation5], 4294967280  ;;  %v154_v0 = vmov 0   ;;  %v44_v1 = vld [vmem:[%s205_s0 + $0x10] sm:$0xff]  ;;  %v42_v2 = vld [vmem:[%s205_s0] sm:$0xff]  ;;  %vm82_vm0 = vcmask 130048  }
   0xb   :  { %97 = vset.pattern.permute.xlu1 %v154_v0  ;;  %96 = vset.pattern.permute.xlu0 %v154_v0  ;;  %v45_v3 = vld [vmem:[%s205_s0 + $0x18] sm:$0xff]  ;;  %v43_v4 = vld [vmem:[%s205_s0 + $0x8] sm:$0xff]  ;;  %v98_v5 = vld [vmem:[#allocation2] ss:$0 sm:$0xff] }
   0xc   :  { %59 = vperm.xlu1 %97, %v44_v1   ;;  %49 = vperm.xlu0 %96, %v42_v2   ;;  %v99_v6 = vld [vmem:[#allocation4] ss:$0 sm:$0xff] }
  0x14   :  { %64 = vperm.xlu1 %97, %v45_v3   ;;  %54 = vperm.xlu0 %96, %v43_v4  }
  0x7e   :  { %v60_v7 = vpop.permute.xlu1 %59  ;;  %v50_v8 = vpop.permute.xlu0 %49 }
  0x7f   :  { %v72_v9 = vmul.f32 %v98_v5, %v60_v7  ;;  %v70_v10 = vmul.f32 %v98_v5, %v50_v8 }
  0x81   :  { %v80_v11 = vadd.f32 %v99_v6, %v72_v9  ;;  %v78_v12 = vadd.f32 %v99_v6, %v70_v10 }
  0x83   :  { %85 = vst.msk [vmem:[%s208_s3 + $0x10] sm:$0xff] %vm82_vm0, %v80_v11 }
  0x84   :  { %83 = vst.msk [vmem:[%s208_s3] sm:$0xff] %vm82_vm0, %v78_v12 }
  0x86   :  { %v65_v13 = vpop.permute.xlu1 %64  ;;  %v55_v14 = vpop.permute.xlu0 %54 }
  0x87   :  { %v73_v15 = vmul.f32 %v98_v5, %v65_v13  ;;  %v71_v16 = vmul.f32 %v98_v5, %v55_v14 }
  0x89   :  { %v81_v17 = vadd.f32 %v99_v6, %v73_v15  ;;  %v79_v18 = vadd.f32 %v99_v6, %v71_v16 }
  0x8b   :  { %86 = vst.msk [vmem:[%s208_s3 + $0x18] sm:$0xff] %vm82_vm0, %v81_v17 }
  0x8c   :  { %84 = vst.msk [vmem:[%s208_s3 + $0x8] sm:$0xff] %vm82_vm0, %v79_v18 }
  0x8d   :  { %91 = vsyncpa [#allocation3], 1 }
  0x8e   :  { %92 = vsyncpa [#allocation5], 1 }

// kernel: decoder_bev_forward.9
= control target key start
LH: loop header
LB: loop body
LE: loop exit
PB: predicated region body
PF: predicated region fallthrough
CT: control target
= control target key end

     0   :  { %vm197_vm0 = vcmask 261120   ;;  %s581_s1 = inlined_call_operand.vmem [shape: bf16[128,32], index: 1, kind: input, shape index: {}]   ;;  %s582_s2 = inlined_call_operand.vmem [shape: f32[1,32], index: 2, kind: input, shape index: {}]   ;;  %s583_s0 = inlined_call_operand.vmem [shape: bf16[128,128], index: 0, kind: input, shape index: {}]   ;;  %s584_s3 = inlined_call_operand.vmem [shape: f32[128,32], index: 3, kind: output, shape index: {0}]   ;;  %s585_s4 = inlined_call_operand.vmem [shape: f32[128,32], index: 4, kind: output, shape index: {1}]  }
   0x1   :  { %v333_v0 = vld [vmem:[%s581_s1 + $0x38] sm:$0xff]  ;;  %v332_v1 = vld [vmem:[%s581_s1 + $0x30] sm:$0xff]  ;;  %v331_v2 = vld [vmem:[%s581_s1 + $0x28] sm:$0xff] }
   0x2   :  { %148 = vmatpush.bf16.msra.mxu0 %v333_v0  ;;  %334 = vmatpush.bf16.msra.mxu1 %v333_v0  ;;  %v330_v3 = vld [vmem:[%s581_s1 + $0x20] sm:$0xff]  ;;  %v329_v4 = vld [vmem:[%s581_s1 + $0x18] sm:$0xff]  ;;  %v328_v5 = vld [vmem:[%s581_s1 + $0x10] sm:$0xff] }
   0x3   :  { %335 = vmatpush.bf16.msra.mxu2 %v333_v0  ;;  %336 = vmatpush.bf16.msra.mxu3 %v333_v0  ;;  %v327_v6 = vld [vmem:[%s581_s1 + $0x8] sm:$0xff]  ;;  %v326_v7 = vld [vmem:[%s581_s1] sm:$0xff]  ;;  %v320_v9 = vld [vmem:[%s583_s0 + $0x10] sm:$0xff] }
   0x4   :  { %v318_v8 = vld [vmem:[%s583_s0] sm:$0xff]  ;;  %v324_v11 = vld [vmem:[%s583_s0 + $0x30] sm:$0xff]  ;;  %v319_v12 = vld [vmem:[%s583_s0 + $0x8] sm:$0xff] }
   0x5   :  { %v322_v10 = vld [vmem:[%s583_s0 + $0x20] sm:$0xff]  ;;  %v321_v13 = vld [vmem:[%s583_s0 + $0x18] sm:$0xff]  ;;  %v323_v14 = vld [vmem:[%s583_s0 + $0x28] sm:$0xff] }
   0x6   :  { %149 = vmatpush.bf16.msra.mxu0 %v332_v1  ;;  %337 = vmatpush.bf16.msra.mxu1 %v332_v1  ;;  %v325_v15 = vld [vmem:[%s583_s0 + $0x38] sm:$0xff]  ;;  %v435_v16 = vld [vmem:[%s582_s2] ss:$0 sm:$0xff] }
   0x7   :  { %338 = vmatpush.bf16.msra.mxu2 %v332_v1  ;;  %339 = vmatpush.bf16.msra.mxu3 %v332_v1 }
   0xa   :  { %150 = vmatpush.bf16.msra.mxu0 %v331_v2  ;;  %340 = vmatpush.bf16.msra.mxu1 %v331_v2 }
   0xb   :  { %341 = vmatpush.bf16.msra.mxu2 %v331_v2  ;;  %342 = vmatpush.bf16.msra.mxu3 %v331_v2 }
   0xe   :  { %151 = vmatpush.bf16.msra.mxu0 %v330_v3  ;;  %343 = vmatpush.bf16.msra.mxu1 %v330_v3 }
   0xf   :  { %344 = vmatpush.bf16.msra.mxu2 %v330_v3  ;;  %345 = vmatpush.bf16.msra.mxu3 %v330_v3 }
  0x12   :  { %152 = vmatpush.bf16.msra.mxu0 %v329_v4  ;;  %346 = vmatpush.bf16.msra.mxu1 %v329_v4 }
  0x13   :  { %347 = vmatpush.bf16.msra.mxu2 %v329_v4  ;;  %348 = vmatpush.bf16.msra.mxu3 %v329_v4 }
  0x16   :  { %153 = vmatpush.bf16.msra.mxu0 %v328_v5  ;;  %349 = vmatpush.bf16.msra.mxu1 %v328_v5 }
  0x17   :  { %350 = vmatpush.bf16.msra.mxu2 %v328_v5  ;;  %351 = vmatpush.bf16.msra.mxu3 %v328_v5 }
  0x1a   :  { %154 = vmatpush.bf16.msra.mxu0 %v327_v6  ;;  %352 = vmatpush.bf16.msra.mxu1 %v327_v6 }
  0x1b   :  { %353 = vmatpush.bf16.msra.mxu2 %v327_v6  ;;  %354 = vmatpush.bf16.msra.mxu3 %v327_v6 }
  0x1e   :  { %155 = vmatpush.bf16.msra.mxu0 %v326_v7  ;;  %355 = vmatpush.bf16.msra.mxu1 %v326_v7 }
  0x1f   :  { %356 = vmatpush.bf16.msra.mxu2 %v326_v7  ;;  %357 = vmatpush.bf16.msra.mxu3 %v326_v7 }
  0x21   :  { %156 = vmatmul.bf16.vlgmr.msra.gmra.mxu0 %v318_v8  ;;  %166 = vmatmul.bf16.vlgmr.msra.gmra.mxu1 %v320_v9 }
  0x22   :  { %176 = vmatmul.bf16.vlgmr.msra.gmra.mxu2 %v322_v10  ;;  %186 = vmatmul.bf16.vlgmr.msra.gmra.mxu3 %v324_v11 }
  0x31   :  { %161 = vmatmul.bf16.gmra.mxu0 %v319_v12  ;;  %171 = vmatmul.bf16.gmra.mxu1 %v321_v13 }
  0x32   :  { %181 = vmatmul.bf16.gmra.mxu2 %v323_v14  ;;  %191 = vmatmul.bf16.gmra.mxu3 %v325_v15 }
  0x9e   :  { %v157_v17 = vpop.f32.mrf.mxu0  ;;  %v167_v18 = vpop.f32.mrf.mxu1 }
  0x9f   :  { %v158_v19 = vadd.f32 %v435_v16, %v157_v17  ;;  %v168_v20 = vadd.f32 %v435_v16, %v167_v18 }
  0xa1   :  { %198 = vst.msk [vmem:[%s584_s3] sm:$0xff] %vm197_vm0, %v158_v19  ;;  %v214_v21 = vmax.f32 %v158_v19, 0.0  ;;  %v218_v22 = vmax.f32 %v168_v20, 0.0 }
  0xa2   :  { %202 = vst.msk [vmem:[%s584_s3 + $0x20] sm:$0xff] %vm197_vm0, %v168_v20 }
  0xa3   :  { %230 = vst.msk [vmem:[%s585_s4] sm:$0xff] %vm197_vm0, %v214_v21 }
  0xa4   :  { %234 = vst.msk [vmem:[%s585_s4 + $0x20] sm:$0xff] %vm197_vm0, %v218_v22 }
  0xa5   :  { %v177_v23 = vpop.f32.mrf.mxu2  ;;  %v187_v24 = vpop.f32.mrf.mxu3 }
  0xa6   :  { %v178_v25 = vadd.f32 %v435_v16, %v177_v23  ;;  %v188_v26 = vadd.f32 %v435_v16, %v187_v24  ;;  %v159_v27 = vpop.f32.mrf.mxu0  ;;  %v169_v28 = vpop.f32.mrf.mxu1 }
  0xa7   :  { %v160_v29 = vadd.f32 %v435_v16, %v159_v27  ;;  %v170_v30 = vadd.f32 %v435_v16, %v169_v28 }
  0xa8   :  { %206 = vst.msk [vmem:[%s584_s3 + $0x40] sm:$0xff] %vm197_vm0, %v178_v25  ;;  %v222_v31 = vmax.f32 %v178_v25, 0.0  ;;  %v226_v32 = vmax.f32 %v188_v26, 0.0 }
  0xa9   :  { %210 = vst.msk [vmem:[%s584_s3 + $0x60] sm:$0xff] %vm197_vm0, %v188_v26  ;;  %v215_v33 = vmax.f32 %v160_v29, 0.0  ;;  %v219_v34 = vmax.f32 %v170_v30, 0.0 }
  0xaa   :  { %238 = vst.msk [vmem:[%s585_s4 + $0x40] sm:$0xff] %vm197_vm0, %v222_v31 }
  0xab   :  { %242 = vst.msk [vmem:[%s585_s4 + $0x60] sm:$0xff] %vm197_vm0, %v226_v32 }
  0xac   :  { %199 = vst.msk [vmem:[%s584_s3 + $0x8] sm:$0xff] %vm197_vm0, %v160_v29 }
  0xad   :  { %231 = vst.msk [vmem:[%s585_s4 + $0x8] sm:$0xff] %vm197_vm0, %v215_v33  ;;  %v179_v35 = vpop.f32.mrf.mxu2  ;;  %v189_v36 = vpop.f32.mrf.mxu3 }
  0xae   :  { %203 = vst.msk [vmem:[%s584_s3 + $0x28] sm:$0xff] %vm197_vm0, %v170_v30  ;;  %v180_v37 = vadd.f32 %v435_v16, %v179_v35  ;;  %v190_v38 = vadd.f32 %v435_v16, %v189_v36  ;;  %v162_v39 = vpop.f32.mrf.mxu0  ;;  %v172_v40 = vpop.f32.mrf.mxu1 }
  0xaf   :  { %235 = vst.msk [vmem:[%s585_s4 + $0x28] sm:$0xff] %vm197_vm0, %v219_v34  ;;  %v163_v41 = vadd.f32 %v435_v16, %v162_v39  ;;  %v173_v42 = vadd.f32 %v435_v16, %v172_v40 }
  0xb0   :  { %207 = vst.msk [vmem:[%s584_s3 + $0x48] sm:$0xff] %vm197_vm0, %v180_v37  ;;  %v223_v43 = vmax.f32 %v180_v37, 0.0  ;;  %v227_v44 = vmax.f32 %v190_v38, 0.0 }
  0xb1   :  { %211 = vst.msk [vmem:[%s584_s3 + $0x68] sm:$0xff] %vm197_vm0, %v190_v38  ;;  %v216_v45 = vmax.f32 %v163_v41, 0.0  ;;  %v220_v46 = vmax.f32 %v173_v42, 0.0 }
  0xb2   :  { %239 = vst.msk [vmem:[%s585_s4 + $0x48] sm:$0xff] %vm197_vm0, %v223_v43 }
  0xb3   :  { %243 = vst.msk [vmem:[%s585_s4 + $0x68] sm:$0xff] %vm197_vm0, %v227_v44 }
  0xb4   :  { %200 = vst.msk [vmem:[%s584_s3 + $0x10] sm:$0xff] %vm197_vm0, %v163_v41 }
  0xb5   :  { %232 = vst.msk [vmem:[%s585_s4 + $0x10] sm:$0xff] %vm197_vm0, %v216_v45  ;;  %v182_v47 = vpop.f32.mrf.mxu2  ;;  %v192_v48 = vpop.f32.mrf.mxu3 }
  0xb6   :  { %204 = vst.msk [vmem:[%s584_s3 + $0x30] sm:$0xff] %vm197_vm0, %v173_v42  ;;  %v183_v49 = vadd.f32 %v435_v16, %v182_v47  ;;  %v193_v50 = vadd.f32 %v435_v16, %v192_v48  ;;  %v164_v51 = vpop.f32.mrf.mxu0  ;;  %v174_v52 = vpop.f32.mrf.mxu1 }
  0xb7   :  { %236 = vst.msk [vmem:[%s585_s4 + $0x30] sm:$0xff] %vm197_vm0, %v220_v46  ;;  %v165_v53 = vadd.f32 %v435_v16, %v164_v51  ;;  %v175_v54 = vadd.f32 %v435_v16, %v174_v52 }
  0xb8   :  { %208 = vst.msk [vmem:[%s584_s3 + $0x50] sm:$0xff] %vm197_vm0, %v183_v49  ;;  %v224_v55 = vmax.f32 %v183_v49, 0.0  ;;  %v228_v56 = vmax.f32 %v193_v50, 0.0 }
  0xb9   :  { %212 = vst.msk [vmem:[%s584_s3 + $0x70] sm:$0xff] %vm197_vm0, %v193_v50  ;;  %v217_v57 = vmax.f32 %v165_v53, 0.0  ;;  %v221_v58 = vmax.f32 %v175_v54, 0.0 }
  0xba   :  { %240 = vst.msk [vmem:[%s585_s4 + $0x50] sm:$0xff] %vm197_vm0, %v224_v55 }
  0xbb   :  { %244 = vst.msk [vmem:[%s585_s4 + $0x70] sm:$0xff] %vm197_vm0, %v228_v56 }
  0xbc   :  { %201 = vst.msk [vmem:[%s584_s3 + $0x18] sm:$0xff] %vm197_vm0, %v165_v53 }
  0xbd   :  { %233 = vst.msk [vmem:[%s585_s4 + $0x18] sm:$0xff] %vm197_vm0, %v217_v57  ;;  %v184_v59 = vpop.f32.mrf.mxu2  ;;  %v194_v60 = vpop.f32.mrf.mxu3 }
  0xbe   :  { %205 = vst.msk [vmem:[%s584_s3 + $0x38] sm:$0xff] %vm197_vm0, %v175_v54  ;;  %v185_v61 = vadd.f32 %v435_v16, %v184_v59  ;;  %v195_v62 = vadd.f32 %v435_v16, %v194_v60 }
  0xbf   :  { %237 = vst.msk [vmem:[%s585_s4 + $0x38] sm:$0xff] %vm197_vm0, %v221_v58 }
  0xc0   :  { %209 = vst.msk [vmem:[%s584_s3 + $0x58] sm:$0xff] %vm197_vm0, %v185_v61  ;;  %v225_v63 = vmax.f32 %v185_v61, 0.0  ;;  %v229_v0 = vmax.f32 %v195_v62, 0.0 }
  0xc1   :  { %213 = vst.msk [vmem:[%s584_s3 + $0x78] sm:$0xff] %vm197_vm0, %v195_v62 }
  0xc2   :  { %241 = vst.msk [vmem:[%s585_s4 + $0x58] sm:$0xff] %vm197_vm0, %v225_v63 }
  0xc3   :  { %245 = vst.msk [vmem:[%s585_s4 + $0x78] sm:$0xff] %vm197_vm0, %v229_v0 }

// kernel: decoder_bev_forward.10
= control target key start
LH: loop header
LB: loop body
LE: loop exit
PB: predicated region body
PF: predicated region fallthrough
CT: control target
= control target key end

     0   :  { %vm1170_vm0 = vcmask 130048   ;;  %s2482_s1 = inlined_call_operand.vmem [shape: bf16[896,16], index: 1, kind: input, shape index: {}]   ;;  %s2483_s0 = inlined_call_operand.vmem [shape: bf16[128,896], index: 0, kind: input, shape index: {}]   ;;  %s2484_s2 = inlined_call_operand.vmem [shape: f32[128,16], index: 2, kind: output, shape index: {}]  }
   0x1   :  { %v1702_v0 = vld [vmem:[%s2482_s1 + $0x38] sm:$0xff]  ;;  %v1701_v3 = vld [vmem:[%s2482_s1 + $0x30] sm:$0xff]  ;;  %v1700_v6 = vld [vmem:[%s2482_s1 + $0x28] sm:$0xff] }
   0x2   :  { %v1796_v1 = vld [vmem:[%s2482_s1 + $0xb8] sm:$0xff]  ;;  %811 = vmatpush.bf16.msra.mxu0 %v1702_v0  ;;  %1751 = vmatpush.bf16.msra.mxu3 %v1702_v0  ;;  %v1811_v4 = vld [vmem:[%s2482_s1 + $0xb0] sm:$0xff]  ;;  %v1826_v7 = vld [vmem:[%s2482_s1 + $0xa8] sm:$0xff] }
   0x3   :  { %v1801_v2 = vld [vmem:[%s2482_s1 + $0x78] sm:$0xff]  ;;  %1767 = vmatpush.bf16.msra.mxu2 %v1796_v1  ;;  %v1816_v5 = vld [vmem:[%s2482_s1 + $0x70] sm:$0xff]  ;;  %v1831_v8 = vld [vmem:[%s2482_s1 + $0x68] sm:$0xff] }
   0x4   :  { %1759 = vmatpush.bf16.msra.mxu1 %v1801_v2  ;;  %v1699_v9 = vld [vmem:[%s2482_s1 + $0x20] sm:$0xff]  ;;  %v1698_v12 = vld [vmem:[%s2482_s1 + $0x18] sm:$0xff]  ;;  %v1697_v15 = vld [vmem:[%s2482_s1 + $0x10] sm:$0xff] }
   0x5   :  { %v1841_v10 = vld [vmem:[%s2482_s1 + $0xa0] sm:$0xff]  ;;  %v1856_v13 = vld [vmem:[%s2482_s1 + $0x98] sm:$0xff]  ;;  %v1871_v16 = vld [vmem:[%s2482_s1 + $0x90] sm:$0xff] }
   0x6   :  { %812 = vmatpush.bf16.msra.mxu0 %v1701_v3  ;;  %1752 = vmatpush.bf16.msra.mxu3 %v1701_v3  ;;  %v1846_v11 = vld [vmem:[%s2482_s1 + $0x60] sm:$0xff]  ;;  %v1861_v14 = vld [vmem:[%s2482_s1 + $0x58] sm:$0xff]  ;;  %v1876_v17 = vld [vmem:[%s2482_s1 + $0x50] sm:$0xff] }
   0x7   :  { %1768 = vmatpush.bf16.msra.mxu2 %v1811_v4  ;;  %v1696_v18 = vld [vmem:[%s2482_s1 + $0x8] sm:$0xff]  ;;  %v1695_v21 = vld [vmem:[%s2482_s1] sm:$0xff]  ;;  %v1642_v25 = vld [vmem:[%s2483_s0 + $0x18] sm:$0xf0] }
   0x8   :  { %1760 = vmatpush.bf16.msra.mxu1 %v1816_v5  ;;  %v1886_v19 = vld [vmem:[%s2482_s1 + $0x88] sm:$0xff]  ;;  %v1899_v22 = vld [vmem:[%s2482_s1 + $0x80] sm:$0xff]  ;;  %v1249_v26 = vld [vmem:[%s2483_s0 + $0x70] sm:$0xf] }
   0x9   :  { %v1891_v20 = vld [vmem:[%s2482_s1 + $0x48] sm:$0xff]  ;;  %v1904_v23 = vld [vmem:[%s2482_s1 + $0x40] sm:$0xff]  ;;  %v1257_v28 = vld [vmem:[%s2483_s0 + $0x78] sm:$0xf] }
   0xa   :  { %813 = vmatpush.bf16.msra.mxu0 %v1700_v6  ;;  %1753 = vmatpush.bf16.msra.mxu3 %v1700_v6  ;;  %v1193_v24 = vld [vmem:[%s2483_s0] sm:$0xf]  ;;  %v1656_v27 = vld [vmem:[%s2483_s0 + $0x88] sm:$0xf0]  ;;  %v1657_v29 = vld [vmem:[%s2483_s0 + $0x90] sm:$0xf0] }
   0xb   :  { %1769 = vmatpush.bf16.msra.mxu2 %v1826_v7  ;;  %v1653_v30 = vld [vmem:[%s2483_s0 + $0x74] sm:$0xf]  ;;  %v1251_v31 = vld [vmem:[%s2483_s0 + $0x8c] sm:$0xf0]  ;;  %v1726_v32 = vld [vmem:[%s2482_s1 + $0xf8] sm:$0xff]  ;;  %v1194_v33 = vor.u32 %v1642_v25, %v1193_v24  ;;  %v1250_v34 = vor.u32 %v1656_v27, %v1249_v26  ;;  %v1258_v35 = vor.u32 %v1657_v29, %v1257_v28 }
   0xc   :  { %1761 = vmatpush.bf16.msra.mxu1 %v1831_v8  ;;  %v1254_v36 = vor.u32 %v1653_v30, %v1251_v31  ;;  %v1750_v37 = vld [vmem:[%s2482_s1 + $0x1b8] sm:$0xff]  ;;  %v1725_v39 = vld [vmem:[%s2482_s1 + $0xf0] sm:$0xff]  ;;  %v1724_v42 = vld [vmem:[%s2482_s1 + $0xe8] sm:$0xff] }
   0xd   :  { %v1742_v38 = vld [vmem:[%s2482_s1 + $0x178] sm:$0xff]  ;;  %v1749_v40 = vld [vmem:[%s2482_s1 + $0x1b0] sm:$0xff]  ;;  %v1748_v43 = vld [vmem:[%s2482_s1 + $0x1a8] sm:$0xff] }
   0xe   :  { %814 = vmatpush.bf16.msra.mxu0 %v1699_v9  ;;  %1754 = vmatpush.bf16.msra.mxu3 %v1699_v9  ;;  %v1741_v41 = vld [vmem:[%s2482_s1 + $0x170] sm:$0xff]  ;;  %v1740_v44 = vld [vmem:[%s2482_s1 + $0x168] sm:$0xff]  ;;  %v1221_v45 = vld [vmem:[%s2483_s0 + $0x38] sm:$0xf] }
   0xf   :  { %1770 = vmatpush.bf16.msra.mxu2 %v1841_v10  ;;  %v1723_v46 = vld [vmem:[%s2482_s1 + $0xe0] sm:$0xff]  ;;  %v1649_v47 = vld [vmem:[%s2483_s0 + $0x50] sm:$0xf0]  ;;  %v1277_v48 = vld [vmem:[%s2483_s0 + $0xa8] sm:$0xf] }
  0x10   :  { %1762 = vmatpush.bf16.msra.mxu1 %v1846_v11  ;;  %v1663_v49 = vld [vmem:[%s2483_s0 + $0xc0] sm:$0xf0]  ;;  %v1285_v50 = vld [vmem:[%s2483_s0 + $0xb0] sm:$0xf]  ;;  %v1664_v51 = vld [vmem:[%s2483_s0 + $0xc8] sm:$0xf0]  ;;  %v1222_v56 = vor.u32 %v1649_v47, %v1221_v45 }
  0x11   :  { %v1660_v52 = vld [vmem:[%s2483_s0 + $0xac] sm:$0xf]  ;;  %v1279_v53 = vld [vmem:[%s2483_s0 + $0xc4] sm:$0xf0]  ;;  %v1747_v54 = vld [vmem:[%s2482_s1 + $0x1a0] sm:$0xff]  ;;  %v1278_v57 = vor.u32 %v1663_v49, %v1277_v48  ;;  %v1286_v58 = vor.u32 %v1664_v51, %v1285_v50 }
  0x12   :  { %815 = vmatpush.bf16.msra.mxu0 %v1698_v12  ;;  %1755 = vmatpush.bf16.msra.mxu3 %v1698_v12  ;;  %v1739_v55 = vld [vmem:[%s2482_s1 + $0x160] sm:$0xff]  ;;  %v1282_v59 = vor.u32 %v1660_v52, %v1279_v53  ;;  %v1722_v60 = vld [vmem:[%s2482_s1 + $0xd8] sm:$0xff]  ;;  %v1721_v63 = vld [vmem:[%s2482_s1 + $0xd0] sm:$0xff] }
  0x13   :  { %1771 = vmatpush.bf16.msra.mxu2 %v1856_v13  ;;  %v1746_v61 = vld [vmem:[%s2482_s1 + $0x198] sm:$0xff]  ;;  %v1305_v0 = vld [vmem:[%s2483_s0 + $0xe0] sm:$0xf]  ;;  %v1639_v3 = vld [vmem:[%s2483_s0 + $0x4] sm:$0xf] }
  0x14   :  { %1763 = vmatpush.bf16.msra.mxu1 %v1861_v14  ;;  %v1738_v62 = vld [vmem:[%s2482_s1 + $0x158] sm:$0xff]  ;;  %v1313_v6 = vld [vmem:[%s2483_s0 + $0xe8] sm:$0xf]  ;;  %v1667_v9 = vld [vmem:[%s2483_s0 + $0xe4] sm:$0xf] }
  0x15   :  { %v1646_v24 = vld [vmem:[%s2483_s0 + $0x3c] sm:$0xf]  ;;  %v1341_v25 = vld [vmem:[%s2483_s0 + $0x120] sm:$0xf]  ;;  %v1335_v28 = vld [vmem:[%s2483_s0 + $0x134] sm:$0xf0] }
  0x16   :  { %816 = vmatpush.bf16.msra.mxu0 %v1697_v15  ;;  %1756 = vmatpush.bf16.msra.mxu3 %v1697_v15  ;;  %v1678_v26 = vld [vmem:[%s2483_s0 + $0x138] sm:$0xf0]  ;;  %v1731_v47 = vld [vmem:[%s2482_s1 + $0x120] sm:$0xff]  ;;  %v1389_v49 = vld [vmem:[%s2483_s0 + $0x188] sm:$0xf] }
  0x17   :  { %1772 = vmatpush.bf16.msra.mxu2 %v1871_v16  ;;  %v1674_v27 = vld [vmem:[%s2483_s0 + $0x11c] sm:$0xf]  ;;  %v1342_v31 = vor.u32 %v1678_v26, %v1341_v25  ;;  %v1691_v50 = vld [vmem:[%s2483_s0 + $0x1a0] sm:$0xf0]  ;;  %v1229_v51 = vld [vmem:[%s2483_s0 + $0x40] sm:$0xf] }
  0x18   :  { %1764 = vmatpush.bf16.msra.mxu1 %v1876_v17  ;;  %v1730_v48 = vld [vmem:[%s2482_s1 + $0x118] sm:$0xff]  ;;  %v1397_v53 = vld [vmem:[%s2483_s0 + $0x190] sm:$0xf] }
  0x19   :  { %v1650_v52 = vld [vmem:[%s2483_s0 + $0x58] sm:$0xf0] }
  0x1a   :  { %817 = vmatpush.bf16.msra.mxu0 %v1696_v18  ;;  %1757 = vmatpush.bf16.msra.mxu3 %v1696_v18  ;;  %v1745_v18 = vld [vmem:[%s2482_s1 + $0x190] sm:$0xff] }
  0x1b   :  { %1773 = vmatpush.bf16.msra.mxu2 %v1886_v19 }
  0x1c   :  { %1765 = vmatpush.bf16.msra.mxu1 %v1891_v20 }
  0x1e   :  { %818 = vmatpush.bf16.msra.mxu0 %v1695_v21  ;;  %1758 = vmatpush.bf16.msra.mxu3 %v1695_v21  ;;  %v1744_v21 = vld [vmem:[%s2482_s1 + $0x188] sm:$0xff] }
  0x1f   :  { %1774 = vmatpush.bf16.msra.mxu2 %v1899_v22 }
  0x20   :  { %1766 = vmatpush.bf16.msra.mxu1 %v1904_v23 }
  0x21   :  { %819 = vmatmul.bf16.vlgmr.msra.gmra.mxu0 %v1194_v33  ;;  %829 = vmatmul.bf16.vlgmr.msra.gmra.mxu3 %v1250_v34  ;;  %v1719_v33 = vld [vmem:[%s2482_s1 + $0xc0] sm:$0xff]  ;;  %v1734_v34 = vld [vmem:[%s2482_s1 + $0x138] sm:$0xff] }
  0x22   :  { %958 = vmatpush.bf16.msrb.mxu3 %v1726_v32  ;;  %860 = vmatpush.bf16.msrb.mxu0 %v1801_v2  ;;  %v1670_v2 = vld [vmem:[%s2483_s0 + $0xf8] sm:$0xf0]  ;;  %v1338_v32 = vor.u32 %v1674_v27, %v1335_v28 }
  0x23   :  { %927 = vmatmul.bf16.vlgmr.msra.gmra.mxu2 %v1258_v35  ;;  %878 = vmatmul.bf16.vlgmr.msra.gmra.mxu1 %v1254_v36  ;;  %v1306_v12 = vor.u32 %v1670_v2, %v1305_v0  ;;  %v1735_v35 = vld [vmem:[%s2482_s1 + $0x140] sm:$0xff]  ;;  %v1684_v36 = vld [vmem:[%s2483_s0 + $0x168] sm:$0xf0]  ;;  %v1203_v2 = vld [vmem:[%s2483_s0 + $0x24] sm:$0xf0] }
  0x24   :  { %1105 = vmatpush.bf16.msrb.mxu2 %v1750_v37  ;;  %1056 = vmatpush.bf16.msrb.mxu1 %v1742_v38  ;;  %v1643_v37 = vld [vmem:[%s2483_s0 + $0x20] sm:$0xf0]  ;;  %v1369_v38 = vld [vmem:[%s2483_s0 + $0x158] sm:$0xf]  ;;  %v1640_v0 = vld [vmem:[%s2483_s0 + $0xc] sm:$0xf] }
  0x26   :  { %861 = vmatpush.bf16.msrb.mxu0 %v1816_v5  ;;  %959 = vmatpush.bf16.msrb.mxu3 %v1725_v39  ;;  %v1195_v5 = vld [vmem:[%s2483_s0 + $0x1c] sm:$0xf0]  ;;  %v1685_v39 = vld [vmem:[%s2483_s0 + $0x170] sm:$0xf0] }
  0x28   :  { %1106 = vmatpush.bf16.msrb.mxu2 %v1749_v40  ;;  %1057 = vmatpush.bf16.msrb.mxu1 %v1741_v41  ;;  %v1681_v40 = vld [vmem:[%s2483_s0 + $0x154] sm:$0xf]  ;;  %v1363_v41 = vld [vmem:[%s2483_s0 + $0x16c] sm:$0xf0] }
  0x29   :  { %v1366_v45 = vor.u32 %v1681_v40, %v1363_v41 }
  0x2a   :  { %862 = vmatpush.bf16.msrb.mxu0 %v1831_v8  ;;  %960 = vmatpush.bf16.msrb.mxu3 %v1724_v42  ;;  %v1671_v8 = vld [vmem:[%s2483_s0 + $0x100] sm:$0xf0]  ;;  %v1733_v42 = vld [vmem:[%s2482_s1 + $0x130] sm:$0xff] }
  0x2b   :  { %v1314_v15 = vor.u32 %v1671_v8, %v1313_v6  ;;  %v1217_v6 = vld [vmem:[%s2483_s0 + $0x18] sm:$0xf]  ;;  %v1645_v8 = vld [vmem:[%s2483_s0 + $0x30] sm:$0xf0] }
  0x2c   :  { %1107 = vmatpush.bf16.msrb.mxu2 %v1748_v43  ;;  %1058 = vmatpush.bf16.msrb.mxu1 %v1740_v44 }
  0x2e   :  { %863 = vmatpush.bf16.msrb.mxu0 %v1846_v11  ;;  %961 = vmatpush.bf16.msrb.mxu3 %v1723_v46  ;;  %v1307_v11 = vld [vmem:[%s2483_s0 + $0xfc] sm:$0xf0]  ;;  %v1732_v46 = vld [vmem:[%s2482_s1 + $0x128] sm:$0xff] }
  0x30   :  { %1108 = vmatpush.bf16.msrb.mxu2 %v1747_v54  ;;  %1059 = vmatpush.bf16.msrb.mxu1 %v1739_v55  ;;  %v1692_v54 = vld [vmem:[%s2483_s0 + $0x1a8] sm:$0xf0] }
  0x31   :  { %824 = vmatmul.bf16.gmra.mxu0 %v1222_v56  ;;  %834 = vmatmul.bf16.gmra.mxu3 %v1278_v57  ;;  %v1688_v55 = vld [vmem:[%s2483_s0 + $0x18c] sm:$0xf]  ;;  %v1391_v56 = vld [vmem:[%s2483_s0 + $0x1a4] sm:$0xf0]  ;;  %v1729_v57 = vld [vmem:[%s2482_s1 + $0x110] sm:$0xff] }
  0x32   :  { %864 = vmatpush.bf16.msrb.mxu0 %v1861_v14  ;;  %962 = vmatpush.bf16.msrb.mxu3 %v1722_v60  ;;  %v1198_v14 = vor.u32 %v1639_v3, %v1195_v5  ;;  %v1398_v60 = vor.u32 %v1692_v54, %v1397_v53  ;;  %v1209_v3 = vld [vmem:[%s2483_s0 + $0x10] sm:$0xf]  ;;  %v1644_v5 = vld [vmem:[%s2483_s0 + $0x28] sm:$0xf0] }
  0x33   :  { %932 = vmatmul.bf16.gmra.mxu2 %v1286_v58  ;;  %883 = vmatmul.bf16.gmra.mxu1 %v1282_v59  ;;  %v1390_v58 = vor.u32 %v1691_v50, %v1389_v49  ;;  %v1230_v59 = vor.u32 %v1650_v52, %v1229_v51  ;;  %v1666_v49 = vld [vmem:[%s2483_s0 + $0xd8] sm:$0xf0]  ;;  %v1295_v51 = vld [vmem:[%s2483_s0 + $0xd4] sm:$0xf0] }
  0x34   :  { %1109 = vmatpush.bf16.msrb.mxu2 %v1746_v61  ;;  %1060 = vmatpush.bf16.msrb.mxu1 %v1738_v62  ;;  %v1394_v61 = vor.u32 %v1688_v55, %v1391_v56  ;;  %v1728_v62 = vld [vmem:[%s2482_s1 + $0x108] sm:$0xff]  ;;  %v1662_v50 = vld [vmem:[%s2483_s0 + $0xbc] sm:$0xf] }
  0x36   :  { %865 = vmatpush.bf16.msrb.mxu0 %v1876_v17  ;;  %963 = vmatpush.bf16.msrb.mxu3 %v1721_v63  ;;  %v1310_v17 = vor.u32 %v1667_v9, %v1307_v11  ;;  %v1727_v63 = vld [vmem:[%s2482_s1 + $0x100] sm:$0xff]  ;;  %v1641_v9 = vld [vmem:[%s2483_s0 + $0x14] sm:$0xf]  ;;  %v1211_v11 = vld [vmem:[%s2483_s0 + $0x2c] sm:$0xf0] }
  0x38   :  { %1110 = vmatpush.bf16.msrb.mxu2 %v1745_v18  ;;  %v1647_v18 = vld [vmem:[%s2483_s0 + $0x44] sm:$0xf] }
  0x3a   :  { %866 = vmatpush.bf16.msrb.mxu0 %v1891_v20  ;;  %v1737_v20 = vld [vmem:[%s2482_s1 + $0x150] sm:$0xff] }
  0x3b   :  { %1061 = vmatpush.bf16.msrb.mxu1 %v1737_v20  ;;  %v1231_v20 = vld [vmem:[%s2483_s0 + $0x5c] sm:$0xf0] }
  0x3c   :  { %1111 = vmatpush.bf16.msrb.mxu2 %v1744_v21  ;;  %v1651_v21 = vld [vmem:[%s2483_s0 + $0x60] sm:$0xf0]  ;;  %v1234_v25 = vor.u32 %v1647_v18, %v1231_v20 }
  0x3e   :  { %867 = vmatpush.bf16.msrb.mxu0 %v1904_v23  ;;  %v1333_v23 = vld [vmem:[%s2483_s0 + $0x118] sm:$0xf] }
  0x41   :  { %839 = vmatmul.bf16.gmra.mxu3 %v1306_v12  ;;  %868 = vmatmul.bf16.vlgmr.msrb.gmra.mxu0 %v1198_v14  ;;  %v1206_v12 = vor.u32 %v1640_v0, %v1203_v2  ;;  %v1210_v14 = vor.u32 %v1644_v5, %v1209_v3 }
  0x42   :  { %909 = vmatpush.bf16.msra.mxu0 %v1796_v1  ;;  %v1720_v1 = vld [vmem:[%s2482_s1 + $0xc8] sm:$0xff] }
  0x43   :  { %937 = vmatmul.bf16.gmra.mxu2 %v1314_v15  ;;  %888 = vmatmul.bf16.gmra.mxu1 %v1310_v17  ;;  %v1218_v15 = vor.u32 %v1645_v8, %v1217_v6  ;;  %v1214_v17 = vor.u32 %v1641_v9, %v1211_v11  ;;  %v1668_v6 = vld [vmem:[%s2483_s0 + $0xec] sm:$0xf]  ;;  %v1315_v8 = vld [vmem:[%s2483_s0 + $0x104] sm:$0xf0]  ;;  %v1321_v9 = vld [vmem:[%s2483_s0 + $0xf0] sm:$0xf] }
  0x44   :  { %964 = vmatpush.bf16.msrb.mxu3 %v1720_v1  ;;  %v1237_v1 = vld [vmem:[%s2483_s0 + $0x48] sm:$0xf]  ;;  %v1672_v11 = vld [vmem:[%s2483_s0 + $0x108] sm:$0xf0] }
  0x45   :  { %v1238_v26 = vor.u32 %v1651_v21, %v1237_v1  ;;  %v1318_v21 = vor.u32 %v1668_v6, %v1315_v8 }
  0x46   :  { %910 = vmatpush.bf16.msra.mxu0 %v1811_v4  ;;  %v1677_v4 = vld [vmem:[%s2483_s0 + $0x130] sm:$0xf0] }
  0x47   :  { %v1334_v29 = vor.u32 %v1677_v4, %v1333_v23  ;;  %v1245_v23 = vld [vmem:[%s2483_s0 + $0x50] sm:$0xf]  ;;  %v1652_v4 = vld [vmem:[%s2483_s0 + $0x68] sm:$0xf0] }
  0x48   :  { %965 = vmatpush.bf16.msrb.mxu3 %v1719_v33  ;;  %v1246_v27 = vor.u32 %v1652_v4, %v1245_v23  ;;  %v1659_v33 = vld [vmem:[%s2483_s0 + $0xa0] sm:$0xf0]  ;;  %v1322_v23 = vor.u32 %v1672_v11, %v1321_v9 }
  0x4a   :  { %911 = vmatpush.bf16.msra.mxu0 %v1826_v7  ;;  %v1223_v7 = vld [vmem:[%s2483_s0 + $0x54] sm:$0xf0] }
  0x4b   :  { %v1226_v30 = vor.u32 %v1646_v24, %v1223_v7  ;;  %v1648_v24 = vld [vmem:[%s2483_s0 + $0x4c] sm:$0xf]  ;;  %v1239_v7 = vld [vmem:[%s2483_s0 + $0x64] sm:$0xf0] }
  0x4c   :  { %v1242_v28 = vor.u32 %v1648_v24, %v1239_v7 }
  0x4e   :  { %912 = vmatpush.bf16.msra.mxu0 %v1841_v10  ;;  %v1736_v10 = vld [vmem:[%s2482_s1 + $0x148] sm:$0xff] }
  0x4f   :  { %1062 = vmatpush.bf16.msrb.mxu1 %v1736_v10  ;;  %v1273_v10 = vld [vmem:[%s2483_s0 + $0x88] sm:$0xf] }
  0x51   :  { %844 = vmatmul.bf16.gmra.mxu3 %v1334_v29  ;;  %873 = vmatmul.bf16.gmra.mxu0 %v1226_v30  ;;  %v1654_v29 = vld [vmem:[%s2483_s0 + $0x7c] sm:$0xf]  ;;  %v1259_v30 = vld [vmem:[%s2483_s0 + $0x94] sm:$0xf0] }
  0x52   :  { %913 = vmatpush.bf16.msra.mxu0 %v1856_v13  ;;  %v1743_v13 = vld [vmem:[%s2482_s1 + $0x180] sm:$0xff] }
  0x53   :  { %942 = vmatmul.bf16.gmra.mxu2 %v1342_v31  ;;  %893 = vmatmul.bf16.gmra.mxu1 %v1338_v32  ;;  %v1265_v31 = vld [vmem:[%s2483_s0 + $0x80] sm:$0xf]  ;;  %v1658_v32 = vld [vmem:[%s2483_s0 + $0x98] sm:$0xf0] }
  0x54   :  { %1112 = vmatpush.bf16.msrb.mxu2 %v1743_v13  ;;  %1063 = vmatpush.bf16.msrb.mxu1 %v1735_v35  ;;  %v1655_v13 = vld [vmem:[%s2483_s0 + $0x84] sm:$0xf]  ;;  %v1262_v35 = vor.u32 %v1654_v29, %v1259_v30 }
  0x56   :  { %914 = vmatpush.bf16.msra.mxu0 %v1871_v16  ;;  %v1361_v16 = vld [vmem:[%s2483_s0 + $0x150] sm:$0xf] }
  0x57   :  { %v1362_v43 = vor.u32 %v1684_v36, %v1361_v16  ;;  %v1266_v16 = vor.u32 %v1658_v32, %v1265_v31 }
  0x5a   :  { %915 = vmatpush.bf16.msra.mxu0 %v1886_v19  ;;  %v1201_v19 = vld [vmem:[%s2483_s0 + $0x8] sm:$0xf] }
  0x5b   :  { %v1202_v44 = vor.u32 %v1643_v37, %v1201_v19  ;;  %v1274_v19 = vor.u32 %v1659_v33, %v1273_v10  ;;  %v1675_v10 = vld [vmem:[%s2483_s0 + $0x124] sm:$0xf]  ;;  %v1343_v33 = vld [vmem:[%s2483_s0 + $0x13c] sm:$0xf0] }
  0x5e   :  { %916 = vmatpush.bf16.msra.mxu0 %v1899_v22  ;;  %v1370_v22 = vor.u32 %v1685_v39, %v1369_v38 }
  0x61   :  { %849 = vmatmul.bf16.gmra.mxu3 %v1362_v43  ;;  %917 = vmatmul.bf16.vlgmr.msra.gmra.mxu0 %v1202_v44 }
  0x62   :  { %1007 = vmatpush.bf16.msrb.mxu0 %v1734_v34  ;;  %v1267_v34 = vld [vmem:[%s2483_s0 + $0x9c] sm:$0xf0] }
  0x63   :  { %947 = vmatmul.bf16.gmra.mxu2 %v1370_v22  ;;  %898 = vmatmul.bf16.gmra.mxu1 %v1366_v45  ;;  %v1270_v37 = vor.u32 %v1655_v13, %v1267_v34  ;;  %v1661_v22 = vld [vmem:[%s2483_s0 + $0xb4] sm:$0xf]  ;;  %v1287_v45 = vld [vmem:[%s2483_s0 + $0xcc] sm:$0xf0]  ;;  %v1349_v13 = vld [vmem:[%s2483_s0 + $0x128] sm:$0xf] }
  0x64   :  { %v1290_v55 = vor.u32 %v1661_v22, %v1287_v45  ;;  %v1679_v34 = vld [vmem:[%s2483_s0 + $0x140] sm:$0xf0] }
  0x66   :  { %1008 = vmatpush.bf16.msrb.mxu0 %v1733_v42 }
  0x6a   :  { %1009 = vmatpush.bf16.msrb.mxu0 %v1732_v46  ;;  %v1293_v46 = vld [vmem:[%s2483_s0 + $0xb8] sm:$0xf] }
  0x6e   :  { %1010 = vmatpush.bf16.msrb.mxu0 %v1731_v47  ;;  %v1665_v47 = vld [vmem:[%s2483_s0 + $0xd0] sm:$0xf0] }
  0x6f   :  { %v1294_v56 = vor.u32 %v1665_v47, %v1293_v46 }
  0x71   :  { %854 = vmatmul.bf16.gmra.mxu3 %v1390_v58  ;;  %922 = vmatmul.bf16.gmra.mxu0 %v1230_v59  ;;  %v1298_v59 = vor.u32 %v1662_v50, %v1295_v51 }
  0x72   :  { %1011 = vmatpush.bf16.msrb.mxu0 %v1730_v48  ;;  %v1301_v48 = vld [vmem:[%s2483_s0 + $0xc0] sm:$0xf] }
  0x73   :  { %952 = vmatmul.bf16.gmra.mxu2 %v1398_v60  ;;  %903 = vmatmul.bf16.gmra.mxu1 %v1394_v61  ;;  %v1302_v58 = vor.u32 %v1666_v49, %v1301_v48 }
  0x76   :  { %1012 = vmatpush.bf16.msrb.mxu0 %v1729_v57 }
  0x7a   :  { %1013 = vmatpush.bf16.msrb.mxu0 %v1728_v62 }
  0x7e   :  { %1014 = vmatpush.bf16.msrb.mxu0 %v1727_v63 }
  0x81   :  { %966 = vmatmul.bf16.vlgmr.msrb.gmra.mxu3 %v1206_v12  ;;  %1015 = vmatmul.bf16.vlgmr.msrb.gmra.mxu0 %v1210_v14  ;;  %v1329_v12 = vld [vmem:[%s2483_s0 + $0xf8] sm:$0xf]  ;;  %v1673_v14 = vld [vmem:[%s2483_s0 + $0x110] sm:$0xf0] }
  0x82   :  { %v1330_v24 = vor.u32 %v1673_v14, %v1329_v12 }
  0x83   :  { %1113 = vmatmul.bf16.vlgmr.msrb.gmra.mxu2 %v1218_v15  ;;  %1064 = vmatmul.bf16.vlgmr.msrb.gmra.mxu1 %v1214_v17  ;;  %v1669_v15 = vld [vmem:[%s2483_s0 + $0xf4] sm:$0xf]  ;;  %v1323_v17 = vld [vmem:[%s2483_s0 + $0x10c] sm:$0xf0] }
  0x84   :  { %v1326_v7 = vor.u32 %v1669_v15, %v1323_v17 }
  0x91   :  { %971 = vmatmul.bf16.gmra.mxu3 %v1234_v25  ;;  %1020 = vmatmul.bf16.gmra.mxu0 %v1238_v26 }
  0x93   :  { %1118 = vmatmul.bf16.gmra.mxu2 %v1246_v27  ;;  %1069 = vmatmul.bf16.gmra.mxu1 %v1242_v28 }
  0x9e   :  { %v2238_v36 = vpop.f32.mrf.mxu0 }
  0xa0   :  { %v879_v38 = vpop.f32.mrf.mxu1 }
  0xa1   :  { %976 = vmatmul.bf16.gmra.mxu3 %v1262_v35  ;;  %1025 = vmatmul.bf16.gmra.mxu0 %v1266_v16  ;;  %v1357_v35 = vld [vmem:[%s2483_s0 + $0x130] sm:$0xf]  ;;  %v1680_v16 = vld [vmem:[%s2483_s0 + $0x148] sm:$0xf0] }
  0xa2   :  { %v1358_v45 = vor.u32 %v1680_v16, %v1357_v35 }
  0xa3   :  { %1123 = vmatmul.bf16.gmra.mxu2 %v1274_v19  ;;  %1074 = vmatmul.bf16.gmra.mxu1 %v1270_v37  ;;  %v1676_v19 = vld [vmem:[%s2483_s0 + $0x12c] sm:$0xf]  ;;  %v1351_v37 = vld [vmem:[%s2483_s0 + $0x144] sm:$0xf0] }
  0xa4   :  { %v830_v39 = vpop.f32.mrf.mxu3  ;;  %v1354_v46 = vor.u32 %v1676_v19, %v1351_v37 }
  0xa5   :  { %v880_v40 = vadd.f32 %v879_v38, %v830_v39 }
  0xa6   :  { %v928_v41 = vpop.f32.mrf.mxu2  ;;  %v2240_v42 = vpop.f32.mrf.mxu0 }
  0xa7   :  { %v2242_v43 = vadd.f32 %v928_v41, %v880_v40  ;;  %v1346_v41 = vor.u32 %v1675_v10, %v1343_v33  ;;  %v1694_v10 = vld [vmem:[%s2483_s0 + $0x1b8] sm:$0xf0] }
  0xa8   :  { %v881_v44 = vpop.f32.mrf.mxu1  ;;  %v1690_v33 = vld [vmem:[%s2483_s0 + $0x19c] sm:$0xf] }
  0xac   :  { %v832_v52 = vpop.f32.mrf.mxu3 }
  0xad   :  { %v882_v53 = vadd.f32 %v881_v44, %v832_v52  ;;  %v1350_v44 = vor.u32 %v1679_v34, %v1349_v13  ;;  %v1407_v13 = vld [vmem:[%s2483_s0 + $0x1b4] sm:$0xf0] }
  0xae   :  { %v930_v54 = vpop.f32.mrf.mxu2  ;;  %v2268_v57 = vpop.f32.mrf.mxu0 }
  0xaf   :  { %v2270_v60 = vadd.f32 %v930_v54, %v882_v53 }
  0xb0   :  { %v884_v61 = vpop.f32.mrf.mxu1 }
  0xb1   :  { %981 = vmatmul.bf16.gmra.mxu3 %v1290_v55  ;;  %1030 = vmatmul.bf16.gmra.mxu0 %v1294_v56  ;;  %v1682_v55 = vld [vmem:[%s2483_s0 + $0x15c] sm:$0xf]  ;;  %v1371_v56 = vld [vmem:[%s2483_s0 + $0x174] sm:$0xf0] }
  0xb2   :  { %v1374_v9 = vor.u32 %v1682_v55, %v1371_v56 }
  0xb3   :  { %1128 = vmatmul.bf16.gmra.mxu2 %v1302_v58  ;;  %1079 = vmatmul.bf16.gmra.mxu1 %v1298_v59  ;;  %v1377_v58 = vld [vmem:[%s2483_s0 + $0x160] sm:$0xf]  ;;  %v1686_v59 = vld [vmem:[%s2483_s0 + $0x178] sm:$0xf0] }
  0xb4   :  { %v835_v62 = vpop.f32.mrf.mxu3  ;;  %v1378_v11 = vor.u32 %v1686_v59, %v1377_v58 }
  0xb5   :  { %v885_v63 = vadd.f32 %v884_v61, %v835_v62  ;;  %v1385_v61 = vld [vmem:[%s2483_s0 + $0x168] sm:$0xf]  ;;  %v1687_v62 = vld [vmem:[%s2483_s0 + $0x180] sm:$0xf0] }
  0xb6   :  { %v933_v0 = vpop.f32.mrf.mxu2  ;;  %v2272_v2 = vpop.f32.mrf.mxu0  ;;  %v1386_v14 = vor.u32 %v1687_v62, %v1385_v61 }
  0xb7   :  { %v2274_v3 = vadd.f32 %v933_v0, %v885_v63  ;;  %v1683_v63 = vld [vmem:[%s2483_s0 + $0x164] sm:$0xf]  ;;  %v1379_v0 = vld [vmem:[%s2483_s0 + $0x17c] sm:$0xf0] }
  0xb8   :  { %v886_v5 = vpop.f32.mrf.mxu1  ;;  %v1382_v15 = vor.u32 %v1683_v63, %v1379_v0 }
  0xbc   :  { %v837_v18 = vpop.f32.mrf.mxu3 }
  0xbd   :  { %v887_v20 = vadd.f32 %v886_v5, %v837_v18 }
  0xbe   :  { %v935_v1 = vpop.f32.mrf.mxu2  ;;  %v2300_v4 = vpop.f32.mrf.mxu0 }
  0xbf   :  { %v2302_v25 = vadd.f32 %v935_v1, %v887_v20  ;;  %v870_v62 = vadd.f32 %v2300_v4, %v2238_v36 }
  0xc0   :  { %v889_v26 = vpop.f32.mrf.mxu1 }
  0xc1   :  { %986 = vmatmul.bf16.gmra.mxu3 %v1318_v21  ;;  %1035 = vmatmul.bf16.gmra.mxu0 %v1322_v23 }
  0xc3   :  { %1133 = vmatmul.bf16.gmra.mxu2 %v1330_v24  ;;  %1084 = vmatmul.bf16.gmra.mxu1 %v1326_v7 }
  0xc4   :  { %v840_v27 = vpop.f32.mrf.mxu3 }
  0xc5   :  { %v890_v28 = vadd.f32 %v889_v26, %v840_v27  ;;  %v1689_v26 = vld [vmem:[%s2483_s0 + $0x194] sm:$0xf]  ;;  %v1399_v27 = vld [vmem:[%s2483_s0 + $0x1ac] sm:$0xf0] }
  0xc6   :  { %v938_v29 = vpop.f32.mrf.mxu2  ;;  %v2304_v30 = vpop.f32.mrf.mxu0  ;;  %v1402_v19 = vor.u32 %v1689_v26, %v1399_v27 }
  0xc7   :  { %v2306_v31 = vadd.f32 %v938_v29, %v890_v28  ;;  %v1405_v28 = vld [vmem:[%s2483_s0 + $0x198] sm:$0xf]  ;;  %v1693_v29 = vld [vmem:[%s2483_s0 + $0x1b0] sm:$0xf0] }
  0xc8   :  { %v891_v32 = vpop.f32.mrf.mxu1  ;;  %v1406_v37 = vor.u32 %v1693_v29, %v1405_v28 }
  0xcc   :  { %v842_v38 = vpop.f32.mrf.mxu3 }
  0xcd   :  { %v892_v39 = vadd.f32 %v891_v32, %v842_v38  ;;  %v1413_v32 = vld [vmem:[%s2483_s0 + $0x1a0] sm:$0xf] }
  0xce   :  { %v940_v40 = vpop.f32.mrf.mxu2  ;;  %v2332_v22 = vpop.f32.mrf.mxu0 }
  0xcf   :  { %v2334_v47 = vadd.f32 %v940_v40, %v892_v39  ;;  %v1414_v39 = vor.u32 %v1694_v10, %v1413_v32  ;;  %v1410_v40 = vor.u32 %v1690_v33, %v1407_v13 }
  0xd0   :  { %v894_v48 = vpop.f32.mrf.mxu1 }
  0xd1   :  { %991 = vmatmul.bf16.gmra.mxu3 %v1346_v41  ;;  %1040 = vmatmul.bf16.gmra.mxu0 %v1350_v44 }
  0xd3   :  { %1138 = vmatmul.bf16.gmra.mxu2 %v1358_v45  ;;  %1089 = vmatmul.bf16.gmra.mxu1 %v1354_v46 }
  0xd4   :  { %v845_v49 = vpop.f32.mrf.mxu3 }
  0xd5   :  { %v895_v50 = vadd.f32 %v894_v48, %v845_v49 }
  0xd6   :  { %v943_v51 = vpop.f32.mrf.mxu2  ;;  %v2336_v52 = vpop.f32.mrf.mxu0 }
  0xd7   :  { %v2338_v53 = vadd.f32 %v943_v51, %v895_v50 }
  0xd8   :  { %v896_v54 = vpop.f32.mrf.mxu1 }
  0xdc   :  { %v847_v5 = vpop.f32.mrf.mxu3 }
  0xdd   :  { %v897_v6 = vadd.f32 %v896_v54, %v847_v5 }
  0xde   :  { %v945_v8 = vpop.f32.mrf.mxu2  ;;  %v918_v12 = vpop.f32.mrf.mxu0 }
  0xdf   :  { %v2364_v17 = vadd.f32 %v945_v8, %v897_v6  ;;  %v919_v63 = vadd.f32 %v918_v12, %v870_v62  ;;  %v875_v12 = vadd.f32 %v2332_v22, %v2268_v57 }
  0xe0   :  { %v899_v18 = vpop.f32.mrf.mxu1 }
  0xe1   :  { %996 = vmatmul.bf16.gmra.mxu3 %v1374_v9  ;;  %1045 = vmatmul.bf16.gmra.mxu0 %v1378_v11 }
  0xe3   :  { %1143 = vmatmul.bf16.gmra.mxu2 %v1386_v14  ;;  %1094 = vmatmul.bf16.gmra.mxu1 %v1382_v15  ;;  %v872_v14 = vadd.f32 %v2304_v30, %v2240_v42 }
  0xe4   :  { %v850_v20 = vpop.f32.mrf.mxu3 }
  0xe5   :  { %v900_v1 = vadd.f32 %v899_v18, %v850_v20 }
  0xe6   :  { %v948_v21 = vpop.f32.mrf.mxu2  ;;  %v920_v23 = vpop.f32.mrf.mxu0 }
  0xe7   :  { %v2366_v24 = vadd.f32 %v948_v21, %v900_v1  ;;  %v921_v18 = vadd.f32 %v920_v23, %v872_v14 }
  0xe8   :  { %v901_v7 = vpop.f32.mrf.mxu1 }
  0xec   :  { %v852_v34 = vpop.f32.mrf.mxu3 }
  0xed   :  { %v902_v35 = vadd.f32 %v901_v7, %v852_v34 }
  0xee   :  { %v950_v16 = vpop.f32.mrf.mxu2  ;;  %v923_v38 = vpop.f32.mrf.mxu0 }
  0xef   :  { %v2392_v41 = vadd.f32 %v950_v16, %v902_v35  ;;  %v924_v30 = vadd.f32 %v923_v38, %v875_v12  ;;  %v877_v35 = vadd.f32 %v2336_v52, %v2272_v2 }
  0xf0   :  { %v904_v44 = vpop.f32.mrf.mxu1 }
  0xf1   :  { %1001 = vmatmul.bf16.gmra.mxu3 %v1402_v19  ;;  %1050 = vmatmul.bf16.gmra.mxu0 %v1406_v37 }
  0xf3   :  { %1148 = vmatmul.bf16.gmra.mxu2 %v1414_v39  ;;  %1099 = vmatmul.bf16.gmra.mxu1 %v1410_v40 }
  0xf4   :  { %v855_v45 = vpop.f32.mrf.mxu3 }
  0xf5   :  { %v905_v46 = vadd.f32 %v904_v44, %v855_v45 }
  0xf6   :  { %v953_v48 = vpop.f32.mrf.mxu2  ;;  %v925_v49 = vpop.f32.mrf.mxu0 }
  0xf7   :  { %v2394_v50 = vadd.f32 %v953_v48, %v905_v46  ;;  %v926_v57 = vadd.f32 %v925_v49, %v877_v35 }
  0xf8   :  { %v906_v51 = vpop.f32.mrf.mxu1 }
  0xfc   :  { %v857_v54 = vpop.f32.mrf.mxu3 }
  0xfd   :  { %v907_v55 = vadd.f32 %v906_v51, %v857_v54 }
  0xfe   :  { %v955_v56 = vpop.f32.mrf.mxu2  ;;  %v1016_v58 = vpop.f32.mrf.mxu0 }
  0xff   :  { %v2396_v59 = vadd.f32 %v955_v56, %v907_v55 }
 0x100   :  { %v1065_v61 = vpop.f32.mrf.mxu1 }
 0x104   :  { %v967_v0 = vpop.f32.mrf.mxu3 }
 0x105   :  { %v968_v5 = vadd.f32 %v967_v0, %v919_v63 }
 0x106   :  { %v1114_v6 = vpop.f32.mrf.mxu2  ;;  %v1018_v8 = vpop.f32.mrf.mxu0 }
 0x107   :  { %v1017_v9 = vadd.f32 %v1016_v58, %v968_v5 }
 0x108   :  { %v1067_v11 = vpop.f32.mrf.mxu1 }
 0x109   :  { %v1066_v15 = vadd.f32 %v1065_v61, %v1017_v9 }
 0x10b   :  { %v1115_v20 = vadd.f32 %v1114_v6, %v1066_v15 }
 0x10c   :  { %v969_v1 = vpop.f32.mrf.mxu3 }
 0x10d   :  { %v1154_v21 = vmax.f32 %v1115_v20, 0.0  ;;  %v970_v7 = vadd.f32 %v969_v1, %v921_v18 }
 0x10e   :  { %v1116_v26 = vpop.f32.mrf.mxu2  ;;  %v1021_v27 = vpop.f32.mrf.mxu0 }
 0x10f   :  { %1171 = vst.msk [vmem:[%s2484_s2] sm:$0xff] %vm1170_vm0, %v1154_v21  ;;  %v1019_v36 = vadd.f32 %v1018_v8, %v970_v7 }
 0x110   :  { %v1070_v4 = vpop.f32.mrf.mxu1 }
 0x111   :  { %v1068_v42 = vadd.f32 %v1067_v11, %v1019_v36 }
 0x113   :  { %v1117_v23 = vadd.f32 %v1116_v26, %v1068_v42 }
 0x114   :  { %v972_v28 = vpop.f32.mrf.mxu3 }
 0x115   :  { %v1155_v29 = vmax.f32 %v1117_v23, 0.0  ;;  %v973_v32 = vadd.f32 %v972_v28, %v924_v30 }
 0x116   :  { %v1119_v10 = vpop.f32.mrf.mxu2  ;;  %v1023_v33 = vpop.f32.mrf.mxu0 }
 0x117   :  { %1172 = vst.msk [vmem:[%s2484_s2 + $0x8] sm:$0xff] %vm1170_vm0, %v1155_v29  ;;  %v1022_v13 = vadd.f32 %v1021_v27, %v973_v32 }
 0x118   :  { %v1072_v34 = vpop.f32.mrf.mxu1 }
 0x119   :  { %v1071_v16 = vadd.f32 %v1070_v4, %v1022_v13 }
 0x11b   :  { %v1120_v22 = vadd.f32 %v1119_v10, %v1071_v16 }
 0x11c   :  { %v974_v19 = vpop.f32.mrf.mxu3 }
 0x11d   :  { %v1156_v37 = vmax.f32 %v1120_v22, 0.0  ;;  %v975_v38 = vadd.f32 %v974_v19, %v926_v57 }
 0x11e   :  { %v1121_v39 = vpop.f32.mrf.mxu2  ;;  %v1026_v40 = vpop.f32.mrf.mxu0 }
 0x11f   :  { %1173 = vst.msk [vmem:[%s2484_s2 + $0x10] sm:$0xff] %vm1170_vm0, %v1156_v37  ;;  %v1024_v44 = vadd.f32 %v1023_v33, %v975_v38 }
 0x120   :  { %v1075_v45 = vpop.f32.mrf.mxu1 }
 0x121   :  { %v1073_v46 = vadd.f32 %v1072_v34, %v1024_v44 }
 0x123   :  { %v1122_v48 = vadd.f32 %v1121_v39, %v1073_v46 }
 0x124   :  { %v977_v51 = vpop.f32.mrf.mxu3 }
 0x125   :  { %v1157_v54 = vmax.f32 %v1122_v48, 0.0  ;;  %v978_v2 = vadd.f32 %v977_v51, %v2242_v43 }
 0x126   :  { %v1124_v52 = vpop.f32.mrf.mxu2  ;;  %v1028_v49 = vpop.f32.mrf.mxu0 }
 0x127   :  { %1174 = vst.msk [vmem:[%s2484_s2 + $0x18] sm:$0xff] %vm1170_vm0, %v1157_v54  ;;  %v1027_v55 = vadd.f32 %v1026_v40, %v978_v2 }
 0x128   :  { %v1077_v56 = vpop.f32.mrf.mxu1 }
 0x129   :  { %v1076_v58 = vadd.f32 %v1075_v45, %v1027_v55 }
 0x12b   :  { %v1125_v61 = vadd.f32 %v1124_v52, %v1076_v58 }
 0x12c   :  { %v979_v62 = vpop.f32.mrf.mxu3 }
 0x12d   :  { %v1158_v63 = vmax.f32 %v1125_v61, 0.0  ;;  %v980_v0 = vadd.f32 %v979_v62, %v2270_v60 }
 0x12e   :  { %v1126_v5 = vpop.f32.mrf.mxu2  ;;  %v1031_v6 = vpop.f32.mrf.mxu0 }
 0x12f   :  { %1175 = vst.msk [vmem:[%s2484_s2 + $0x20] sm:$0xff] %vm1170_vm0, %v1158_v63  ;;  %v1029_v43 = vadd.f32 %v1028_v49, %v980_v0 }
 0x130   :  { %v1080_v8 = vpop.f32.mrf.mxu1 }
 0x131   :  { %v1078_v9 = vadd.f32 %v1077_v56, %v1029_v43 }
 0x133   :  { %v1127_v11 = vadd.f32 %v1126_v5, %v1078_v9 }
 0x134   :  { %v982_v14 = vpop.f32.mrf.mxu3 }
 0x135   :  { %v1159_v15 = vmax.f32 %v1127_v11, 0.0  ;;  %v983_v18 = vadd.f32 %v982_v14, %v2274_v3 }
 0x136   :  { %v1129_v20 = vpop.f32.mrf.mxu2  ;;  %v1033_v1 = vpop.f32.mrf.mxu0 }
 0x137   :  { %1176 = vst.msk [vmem:[%s2484_s2 + $0x28] sm:$0xff] %vm1170_vm0, %v1159_v15  ;;  %v1032_v60 = vadd.f32 %v1031_v6, %v983_v18 }
 0x138   :  { %v1082_v21 = vpop.f32.mrf.mxu1 }
 0x139   :  { %v1081_v7 = vadd.f32 %v1080_v8, %v1032_v60 }
 0x13b   :  { %v1130_v26 = vadd.f32 %v1129_v20, %v1081_v7 }
 0x13c   :  { %v984_v27 = vpop.f32.mrf.mxu3 }
 0x13d   :  { %v1160_v36 = vmax.f32 %v1130_v26, 0.0  ;;  %v985_v4 = vadd.f32 %v984_v27, %v2302_v25 }
 0x13e   :  { %v1131_v12 = vpop.f32.mrf.mxu2  ;;  %v1036_v42 = vpop.f32.mrf.mxu0 }
 0x13f   :  { %1177 = vst.msk [vmem:[%s2484_s2 + $0x30] sm:$0xff] %vm1170_vm0, %v1160_v36  ;;  %v1034_v3 = vadd.f32 %v1033_v1, %v985_v4 }
 0x140   :  { %v1085_v30 = vpop.f32.mrf.mxu1 }
 0x141   :  { %v1083_v23 = vadd.f32 %v1082_v21, %v1034_v3 }
 0x143   :  { %v1132_v28 = vadd.f32 %v1131_v12, %v1083_v23 }
 0x144   :  { %v987_v29 = vpop.f32.mrf.mxu3 }
 0x145   :  { %v1161_v32 = vmax.f32 %v1132_v28, 0.0  ;;  %v988_v10 = vadd.f32 %v987_v29, %v2306_v31 }
 0x146   :  { %v1134_v33 = vpop.f32.mrf.mxu2  ;;  %v1038_v13 = vpop.f32.mrf.mxu0 }
 0x147   :  { %1178 = vst.msk [vmem:[%s2484_s2 + $0x38] sm:$0xff] %vm1170_vm0, %v1161_v32  ;;  %v1037_v25 = vadd.f32 %v1036_v42, %v988_v10 }
 0x148   :  { %v1087_v34 = vpop.f32.mrf.mxu1 }
 0x149   :  { %v1086_v35 = vadd.f32 %v1085_v30, %v1037_v25 }
 0x14b   :  { %v1135_v16 = vadd.f32 %v1134_v33, %v1086_v35 }
 0x14c   :  { %v989_v57 = vpop.f32.mrf.mxu3 }
 0x14d   :  { %v1162_v22 = vmax.f32 %v1135_v16, 0.0  ;;  %v990_v19 = vadd.f32 %v989_v57, %v2334_v47 }
 0x14e   :  { %v1136_v37 = vpop.f32.mrf.mxu2  ;;  %v1041_v38 = vpop.f32.mrf.mxu0 }
 0x14f   :  { %1179 = vst.msk [vmem:[%s2484_s2 + $0x40] sm:$0xff] %vm1170_vm0, %v1162_v22  ;;  %v1039_v31 = vadd.f32 %v1038_v13, %v990_v19 }
 0x150   :  { %v1090_v39 = vpop.f32.mrf.mxu1 }
 0x151   :  { %v1088_v40 = vadd.f32 %v1087_v34, %v1039_v31 }
 0x153   :  { %v1137_v44 = vadd.f32 %v1136_v37, %v1088_v40 }
 0x154   :  { %v992_v45 = vpop.f32.mrf.mxu3 }
 0x155   :  { %v1163_v46 = vmax.f32 %v1137_v44, 0.0  ;;  %v993_v48 = vadd.f32 %v992_v45, %v2338_v53 }
 0x156   :  { %v1139_v51 = vpop.f32.mrf.mxu2  ;;  %v1043_v54 = vpop.f32.mrf.mxu0 }
 0x157   :  { %1180 = vst.msk [vmem:[%s2484_s2 + $0x48] sm:$0xff] %vm1170_vm0, %v1163_v46  ;;  %v1042_v47 = vadd.f32 %v1041_v38, %v993_v48 }
 0x158   :  { %v1092_v2 = vpop.f32.mrf.mxu1 }
 0x159   :  { %v1091_v52 = vadd.f32 %v1090_v39, %v1042_v47 }
 0x15b   :  { %v1140_v49 = vadd.f32 %v1139_v51, %v1091_v52 }
 0x15c   :  { %v994_v55 = vpop.f32.mrf.mxu3 }
 0x15d   :  { %v1164_v56 = vmax.f32 %v1140_v49, 0.0  ;;  %v995_v58 = vadd.f32 %v994_v55, %v2364_v17 }
 0x15e   :  { %v1141_v61 = vpop.f32.mrf.mxu2  ;;  %v1046_v62 = vpop.f32.mrf.mxu0 }
 0x15f   :  { %1181 = vst.msk [vmem:[%s2484_s2 + $0x50] sm:$0xff] %vm1170_vm0, %v1164_v56  ;;  %v1044_v53 = vadd.f32 %v1043_v54, %v995_v58 }
 0x160   :  { %v1095_v0 = vpop.f32.mrf.mxu1 }
 0x161   :  { %v1093_v63 = vadd.f32 %v1092_v2, %v1044_v53 }
 0x163   :  { %v1142_v5 = vadd.f32 %v1141_v61, %v1093_v63 }
 0x164   :  { %v997_v6 = vpop.f32.mrf.mxu3 }
 0x165   :  { %v1165_v43 = vmax.f32 %v1142_v5, 0.0  ;;  %v998_v8 = vadd.f32 %v997_v6, %v2366_v24 }
 0x166   :  { %v1144_v9 = vpop.f32.mrf.mxu2  ;;  %v1048_v14 = vpop.f32.mrf.mxu0 }
 0x167   :  { %1182 = vst.msk [vmem:[%s2484_s2 + $0x58] sm:$0xff] %vm1170_vm0, %v1165_v43  ;;  %v1047_v17 = vadd.f32 %v1046_v62, %v998_v8 }
 0x168   :  { %v1097_v18 = vpop.f32.mrf.mxu1 }
 0x169   :  { %v1096_v11 = vadd.f32 %v1095_v0, %v1047_v17 }
 0x16b   :  { %v1145_v15 = vadd.f32 %v1144_v9, %v1096_v11 }
 0x16c   :  { %v999_v20 = vpop.f32.mrf.mxu3 }
 0x16d   :  { %v1166_v1 = vmax.f32 %v1145_v15, 0.0  ;;  %v1000_v60 = vadd.f32 %v999_v20, %v2392_v41 }
 0x16e   :  { %v1146_v21 = vpop.f32.mrf.mxu2  ;;  %v1051_v27 = vpop.f32.mrf.mxu0 }
 0x16f   :  { %1183 = vst.msk [vmem:[%s2484_s2 + $0x60] sm:$0xff] %vm1170_vm0, %v1166_v1  ;;  %v1049_v24 = vadd.f32 %v1048_v14, %v1000_v60 }
 0x170   :  { %v1100_v42 = vpop.f32.mrf.mxu1 }
 0x171   :  { %v1098_v7 = vadd.f32 %v1097_v18, %v1049_v24 }
 0x173   :  { %v1147_v26 = vadd.f32 %v1146_v21, %v1098_v7 }
 0x174   :  { %v1002_v36 = vpop.f32.mrf.mxu3 }
 0x175   :  { %v1167_v4 = vmax.f32 %v1147_v26, 0.0  ;;  %v1003_v12 = vadd.f32 %v1002_v36, %v2394_v50 }
 0x176   :  { %v1149_v3 = vpop.f32.mrf.mxu2  ;;  %v1053_v10 = vpop.f32.mrf.mxu0 }
 0x177   :  { %1184 = vst.msk [vmem:[%s2484_s2 + $0x68] sm:$0xff] %vm1170_vm0, %v1167_v4  ;;  %v1052_v41 = vadd.f32 %v1051_v27, %v1003_v12 }
 0x178   :  { %v1102_v33 = vpop.f32.mrf.mxu1 }
 0x179   :  { %v1101_v30 = vadd.f32 %v1100_v42, %v1052_v41 }
 0x17b   :  { %v1150_v23 = vadd.f32 %v1149_v3, %v1101_v30 }
 0x17c   :  { %v1004_v28 = vpop.f32.mrf.mxu3 }
 0x17d   :  { %v1168_v29 = vmax.f32 %v1150_v23, 0.0  ;;  %v1005_v32 = vadd.f32 %v1004_v28, %v2396_v59 }
 0x17e   :  { %v1151_v25 = vpop.f32.mrf.mxu2 }
 0x17f   :  { %1185 = vst.msk [vmem:[%s2484_s2 + $0x70] sm:$0xff] %vm1170_vm0, %v1168_v29  ;;  %v1054_v50 = vadd.f32 %v1053_v10, %v1005_v32 }
 0x181   :  { %v1103_v13 = vadd.f32 %v1102_v33, %v1054_v50 }
 0x183   :  { %v1152_v34 = vadd.f32 %v1151_v25, %v1103_v13 }
 0x185   :  { %v1169_v35 = vmax.f32 %v1152_v34, 0.0 }
 0x187   :  { %1186 = vst.msk [vmem:[%s2484_s2 + $0x78] sm:$0xff] %vm1170_vm0, %v1169_v35 }

// kernel: decoder_bev_forward.11
= control target key start
LH: loop header
LB: loop body
LE: loop exit
PB: predicated region body
PF: predicated region fallthrough
CT: control target
= control target key end

     0   :  { %vm209_vm0 = vcmask 261120   ;;  %s619_s1 = inlined_call_operand.vmem [shape: bf16[128,32], index: 1, kind: input, shape index: {}]   ;;  %s620_s0 = inlined_call_operand.vmem [shape: bf16[128,128], index: 0, kind: input, shape index: {}]   ;;  %s621_s2 = inlined_call_operand.vmem [shape: f32[128,32], index: 2, kind: input, shape index: {}]   ;;  %s622_s3 = inlined_call_operand.vmem [shape: f32[128,32], index: 3, kind: output, shape index: {0}]   ;;  %s623_s4 = inlined_call_operand.vmem [shape: f32[128,32], index: 4, kind: output, shape index: {1}]  }
   0x1   :  { %v345_v0 = vld [vmem:[%s619_s1 + $0x38] sm:$0xff]  ;;  %v344_v1 = vld [vmem:[%s619_s1 + $0x30] sm:$0xff]  ;;  %v343_v2 = vld [vmem:[%s619_s1 + $0x28] sm:$0xff] }
   0x2   :  { %160 = vmatpush.bf16.msra.mxu0 %v345_v0  ;;  %346 = vmatpush.bf16.msra.mxu1 %v345_v0  ;;  %v342_v3 = vld [vmem:[%s619_s1 + $0x20] sm:$0xff]  ;;  %v341_v4 = vld [vmem:[%s619_s1 + $0x18] sm:$0xff]  ;;  %v340_v5 = vld [vmem:[%s619_s1 + $0x10] sm:$0xff] }
   0x3   :  { %347 = vmatpush.bf16.msra.mxu2 %v345_v0  ;;  %348 = vmatpush.bf16.msra.mxu3 %v345_v0  ;;  %v339_v6 = vld [vmem:[%s619_s1 + $0x8] sm:$0xff]  ;;  %v338_v7 = vld [vmem:[%s619_s1] sm:$0xff]  ;;  %v332_v9 = vld [vmem:[%s620_s0 + $0x10] sm:$0xff] }
   0x4   :  { %v330_v8 = vld [vmem:[%s620_s0] sm:$0xff]  ;;  %v336_v11 = vld [vmem:[%s620_s0 + $0x30] sm:$0xff]  ;;  %v331_v12 = vld [vmem:[%s620_s0 + $0x8] sm:$0xff] }
   0x5   :  { %v334_v10 = vld [vmem:[%s620_s0 + $0x20] sm:$0xff]  ;;  %v333_v13 = vld [vmem:[%s620_s0 + $0x18] sm:$0xff]  ;;  %v335_v14 = vld [vmem:[%s620_s0 + $0x28] sm:$0xff] }
   0x6   :  { %161 = vmatpush.bf16.msra.mxu0 %v344_v1  ;;  %349 = vmatpush.bf16.msra.mxu1 %v344_v1  ;;  %v337_v15 = vld [vmem:[%s620_s0 + $0x38] sm:$0xff]  ;;  %v48_v16 = vld [vmem:[%s621_s2] sm:$0xff]  ;;  %v49_v26 = vld [vmem:[%s621_s2 + $0x8] sm:$0xff] }
   0x7   :  { %350 = vmatpush.bf16.msra.mxu2 %v344_v1  ;;  %351 = vmatpush.bf16.msra.mxu3 %v344_v1  ;;  %v52_v17 = vld [vmem:[%s621_s2 + $0x20] sm:$0xff]  ;;  %v53_v27 = vld [vmem:[%s621_s2 + $0x28] sm:$0xff]  ;;  %v50_v42 = vld [vmem:[%s621_s2 + $0x10] sm:$0xff] }
   0x8   :  { %v56_v24 = vld [vmem:[%s621_s2 + $0x40] sm:$0xff]  ;;  %v57_v40 = vld [vmem:[%s621_s2 + $0x48] sm:$0xff]  ;;  %v54_v43 = vld [vmem:[%s621_s2 + $0x30] sm:$0xff] }
   0x9   :  { %v60_v25 = vld [vmem:[%s621_s2 + $0x60] sm:$0xff]  ;;  %v61_v41 = vld [vmem:[%s621_s2 + $0x68] sm:$0xff]  ;;  %v58_v56 = vld [vmem:[%s621_s2 + $0x50] sm:$0xff] }
   0xa   :  { %162 = vmatpush.bf16.msra.mxu0 %v343_v2  ;;  %352 = vmatpush.bf16.msra.mxu1 %v343_v2  ;;  %v62_v57 = vld [vmem:[%s621_s2 + $0x70] sm:$0xff]  ;;  %v51_v58 = vld [vmem:[%s621_s2 + $0x18] sm:$0xff] }
   0xb   :  { %353 = vmatpush.bf16.msra.mxu2 %v343_v2  ;;  %354 = vmatpush.bf16.msra.mxu3 %v343_v2  ;;  %v55_v59 = vld [vmem:[%s621_s2 + $0x38] sm:$0xff] }
   0xe   :  { %163 = vmatpush.bf16.msra.mxu0 %v342_v3  ;;  %355 = vmatpush.bf16.msra.mxu1 %v342_v3 }
   0xf   :  { %356 = vmatpush.bf16.msra.mxu2 %v342_v3  ;;  %357 = vmatpush.bf16.msra.mxu3 %v342_v3 }
  0x12   :  { %164 = vmatpush.bf16.msra.mxu0 %v341_v4  ;;  %358 = vmatpush.bf16.msra.mxu1 %v341_v4 }
  0x13   :  { %359 = vmatpush.bf16.msra.mxu2 %v341_v4  ;;  %360 = vmatpush.bf16.msra.mxu3 %v341_v4 }
  0x16   :  { %165 = vmatpush.bf16.msra.mxu0 %v340_v5  ;;  %361 = vmatpush.bf16.msra.mxu1 %v340_v5 }
  0x17   :  { %362 = vmatpush.bf16.msra.mxu2 %v340_v5  ;;  %363 = vmatpush.bf16.msra.mxu3 %v340_v5 }
  0x1a   :  { %166 = vmatpush.bf16.msra.mxu0 %v339_v6  ;;  %364 = vmatpush.bf16.msra.mxu1 %v339_v6 }
  0x1b   :  { %365 = vmatpush.bf16.msra.mxu2 %v339_v6  ;;  %366 = vmatpush.bf16.msra.mxu3 %v339_v6 }
  0x1e   :  { %167 = vmatpush.bf16.msra.mxu0 %v338_v7  ;;  %367 = vmatpush.bf16.msra.mxu1 %v338_v7 }
  0x1f   :  { %368 = vmatpush.bf16.msra.mxu2 %v338_v7  ;;  %369 = vmatpush.bf16.msra.mxu3 %v338_v7 }
  0x21   :  { %168 = vmatmul.bf16.vlgmr.msra.gmra.mxu0 %v330_v8  ;;  %178 = vmatmul.bf16.vlgmr.msra.gmra.mxu1 %v332_v9  ;;  %v59_v8 = vld [vmem:[%s621_s2 + $0x58] sm:$0xff] }
  0x22   :  { %188 = vmatmul.bf16.vlgmr.msra.gmra.mxu2 %v334_v10  ;;  %198 = vmatmul.bf16.vlgmr.msra.gmra.mxu3 %v336_v11  ;;  %v63_v9 = vld [vmem:[%s621_s2 + $0x78] sm:$0xff] }
  0x31   :  { %173 = vmatmul.bf16.gmra.mxu0 %v331_v12  ;;  %183 = vmatmul.bf16.gmra.mxu1 %v333_v13 }
  0x32   :  { %193 = vmatmul.bf16.gmra.mxu2 %v335_v14  ;;  %203 = vmatmul.bf16.gmra.mxu3 %v337_v15 }
  0x9e   :  { %v169_v18 = vpop.f32.mrf.mxu0  ;;  %v179_v19 = vpop.f32.mrf.mxu1 }
  0x9f   :  { %v170_v20 = vadd.f32 %v169_v18, %v48_v16  ;;  %v180_v21 = vadd.f32 %v179_v19, %v52_v17 }
  0xa1   :  { %210 = vst.msk [vmem:[%s622_s3] sm:$0xff] %vm209_vm0, %v170_v20  ;;  %v226_v22 = vmax.f32 %v170_v20, 0.0  ;;  %v230_v23 = vmax.f32 %v180_v21, 0.0 }
  0xa2   :  { %214 = vst.msk [vmem:[%s622_s3 + $0x20] sm:$0xff] %vm209_vm0, %v180_v21 }
  0xa3   :  { %242 = vst.msk [vmem:[%s623_s4] sm:$0xff] %vm209_vm0, %v226_v22 }
  0xa4   :  { %246 = vst.msk [vmem:[%s623_s4 + $0x20] sm:$0xff] %vm209_vm0, %v230_v23 }
  0xa5   :  { %v189_v28 = vpop.f32.mrf.mxu2  ;;  %v199_v29 = vpop.f32.mrf.mxu3 }
  0xa6   :  { %v190_v30 = vadd.f32 %v189_v28, %v56_v24  ;;  %v200_v31 = vadd.f32 %v199_v29, %v60_v25  ;;  %v171_v32 = vpop.f32.mrf.mxu0  ;;  %v181_v33 = vpop.f32.mrf.mxu1 }
  0xa7   :  { %v172_v34 = vadd.f32 %v171_v32, %v49_v26  ;;  %v182_v35 = vadd.f32 %v181_v33, %v53_v27 }
  0xa8   :  { %218 = vst.msk [vmem:[%s622_s3 + $0x40] sm:$0xff] %vm209_vm0, %v190_v30  ;;  %v234_v36 = vmax.f32 %v190_v30, 0.0  ;;  %v238_v37 = vmax.f32 %v200_v31, 0.0 }
  0xa9   :  { %222 = vst.msk [vmem:[%s622_s3 + $0x60] sm:$0xff] %vm209_vm0, %v200_v31  ;;  %v227_v38 = vmax.f32 %v172_v34, 0.0  ;;  %v231_v39 = vmax.f32 %v182_v35, 0.0 }
  0xaa   :  { %250 = vst.msk [vmem:[%s623_s4 + $0x40] sm:$0xff] %vm209_vm0, %v234_v36 }
  0xab   :  { %254 = vst.msk [vmem:[%s623_s4 + $0x60] sm:$0xff] %vm209_vm0, %v238_v37 }
  0xac   :  { %211 = vst.msk [vmem:[%s622_s3 + $0x8] sm:$0xff] %vm209_vm0, %v172_v34 }
  0xad   :  { %243 = vst.msk [vmem:[%s623_s4 + $0x8] sm:$0xff] %vm209_vm0, %v227_v38  ;;  %v191_v44 = vpop.f32.mrf.mxu2  ;;  %v201_v45 = vpop.f32.mrf.mxu3 }
  0xae   :  { %215 = vst.msk [vmem:[%s622_s3 + $0x28] sm:$0xff] %vm209_vm0, %v182_v35  ;;  %v192_v46 = vadd.f32 %v191_v44, %v57_v40  ;;  %v202_v47 = vadd.f32 %v201_v45, %v61_v41  ;;  %v174_v48 = vpop.f32.mrf.mxu0  ;;  %v184_v49 = vpop.f32.mrf.mxu1 }
  0xaf   :  { %247 = vst.msk [vmem:[%s623_s4 + $0x28] sm:$0xff] %vm209_vm0, %v231_v39  ;;  %v175_v50 = vadd.f32 %v174_v48, %v50_v42  ;;  %v185_v51 = vadd.f32 %v184_v49, %v54_v43 }
  0xb0   :  { %219 = vst.msk [vmem:[%s622_s3 + $0x48] sm:$0xff] %vm209_vm0, %v192_v46  ;;  %v235_v52 = vmax.f32 %v192_v46, 0.0  ;;  %v239_v53 = vmax.f32 %v202_v47, 0.0 }
  0xb1   :  { %223 = vst.msk [vmem:[%s622_s3 + $0x68] sm:$0xff] %vm209_vm0, %v202_v47  ;;  %v228_v54 = vmax.f32 %v175_v50, 0.0  ;;  %v232_v55 = vmax.f32 %v185_v51, 0.0 }
  0xb2   :  { %251 = vst.msk [vmem:[%s623_s4 + $0x48] sm:$0xff] %vm209_vm0, %v235_v52 }
  0xb3   :  { %255 = vst.msk [vmem:[%s623_s4 + $0x68] sm:$0xff] %vm209_vm0, %v239_v53 }
  0xb4   :  { %212 = vst.msk [vmem:[%s622_s3 + $0x10] sm:$0xff] %vm209_vm0, %v175_v50 }
  0xb5   :  { %244 = vst.msk [vmem:[%s623_s4 + $0x10] sm:$0xff] %vm209_vm0, %v228_v54  ;;  %v194_v60 = vpop.f32.mrf.mxu2  ;;  %v204_v61 = vpop.f32.mrf.mxu3 }
  0xb6   :  { %216 = vst.msk [vmem:[%s622_s3 + $0x30] sm:$0xff] %vm209_vm0, %v185_v51  ;;  %v195_v62 = vadd.f32 %v194_v60, %v58_v56  ;;  %v205_v63 = vadd.f32 %v204_v61, %v62_v57  ;;  %v176_v0 = vpop.f32.mrf.mxu0  ;;  %v186_v1 = vpop.f32.mrf.mxu1 }
  0xb7   :  { %248 = vst.msk [vmem:[%s623_s4 + $0x30] sm:$0xff] %vm209_vm0, %v232_v55  ;;  %v177_v2 = vadd.f32 %v176_v0, %v51_v58  ;;  %v187_v3 = vadd.f32 %v186_v1, %v55_v59 }
  0xb8   :  { %220 = vst.msk [vmem:[%s622_s3 + $0x50] sm:$0xff] %vm209_vm0, %v195_v62  ;;  %v236_v4 = vmax.f32 %v195_v62, 0.0  ;;  %v240_v5 = vmax.f32 %v205_v63, 0.0 }
  0xb9   :  { %224 = vst.msk [vmem:[%s622_s3 + $0x70] sm:$0xff] %vm209_vm0, %v205_v63  ;;  %v229_v6 = vmax.f32 %v177_v2, 0.0  ;;  %v233_v7 = vmax.f32 %v187_v3, 0.0 }
  0xba   :  { %252 = vst.msk [vmem:[%s623_s4 + $0x50] sm:$0xff] %vm209_vm0, %v236_v4 }
  0xbb   :  { %256 = vst.msk [vmem:[%s623_s4 + $0x70] sm:$0xff] %vm209_vm0, %v240_v5 }
  0xbc   :  { %213 = vst.msk [vmem:[%s622_s3 + $0x18] sm:$0xff] %vm209_vm0, %v177_v2 }
  0xbd   :  { %245 = vst.msk [vmem:[%s623_s4 + $0x18] sm:$0xff] %vm209_vm0, %v229_v6  ;;  %v196_v10 = vpop.f32.mrf.mxu2  ;;  %v206_v11 = vpop.f32.mrf.mxu3 }
  0xbe   :  { %217 = vst.msk [vmem:[%s622_s3 + $0x38] sm:$0xff] %vm209_vm0, %v187_v3  ;;  %v197_v12 = vadd.f32 %v196_v10, %v59_v8  ;;  %v207_v13 = vadd.f32 %v206_v11, %v63_v9 }
  0xbf   :  { %249 = vst.msk [vmem:[%s623_s4 + $0x38] sm:$0xff] %vm209_vm0, %v233_v7 }
  0xc0   :  { %221 = vst.msk [vmem:[%s622_s3 + $0x58] sm:$0xff] %vm209_vm0, %v197_v12  ;;  %v237_v14 = vmax.f32 %v197_v12, 0.0  ;;  %v241_v15 = vmax.f32 %v207_v13, 0.0 }
  0xc1   :  { %225 = vst.msk [vmem:[%s622_s3 + $0x78] sm:$0xff] %vm209_vm0, %v207_v13 }
  0xc2   :  { %253 = vst.msk [vmem:[%s623_s4 + $0x58] sm:$0xff] %vm209_vm0, %v237_v14 }
  0xc3   :  { %257 = vst.msk [vmem:[%s623_s4 + $0x78] sm:$0xff] %vm209_vm0, %v241_v15 }

// kernel: decoder_bev_forward.13
= control target key start
LH: loop header
LB: loop body
LE: loop exit
PB: predicated region body
PF: predicated region fallthrough
CT: control target
= control target key end

     0   :  { %s621_s0 = inlined_call_operand.vmem [shape: bf16[128,128], index: 0, kind: input, shape index: {}]   ;;  %s622_s1 = inlined_call_operand.vmem [shape: bf16[128,32], index: 1, kind: input, shape index: {}]   ;;  %s623_s2 = inlined_call_operand.vmem [shape: f32[128,32], index: 2, kind: input, shape index: {}]   ;;  %s624_s3 = inlined_call_operand.hbm [shape: f32[128,32], index: 3, kind: output, shape index: {0}]   ;;  %s625_s4 = inlined_call_operand.vmem [shape: f32[128,32], index: 4, kind: output, shape index: {1}]  }
   0x1   :  { %v360_v0 = vld [vmem:[%s622_s1 + $0x38] sm:$0xff]  ;;  %v359_v1 = vld [vmem:[%s622_s1 + $0x30] sm:$0xff] }
   0x2   :  { %161 = vmatpush.bf16.msra.mxu0 %v360_v0  ;;  %361 = vmatpush.bf16.msra.mxu1 %v360_v0 }
   0x3   :  { %362 = vmatpush.bf16.msra.mxu2 %v360_v0  ;;  %363 = vmatpush.bf16.msra.mxu3 %v360_v0 }
   0x4   :  { %10 = vsyncpa [#allocation3], 0  ;;  %v358_v2 = vld [vmem:[%s622_s1 + $0x28] sm:$0xff]  ;;  %v357_v3 = vld [vmem:[%s622_s1 + $0x20] sm:$0xff]  ;;  %vm210_vm0 = vcmask 261120   ;;  %s414_s22 = smov [#allocation2]  }
   0x5   :  { %v356_v4 = vld [vmem:[%s622_s1 + $0x18] sm:$0xff]  ;;  %v355_v5 = vld [vmem:[%s622_s1 + $0x10] sm:$0xff]  ;;  %v354_v6 = vld [vmem:[%s622_s1 + $0x8] sm:$0xff]  ;;  %s263_s23 = sshll.u32 %s414_s22, 4  ;;  %s265_s25 = sshll.u32 %s624_s3, 4  ;;  %s264_s23 = int_to_ptr.vmem [resolvable:$true] %s263_s23  ;;  %s266_s25 = int_to_ptr.hbm [resolvable:$true] %s265_s25 }
   0x6   :  { %162 = vmatpush.bf16.msra.mxu0 %v359_v1  ;;  %364 = vmatpush.bf16.msra.mxu1 %v359_v1  ;;  %v353_v7 = vld [vmem:[%s622_s1] sm:$0xff]  ;;  %v347_v9 = vld [vmem:[%s621_s0 + $0x10] sm:$0xff]  ;;  %v346_v12 = vld [vmem:[%s621_s0 + $0x8] sm:$0xff]  ;;  %s415_s30 = smov 128   ;;  %s416_s5 = smov 8  }
   0x7   :  { %365 = vmatpush.bf16.msra.mxu2 %v359_v1  ;;  %366 = vmatpush.bf16.msra.mxu3 %v359_v1  ;;  %v345_v8 = vld [vmem:[%s621_s0] sm:$0xff]  ;;  %v351_v11 = vld [vmem:[%s621_s0 + $0x30] sm:$0xff]  ;;  %v348_v13 = vld [vmem:[%s621_s0 + $0x18] sm:$0xff] }
   0x8   :  { %v349_v10 = vld [vmem:[%s621_s0 + $0x20] sm:$0xff]  ;;  %v350_v14 = vld [vmem:[%s621_s0 + $0x28] sm:$0xff]  ;;  %v352_v15 = vld [vmem:[%s621_s0 + $0x38] sm:$0xff] }
   0x9   :  { %v49_v16 = vld [vmem:[%s623_s2] sm:$0xff]  ;;  %v50_v26 = vld [vmem:[%s623_s2 + $0x8] sm:$0xff]  ;;  %v51_v42 = vld [vmem:[%s623_s2 + $0x10] sm:$0xff] }
   0xa   :  { %163 = vmatpush.bf16.msra.mxu0 %v358_v2  ;;  %367 = vmatpush.bf16.msra.mxu1 %v358_v2  ;;  %v53_v17 = vld [vmem:[%s623_s2 + $0x20] sm:$0xff]  ;;  %v54_v27 = vld [vmem:[%s623_s2 + $0x28] sm:$0xff]  ;;  %v55_v43 = vld [vmem:[%s623_s2 + $0x30] sm:$0xff] }
   0xb   :  { %368 = vmatpush.bf16.msra.mxu2 %v358_v2  ;;  %369 = vmatpush.bf16.msra.mxu3 %v358_v2  ;;  %v57_v24 = vld [vmem:[%s623_s2 + $0x40] sm:$0xff]  ;;  %v58_v40 = vld [vmem:[%s623_s2 + $0x48] sm:$0xff]  ;;  %v59_v56 = vld [vmem:[%s623_s2 + $0x50] sm:$0xff] }
   0xc   :  { %v61_v25 = vld [vmem:[%s623_s2 + $0x60] sm:$0xff]  ;;  %v62_v41 = vld [vmem:[%s623_s2 + $0x68] sm:$0xff]  ;;  %v63_v57 = vld [vmem:[%s623_s2 + $0x70] sm:$0xff] }
   0xd   :  { %v52_v58 = vld [vmem:[%s623_s2 + $0x18] sm:$0xff] }
   0xe   :  { %164 = vmatpush.bf16.msra.mxu0 %v357_v3  ;;  %370 = vmatpush.bf16.msra.mxu1 %v357_v3  ;;  %v56_v59 = vld [vmem:[%s623_s2 + $0x38] sm:$0xff] }
   0xf   :  { %371 = vmatpush.bf16.msra.mxu2 %v357_v3  ;;  %372 = vmatpush.bf16.msra.mxu3 %v357_v3 }
  0x12   :  { %165 = vmatpush.bf16.msra.mxu0 %v356_v4  ;;  %373 = vmatpush.bf16.msra.mxu1 %v356_v4 }
  0x13   :  { %374 = vmatpush.bf16.msra.mxu2 %v356_v4  ;;  %375 = vmatpush.bf16.msra.mxu3 %v356_v4 }
  0x16   :  { %166 = vmatpush.bf16.msra.mxu0 %v355_v5  ;;  %376 = vmatpush.bf16.msra.mxu1 %v355_v5 }
  0x17   :  { %377 = vmatpush.bf16.msra.mxu2 %v355_v5  ;;  %378 = vmatpush.bf16.msra.mxu3 %v355_v5 }
  0x1a   :  { %167 = vmatpush.bf16.msra.mxu0 %v354_v6  ;;  %379 = vmatpush.bf16.msra.mxu1 %v354_v6 }
  0x1b   :  { %380 = vmatpush.bf16.msra.mxu2 %v354_v6  ;;  %381 = vmatpush.bf16.msra.mxu3 %v354_v6 }
  0x1e   :  { %168 = vmatpush.bf16.msra.mxu0 %v353_v7  ;;  %382 = vmatpush.bf16.msra.mxu1 %v353_v7 }
  0x1f   :  { %383 = vmatpush.bf16.msra.mxu2 %v353_v7  ;;  %384 = vmatpush.bf16.msra.mxu3 %v353_v7 }
  0x21   :  { %169 = vmatmul.bf16.vlgmr.msra.gmra.mxu0 %v345_v8  ;;  %179 = vmatmul.bf16.vlgmr.msra.gmra.mxu1 %v347_v9  ;;  %v60_v8 = vld [vmem:[%s623_s2 + $0x58] sm:$0xff] }
  0x22   :  { %189 = vmatmul.bf16.vlgmr.msra.gmra.mxu2 %v349_v10  ;;  %199 = vmatmul.bf16.vlgmr.msra.gmra.mxu3 %v351_v11  ;;  %v64_v9 = vld [vmem:[%s623_s2 + $0x78] sm:$0xff] }
  0x31   :  { %174 = vmatmul.bf16.gmra.mxu0 %v346_v12  ;;  %184 = vmatmul.bf16.gmra.mxu1 %v348_v13 }
  0x32   :  { %194 = vmatmul.bf16.gmra.mxu2 %v350_v14  ;;  %204 = vmatmul.bf16.gmra.mxu3 %v352_v15 }
  0x9e   :  { %v170_v18 = vpop.f32.mrf.mxu0  ;;  %v180_v19 = vpop.f32.mrf.mxu1 }
  0x9f   :  { %v171_v20 = vadd.f32 %v170_v18, %v49_v16  ;;  %v181_v21 = vadd.f32 %v180_v19, %v53_v17 }
  0xa1   :  { %211 = vst.msk [vmem:[#allocation2] sm:$0xff] %vm210_vm0, %v171_v20  ;;  %v227_v22 = vmax.f32 %v171_v20, 0.0  ;;  %v231_v23 = vmax.f32 %v181_v21, 0.0 }
  0xa2   :  { %215 = vst.msk [vmem:[#allocation2 + $0x20] sm:$0xff] %vm210_vm0, %v181_v21 }
  0xa3   :  { %243 = vst.msk [vmem:[%s625_s4] sm:$0xff] %vm210_vm0, %v227_v22 }
  0xa4   :  { %247 = vst.msk [vmem:[%s625_s4 + $0x20] sm:$0xff] %vm210_vm0, %v231_v23 }
  0xa5   :  { %v190_v28 = vpop.f32.mrf.mxu2  ;;  %v200_v29 = vpop.f32.mrf.mxu3 }
  0xa6   :  { %v191_v30 = vadd.f32 %v190_v28, %v57_v24  ;;  %v201_v31 = vadd.f32 %v200_v29, %v61_v25  ;;  %v172_v32 = vpop.f32.mrf.mxu0  ;;  %v182_v33 = vpop.f32.mrf.mxu1 }
  0xa7   :  { %v173_v34 = vadd.f32 %v172_v32, %v50_v26  ;;  %v183_v35 = vadd.f32 %v182_v33, %v54_v27 }
  0xa8   :  { %219 = vst.msk [vmem:[#allocation2 + $0x40] sm:$0xff] %vm210_vm0, %v191_v30  ;;  %v235_v36 = vmax.f32 %v191_v30, 0.0  ;;  %v239_v37 = vmax.f32 %v201_v31, 0.0 }
  0xa9   :  { %223 = vst.msk [vmem:[#allocation2 + $0x60] sm:$0xff] %vm210_vm0, %v201_v31  ;;  %v228_v38 = vmax.f32 %v173_v34, 0.0  ;;  %v232_v39 = vmax.f32 %v183_v35, 0.0 }
  0xaa   :  { %251 = vst.msk [vmem:[%s625_s4 + $0x40] sm:$0xff] %vm210_vm0, %v235_v36 }
  0xab   :  { %255 = vst.msk [vmem:[%s625_s4 + $0x60] sm:$0xff] %vm210_vm0, %v239_v37 }
  0xac   :  { %212 = vst.msk [vmem:[#allocation2 + $0x8] sm:$0xff] %vm210_vm0, %v173_v34 }
  0xad   :  { %244 = vst.msk [vmem:[%s625_s4 + $0x8] sm:$0xff] %vm210_vm0, %v228_v38  ;;  %v192_v44 = vpop.f32.mrf.mxu2  ;;  %v202_v45 = vpop.f32.mrf.mxu3 }
  0xae   :  { %216 = vst.msk [vmem:[#allocation2 + $0x28] sm:$0xff] %vm210_vm0, %v183_v35  ;;  %v193_v46 = vadd.f32 %v192_v44, %v58_v40  ;;  %v203_v47 = vadd.f32 %v202_v45, %v62_v41  ;;  %v175_v48 = vpop.f32.mrf.mxu0  ;;  %v185_v49 = vpop.f32.mrf.mxu1 }
  0xaf   :  { %248 = vst.msk [vmem:[%s625_s4 + $0x28] sm:$0xff] %vm210_vm0, %v232_v39  ;;  %v176_v50 = vadd.f32 %v175_v48, %v51_v42  ;;  %v186_v51 = vadd.f32 %v185_v49, %v55_v43 }
  0xb0   :  { %220 = vst.msk [vmem:[#allocation2 + $0x48] sm:$0xff] %vm210_vm0, %v193_v46  ;;  %v236_v52 = vmax.f32 %v193_v46, 0.0  ;;  %v240_v53 = vmax.f32 %v203_v47, 0.0 }
  0xb1   :  { %224 = vst.msk [vmem:[#allocation2 + $0x68] sm:$0xff] %vm210_vm0, %v203_v47  ;;  %v229_v54 = vmax.f32 %v176_v50, 0.0  ;;  %v233_v55 = vmax.f32 %v186_v51, 0.0 }
  0xb2   :  { %252 = vst.msk [vmem:[%s625_s4 + $0x48] sm:$0xff] %vm210_vm0, %v236_v52 }
  0xb3   :  { %256 = vst.msk [vmem:[%s625_s4 + $0x68] sm:$0xff] %vm210_vm0, %v240_v53 }
  0xb4   :  { %213 = vst.msk [vmem:[#allocation2 + $0x10] sm:$0xff] %vm210_vm0, %v176_v50 }
  0xb5   :  { %245 = vst.msk [vmem:[%s625_s4 + $0x10] sm:$0xff] %vm210_vm0, %v229_v54  ;;  %v195_v60 = vpop.f32.mrf.mxu2  ;;  %v205_v61 = vpop.f32.mrf.mxu3 }
  0xb6   :  { %217 = vst.msk [vmem:[#allocation2 + $0x30] sm:$0xff] %vm210_vm0, %v186_v51  ;;  %v196_v62 = vadd.f32 %v195_v60, %v59_v56  ;;  %v206_v63 = vadd.f32 %v205_v61, %v63_v57  ;;  %v177_v0 = vpop.f32.mrf.mxu0  ;;  %v187_v1 = vpop.f32.mrf.mxu1 }
  0xb7   :  { %249 = vst.msk [vmem:[%s625_s4 + $0x30] sm:$0xff] %vm210_vm0, %v233_v55  ;;  %v178_v2 = vadd.f32 %v177_v0, %v52_v58  ;;  %v188_v3 = vadd.f32 %v187_v1, %v56_v59 }
  0xb8   :  { %221 = vst.msk [vmem:[#allocation2 + $0x50] sm:$0xff] %vm210_vm0, %v196_v62  ;;  %v237_v4 = vmax.f32 %v196_v62, 0.0  ;;  %v241_v5 = vmax.f32 %v206_v63, 0.0 }
  0xb9   :  { %225 = vst.msk [vmem:[#allocation2 + $0x70] sm:$0xff] %vm210_vm0, %v206_v63  ;;  %v230_v6 = vmax.f32 %v178_v2, 0.0  ;;  %v234_v7 = vmax.f32 %v188_v3, 0.0 }
  0xba   :  { %253 = vst.msk [vmem:[%s625_s4 + $0x50] sm:$0xff] %vm210_vm0, %v237_v4 }
  0xbb   :  { %257 = vst.msk [vmem:[%s625_s4 + $0x70] sm:$0xff] %vm210_vm0, %v241_v5 }
  0xbc   :  { %214 = vst.msk [vmem:[#allocation2 + $0x18] sm:$0xff] %vm210_vm0, %v178_v2 }
  0xbd   :  { %246 = vst.msk [vmem:[%s625_s4 + $0x18] sm:$0xff] %vm210_vm0, %v230_v6  ;;  %v197_v10 = vpop.f32.mrf.mxu2  ;;  %v207_v11 = vpop.f32.mrf.mxu3 }
  0xbe   :  { %218 = vst.msk [vmem:[#allocation2 + $0x38] sm:$0xff] %vm210_vm0, %v188_v3  ;;  %v198_v12 = vadd.f32 %v197_v10, %v60_v8  ;;  %v208_v13 = vadd.f32 %v207_v11, %v64_v9 }
  0xbf   :  { %250 = vst.msk [vmem:[%s625_s4 + $0x38] sm:$0xff] %vm210_vm0, %v234_v7 }
  0xc0   :  { %222 = vst.msk [vmem:[#allocation2 + $0x58] sm:$0xff] %vm210_vm0, %v198_v12  ;;  %v238_v14 = vmax.f32 %v198_v12, 0.0  ;;  %v242_v15 = vmax.f32 %v208_v13, 0.0 }
  0xc1   :  { %226 = vst.msk [vmem:[#allocation2 + $0x78] sm:$0xff] %vm210_vm0, %v208_v13 }
  0xc2   :  { %254 = vst.msk [vmem:[%s625_s4 + $0x58] sm:$0xff] %vm210_vm0, %v238_v14 }
  0xc3   :  { %258 = vst.msk [vmem:[%s625_s4 + $0x78] sm:$0xff] %vm210_vm0, %v242_v15 }
  0xc4   :  { %271 = dma.vmem_to_hbm [thread:$0]  %s264_s23, 2048, %s266_s25, [#allocation3], %s415_s30, %s415_s30, %s416_s5  }
  0xc5   :  { %412 = dma.done.wait [#allocation3], 2048  }
  0xc6   :  { %413 = vsyncadd [#allocation3], 4294965248 }
  0xc7   :  { %280 = vsyncpa [#allocation3], 1 }

// kernel: decoder_bev_forward.14
= control target key start
LH: loop header
LB: loop body
LE: loop exit
PB: predicated region body
PF: predicated region fallthrough
CT: control target
= control target key end

     0   :  { %s2230_s1 = inlined_call_operand.vmem [shape: bf16[128,1024], index: 1, kind: input, shape index: {}]   ;;  %s2231_s0 = inlined_call_operand.vmem [shape: bf16[128,128], index: 0, kind: input, shape index: {}]   ;;  %s2232_s2 = inlined_call_operand.vmem [shape: f32[128,1024], index: 2, kind: output, shape index: {}]  }
   0x1   :  { %v1241_v0 = vld [vmem:[%s2230_s1 + $0x1c0] sm:$0xf]  ;;  %v1335_v2 = vld [vmem:[%s2230_s1 + $0x1c4] sm:$0xf]  ;;  %v1249_v5 = vld [vmem:[%s2230_s1 + $0x1c8] sm:$0xf] }
   0x2   :  { %v1339_v1 = vld [vmem:[%s2230_s1 + $0x1dc] sm:$0xf0]  ;;  %v1243_v4 = vld [vmem:[%s2230_s1 + $0x1e0] sm:$0xf0]  ;;  %v1340_v6 = vld [vmem:[%s2230_s1 + $0x1e4] sm:$0xf0] }
   0x3   :  { %v1242_v3 = vor.u32 %v1339_v1, %v1241_v0  ;;  %v1246_v7 = vor.u32 %v1335_v2, %v1243_v4  ;;  %v1250_v8 = vor.u32 %v1340_v6, %v1249_v5  ;;  %v1336_v9 = vld [vmem:[%s2230_s1 + $0x1cc] sm:$0xf]  ;;  %v1209_v11 = vld [vmem:[%s2230_s1 + $0x180] sm:$0xf]  ;;  %v1327_v14 = vld [vmem:[%s2230_s1 + $0x184] sm:$0xf] }
   0x4   :  { %v1251_v10 = vld [vmem:[%s2230_s1 + $0x1e8] sm:$0xf0]  ;;  %v1331_v13 = vld [vmem:[%s2230_s1 + $0x19c] sm:$0xf0]  ;;  %v1211_v15 = vld [vmem:[%s2230_s1 + $0x1a0] sm:$0xf0] }
   0x5   :  { %459 = vmatpush.bf16.msra.mxu0 %v1242_v3  ;;  %v1254_v12 = vor.u32 %v1336_v9, %v1251_v10  ;;  %508 = vmatpush.bf16.msra.mxu1 %v1246_v7  ;;  %v1210_v16 = vor.u32 %v1331_v13, %v1209_v11  ;;  %v1214_v17 = vor.u32 %v1327_v14, %v1211_v15  ;;  %v1217_v18 = vld [vmem:[%s2230_s1 + $0x188] sm:$0xf]  ;;  %v1328_v20 = vld [vmem:[%s2230_s1 + $0x18c] sm:$0xf]  ;;  %v1177_v23 = vld [vmem:[%s2230_s1 + $0x140] sm:$0xf] }
   0x6   :  { %557 = vmatpush.bf16.msra.mxu2 %v1250_v8  ;;  %v1332_v19 = vld [vmem:[%s2230_s1 + $0x1a4] sm:$0xf0]  ;;  %v1219_v22 = vld [vmem:[%s2230_s1 + $0x1a8] sm:$0xf0]  ;;  %v1323_v24 = vld [vmem:[%s2230_s1 + $0x15c] sm:$0xf0] }
   0x7   :  { %606 = vmatpush.bf16.msra.mxu3 %v1254_v12  ;;  %v1218_v21 = vor.u32 %v1332_v19, %v1217_v18  ;;  %v1222_v25 = vor.u32 %v1328_v20, %v1219_v22  ;;  %v1319_v26 = vld [vmem:[%s2230_s1 + $0x144] sm:$0xf]  ;;  %v1185_v28 = vld [vmem:[%s2230_s1 + $0x148] sm:$0xf]  ;;  %v1178_v29 = vor.u32 %v1323_v24, %v1177_v23  ;;  %v1320_v31 = vld [vmem:[%s2230_s1 + $0x14c] sm:$0xf] }
   0x8   :  { %v1179_v27 = vld [vmem:[%s2230_s1 + $0x160] sm:$0xf0]  ;;  %v1324_v30 = vld [vmem:[%s2230_s1 + $0x164] sm:$0xf0]  ;;  %v1187_v32 = vld [vmem:[%s2230_s1 + $0x168] sm:$0xf0] }
   0x9   :  { %460 = vmatpush.bf16.msra.mxu0 %v1210_v16  ;;  %509 = vmatpush.bf16.msra.mxu1 %v1214_v17  ;;  %v1182_v33 = vor.u32 %v1319_v26, %v1179_v27  ;;  %v1186_v34 = vor.u32 %v1324_v30, %v1185_v28  ;;  %v1145_v35 = vld [vmem:[%s2230_s1 + $0x100] sm:$0xf]  ;;  %v1311_v37 = vld [vmem:[%s2230_s1 + $0x104] sm:$0xf]  ;;  %v1190_v38 = vor.u32 %v1320_v31, %v1187_v32  ;;  %v1153_v40 = vld [vmem:[%s2230_s1 + $0x108] sm:$0xf] }
   0xa   :  { %558 = vmatpush.bf16.msra.mxu2 %v1218_v21  ;;  %v1315_v36 = vld [vmem:[%s2230_s1 + $0x11c] sm:$0xf0]  ;;  %v1147_v39 = vld [vmem:[%s2230_s1 + $0x120] sm:$0xf0]  ;;  %v1316_v41 = vld [vmem:[%s2230_s1 + $0x124] sm:$0xf0] }
   0xb   :  { %607 = vmatpush.bf16.msra.mxu3 %v1222_v25  ;;  %v1312_v42 = vld [vmem:[%s2230_s1 + $0x10c] sm:$0xf]  ;;  %v1146_v44 = vor.u32 %v1315_v36, %v1145_v35  ;;  %v1150_v45 = vor.u32 %v1311_v37, %v1147_v39  ;;  %v1154_v46 = vor.u32 %v1316_v41, %v1153_v40  ;;  %v1113_v47 = vld [vmem:[%s2230_s1 + $0xc0] sm:$0xf]  ;;  %v1303_v49 = vld [vmem:[%s2230_s1 + $0xc4] sm:$0xf] }
   0xc   :  { %v1155_v43 = vld [vmem:[%s2230_s1 + $0x128] sm:$0xf0]  ;;  %v1307_v48 = vld [vmem:[%s2230_s1 + $0xdc] sm:$0xf0]  ;;  %v1115_v51 = vld [vmem:[%s2230_s1 + $0xe0] sm:$0xf0] }
   0xd   :  { %461 = vmatpush.bf16.msra.mxu0 %v1178_v29  ;;  %510 = vmatpush.bf16.msra.mxu1 %v1182_v33  ;;  %v1158_v50 = vor.u32 %v1312_v42, %v1155_v43  ;;  %v1121_v52 = vld [vmem:[%s2230_s1 + $0xc8] sm:$0xf]  ;;  %v1304_v54 = vld [vmem:[%s2230_s1 + $0xcc] sm:$0xf]  ;;  %v1114_v56 = vor.u32 %v1307_v48, %v1113_v47  ;;  %v1118_v57 = vor.u32 %v1303_v49, %v1115_v51  ;;  %v1081_v59 = vld [vmem:[%s2230_s1 + $0x80] sm:$0xf] }
   0xe   :  { %559 = vmatpush.bf16.msra.mxu2 %v1186_v34  ;;  %v1308_v53 = vld [vmem:[%s2230_s1 + $0xe4] sm:$0xf0]  ;;  %v1123_v55 = vld [vmem:[%s2230_s1 + $0xe8] sm:$0xf0]  ;;  %v1299_v60 = vld [vmem:[%s2230_s1 + $0x9c] sm:$0xf0] }
   0xf   :  { %608 = vmatpush.bf16.msra.mxu3 %v1190_v38  ;;  %v1122_v58 = vor.u32 %v1308_v53, %v1121_v52  ;;  %v1295_v61 = vld [vmem:[%s2230_s1 + $0x84] sm:$0xf]  ;;  %v1126_v62 = vor.u32 %v1304_v54, %v1123_v55  ;;  %v1089_v0 = vld [vmem:[%s2230_s1 + $0x88] sm:$0xf]  ;;  %v1296_v2 = vld [vmem:[%s2230_s1 + $0x8c] sm:$0xf]  ;;  %v1082_v4 = vor.u32 %v1299_v60, %v1081_v59 }
  0x10   :  { %v1083_v63 = vld [vmem:[%s2230_s1 + $0xa0] sm:$0xf0]  ;;  %v1300_v1 = vld [vmem:[%s2230_s1 + $0xa4] sm:$0xf0]  ;;  %v1091_v3 = vld [vmem:[%s2230_s1 + $0xa8] sm:$0xf0] }
  0x11   :  { %462 = vmatpush.bf16.msra.mxu0 %v1146_v44  ;;  %511 = vmatpush.bf16.msra.mxu1 %v1150_v45  ;;  %v1086_v5 = vor.u32 %v1295_v61, %v1083_v63  ;;  %v1090_v6 = vor.u32 %v1300_v1, %v1089_v0  ;;  %v1049_v7 = vld [vmem:[%s2230_s1 + $0x40] sm:$0xf]  ;;  %v1287_v9 = vld [vmem:[%s2230_s1 + $0x44] sm:$0xf]  ;;  %v1094_v10 = vor.u32 %v1296_v2, %v1091_v3  ;;  %v1057_v12 = vld [vmem:[%s2230_s1 + $0x48] sm:$0xf] }
  0x12   :  { %560 = vmatpush.bf16.msra.mxu2 %v1154_v46  ;;  %v1291_v8 = vld [vmem:[%s2230_s1 + $0x5c] sm:$0xf0]  ;;  %v1051_v11 = vld [vmem:[%s2230_s1 + $0x60] sm:$0xf0]  ;;  %v1292_v13 = vld [vmem:[%s2230_s1 + $0x64] sm:$0xf0] }
  0x13   :  { %609 = vmatpush.bf16.msra.mxu3 %v1158_v50  ;;  %v1288_v14 = vld [vmem:[%s2230_s1 + $0x4c] sm:$0xf]  ;;  %v1050_v16 = vor.u32 %v1291_v8, %v1049_v7  ;;  %v1017_v17 = vld [vmem:[%s2230_s1] sm:$0xf]  ;;  %v1054_v18 = vor.u32 %v1287_v9, %v1051_v11  ;;  %v1058_v19 = vor.u32 %v1292_v13, %v1057_v12  ;;  %v1279_v21 = vld [vmem:[%s2230_s1 + $0x4] sm:$0xf] }
  0x14   :  { %v1059_v15 = vld [vmem:[%s2230_s1 + $0x68] sm:$0xf0]  ;;  %v1283_v20 = vld [vmem:[%s2230_s1 + $0x1c] sm:$0xf0]  ;;  %v1019_v22 = vld [vmem:[%s2230_s1 + $0x20] sm:$0xf0] }
  0x15   :  { %463 = vmatpush.bf16.msra.mxu0 %v1114_v56  ;;  %512 = vmatpush.bf16.msra.mxu1 %v1118_v57  ;;  %v1062_v23 = vor.u32 %v1288_v14, %v1059_v15  ;;  %v1025_v24 = vld [vmem:[%s2230_s1 + $0x8] sm:$0xf]  ;;  %v1280_v26 = vld [vmem:[%s2230_s1 + $0xc] sm:$0xf]  ;;  %v1265_v28 = vld [vmem:[%s2230_s1 + $0x1d8] sm:$0xf]  ;;  %v1018_v30 = vor.u32 %v1283_v20, %v1017_v17  ;;  %v1022_v33 = vor.u32 %v1279_v21, %v1019_v22 }
  0x16   :  { %561 = vmatpush.bf16.msra.mxu2 %v1122_v58  ;;  %v1284_v25 = vld [vmem:[%s2230_s1 + $0x24] sm:$0xf0]  ;;  %v1027_v27 = vld [vmem:[%s2230_s1 + $0x28] sm:$0xf0]  ;;  %v1342_v29 = vld [vmem:[%s2230_s1 + $0x1f4] sm:$0xf0] }
  0x17   :  { %610 = vmatpush.bf16.msra.mxu3 %v1126_v62  ;;  %v1338_v31 = vld [vmem:[%s2230_s1 + $0x1dc] sm:$0xf]  ;;  %v1026_v34 = vor.u32 %v1284_v25, %v1025_v24  ;;  %v1565_v35 = vld [vmem:[%s2231_s0] sm:$0xff]  ;;  %v1030_v36 = vor.u32 %v1280_v26, %v1027_v27  ;;  %v1266_v37 = vor.u32 %v1342_v29, %v1265_v28  ;;  %v1257_v38 = vld [vmem:[%s2230_s1 + $0x1d0] sm:$0xf] }
  0x18   :  { %v1267_v32 = vld [vmem:[%s2230_s1 + $0x1f8] sm:$0xf0]  ;;  %v1341_v39 = vld [vmem:[%s2230_s1 + $0x1ec] sm:$0xf0]  ;;  %v1337_v40 = vld [vmem:[%s2230_s1 + $0x1d4] sm:$0xf] }
  0x19   :  { %464 = vmatpush.bf16.msra.mxu0 %v1082_v4  ;;  %513 = vmatpush.bf16.msra.mxu1 %v1086_v5  ;;  %v1270_v41 = vor.u32 %v1338_v31, %v1267_v32  ;;  %v1259_v42 = vld [vmem:[%s2230_s1 + $0x1f0] sm:$0xf0]  ;;  %v1233_v43 = vld [vmem:[%s2230_s1 + $0x198] sm:$0xf]  ;;  %v1330_v45 = vld [vmem:[%s2230_s1 + $0x19c] sm:$0xf]  ;;  %v1258_v47 = vor.u32 %v1341_v39, %v1257_v38 }
  0x1a   :  { %562 = vmatpush.bf16.msra.mxu2 %v1090_v6  ;;  %v1334_v44 = vld [vmem:[%s2230_s1 + $0x1b4] sm:$0xf0]  ;;  %v1235_v46 = vld [vmem:[%s2230_s1 + $0x1b8] sm:$0xf0]  ;;  %v1262_v48 = vor.u32 %v1337_v40, %v1259_v42  ;;  %v1225_v50 = vld [vmem:[%s2230_s1 + $0x190] sm:$0xf] }
  0x1b   :  { %611 = vmatpush.bf16.msra.mxu3 %v1094_v10  ;;  %v1234_v49 = vor.u32 %v1334_v44, %v1233_v43  ;;  %v1333_v51 = vld [vmem:[%s2230_s1 + $0x1ac] sm:$0xf0]  ;;  %v1238_v52 = vor.u32 %v1330_v45, %v1235_v46  ;;  %v1329_v53 = vld [vmem:[%s2230_s1 + $0x194] sm:$0xf]  ;;  %v1201_v56 = vld [vmem:[%s2230_s1 + $0x158] sm:$0xf] }
  0x1c   :  { %v1227_v54 = vld [vmem:[%s2230_s1 + $0x1b0] sm:$0xf0]  ;;  %v1226_v55 = vor.u32 %v1333_v51, %v1225_v50  ;;  %v1326_v57 = vld [vmem:[%s2230_s1 + $0x174] sm:$0xf0]  ;;  %v1322_v58 = vld [vmem:[%s2230_s1 + $0x15c] sm:$0xf] }
  0x1d   :  { %465 = vmatpush.bf16.msra.mxu0 %v1050_v16  ;;  %514 = vmatpush.bf16.msra.mxu1 %v1054_v18  ;;  %v1230_v59 = vor.u32 %v1329_v53, %v1227_v54  ;;  %v1202_v60 = vor.u32 %v1326_v57, %v1201_v56  ;;  %v1203_v61 = vld [vmem:[%s2230_s1 + $0x178] sm:$0xf0]  ;;  %v1193_v62 = vld [vmem:[%s2230_s1 + $0x150] sm:$0xf]  ;;  %v1321_v1 = vld [vmem:[%s2230_s1 + $0x154] sm:$0xf] }
  0x1e   :  { %563 = vmatpush.bf16.msra.mxu2 %v1058_v19  ;;  %v1325_v63 = vld [vmem:[%s2230_s1 + $0x16c] sm:$0xf0]  ;;  %v1206_v0 = vor.u32 %v1322_v58, %v1203_v61  ;;  %v1195_v2 = vld [vmem:[%s2230_s1 + $0x170] sm:$0xf0]  ;;  %v1634_v5 = vld [vmem:[%s2231_s0 + $0x8] sm:$0xff] }
  0x1f   :  { %612 = vmatpush.bf16.msra.mxu3 %v1062_v23  ;;  %v1194_v3 = vor.u32 %v1325_v63, %v1193_v62  ;;  %v1198_v4 = vor.u32 %v1321_v1, %v1195_v2  ;;  %v1169_v6 = vld [vmem:[%s2230_s1 + $0x118] sm:$0xf]  ;;  %v1314_v8 = vld [vmem:[%s2230_s1 + $0x11c] sm:$0xf]  ;;  %v1161_v11 = vld [vmem:[%s2230_s1 + $0x110] sm:$0xf] }
  0x20   :  { %v1318_v7 = vld [vmem:[%s2230_s1 + $0x134] sm:$0xf0]  ;;  %v1171_v10 = vld [vmem:[%s2230_s1 + $0x138] sm:$0xf0]  ;;  %v1317_v12 = vld [vmem:[%s2230_s1 + $0x12c] sm:$0xf0] }
  0x21   :  { %466 = vmatpush.bf16.msra.mxu0 %v1018_v30  ;;  %515 = vmatpush.bf16.msra.mxu1 %v1022_v33  ;;  %v1170_v9 = vor.u32 %v1318_v7, %v1169_v6  ;;  %v1174_v13 = vor.u32 %v1314_v8, %v1171_v10  ;;  %v1162_v14 = vor.u32 %v1317_v12, %v1161_v11  ;;  %v1313_v15 = vld [vmem:[%s2230_s1 + $0x114] sm:$0xf]  ;;  %v1137_v19 = vld [vmem:[%s2230_s1 + $0xd8] sm:$0xf]  ;;  %v1306_v21 = vld [vmem:[%s2230_s1 + $0xdc] sm:$0xf] }
  0x22   :  { %564 = vmatpush.bf16.msra.mxu2 %v1026_v34  ;;  %v1163_v16 = vld [vmem:[%s2230_s1 + $0x130] sm:$0xf0]  ;;  %v1310_v20 = vld [vmem:[%s2230_s1 + $0xf4] sm:$0xf0]  ;;  %v1139_v23 = vld [vmem:[%s2230_s1 + $0xf8] sm:$0xf0] }
  0x23   :  { %613 = vmatpush.bf16.msra.mxu3 %v1030_v36  ;;  %v1166_v17 = vor.u32 %v1313_v15, %v1163_v16  ;;  %v1667_v18 = vld [vmem:[%s2231_s0 + $0x10] sm:$0xff]  ;;  %v1138_v22 = vor.u32 %v1310_v20, %v1137_v19  ;;  %v1142_v26 = vor.u32 %v1306_v21, %v1139_v23  ;;  %v1700_v31 = vld [vmem:[%s2231_s0 + $0x18] sm:$0xff]  ;;  %v1733_v45 = vld [vmem:[%s2231_s0 + $0x20] sm:$0xff] }
  0x24   :  { %467 = vmatmul.bf16.vlgmr.msra.gmra.mxu0 %v1565_v35  ;;  %516 = vmatmul.bf16.vlgmr.msra.gmra.mxu1 %v1565_v35  ;;  %v1129_v24 = vld [vmem:[%s2230_s1 + $0xd0] sm:$0xf]  ;;  %v1305_v28 = vld [vmem:[%s2230_s1 + $0xd4] sm:$0xf]  ;;  %v1105_v32 = vld [vmem:[%s2230_s1 + $0x98] sm:$0xf] }
  0x25   :  { %565 = vmatmul.bf16.vlgmr.msra.gmra.mxu2 %v1565_v35  ;;  %655 = vmatpush.bf16.msrb.mxu0 %v1258_v47  ;;  %v1309_v25 = vld [vmem:[%s2230_s1 + $0xec] sm:$0xf0]  ;;  %v1131_v29 = vld [vmem:[%s2230_s1 + $0xf0] sm:$0xf0]  ;;  %v1302_v33 = vld [vmem:[%s2230_s1 + $0xb4] sm:$0xf0] }
  0x26   :  { %753 = vmatpush.bf16.msrb.mxu2 %v1266_v37  ;;  %614 = vmatmul.bf16.vlgmr.msra.gmra.mxu3 %v1565_v35  ;;  %v1130_v27 = vor.u32 %v1309_v25, %v1129_v24  ;;  %v1134_v30 = vor.u32 %v1305_v28, %v1131_v29  ;;  %v1298_v34 = vld [vmem:[%s2230_s1 + $0x9c] sm:$0xf]  ;;  %v1106_v36 = vor.u32 %v1302_v33, %v1105_v32  ;;  %v1097_v38 = vld [vmem:[%s2230_s1 + $0x90] sm:$0xf]  ;;  %v1297_v42 = vld [vmem:[%s2230_s1 + $0x94] sm:$0xf] }
  0x27   :  { %802 = vmatpush.bf16.msrb.mxu3 %v1270_v41  ;;  %704 = vmatpush.bf16.msrb.mxu1 %v1262_v48  ;;  %v1107_v37 = vld [vmem:[%s2230_s1 + $0xb8] sm:$0xf0]  ;;  %v1301_v39 = vld [vmem:[%s2230_s1 + $0xac] sm:$0xf0]  ;;  %v1099_v43 = vld [vmem:[%s2230_s1 + $0xb0] sm:$0xf0] }
  0x28   :  { %v1110_v40 = vor.u32 %v1298_v34, %v1107_v37  ;;  %v1098_v41 = vor.u32 %v1301_v39, %v1097_v38  ;;  %v1102_v44 = vor.u32 %v1297_v42, %v1099_v43  ;;  %v1073_v46 = vld [vmem:[%s2230_s1 + $0x58] sm:$0xf]  ;;  %v1290_v48 = vld [vmem:[%s2230_s1 + $0x5c] sm:$0xf]  ;;  %v1065_v51 = vld [vmem:[%s2230_s1 + $0x50] sm:$0xf] }
  0x29   :  { %656 = vmatpush.bf16.msrb.mxu0 %v1226_v55  ;;  %v1294_v47 = vld [vmem:[%s2230_s1 + $0x74] sm:$0xf0]  ;;  %v1075_v50 = vld [vmem:[%s2230_s1 + $0x78] sm:$0xf0]  ;;  %v1289_v55 = vld [vmem:[%s2230_s1 + $0x54] sm:$0xf] }
  0x2a   :  { %754 = vmatpush.bf16.msrb.mxu2 %v1234_v49  ;;  %v1074_v49 = vor.u32 %v1294_v47, %v1073_v46  ;;  %v1078_v53 = vor.u32 %v1290_v48, %v1075_v50  ;;  %v1067_v56 = vld [vmem:[%s2230_s1 + $0x70] sm:$0xf0]  ;;  %v1766_v58 = vld [vmem:[%s2231_s0 + $0x28] sm:$0xff]  ;;  %v1282_v61 = vld [vmem:[%s2230_s1 + $0x1c] sm:$0xf] }
  0x2b   :  { %803 = vmatpush.bf16.msrb.mxu3 %v1238_v52  ;;  %705 = vmatpush.bf16.msrb.mxu1 %v1230_v59  ;;  %v1293_v52 = vld [vmem:[%s2230_s1 + $0x6c] sm:$0xf0]  ;;  %v1070_v57 = vor.u32 %v1289_v55, %v1067_v56  ;;  %v1041_v59 = vld [vmem:[%s2230_s1 + $0x18] sm:$0xf]  ;;  %v1043_v63 = vld [vmem:[%s2230_s1 + $0x38] sm:$0xf0] }
  0x2c   :  { %v1066_v54 = vor.u32 %v1293_v52, %v1065_v51  ;;  %v1285_v1 = vld [vmem:[%s2230_s1 + $0x2c] sm:$0xf0]  ;;  %v1046_v2 = vor.u32 %v1282_v61, %v1043_v63  ;;  %v1035_v6 = vld [vmem:[%s2230_s1 + $0x30] sm:$0xf0] }
  0x2d   :  { %657 = vmatpush.bf16.msrb.mxu0 %v1194_v3  ;;  %v1799_v8 = vld [vmem:[%s2231_s0 + $0x30] sm:$0xff] }
  0x2e   :  { %755 = vmatpush.bf16.msrb.mxu2 %v1202_v60  ;;  %v1286_v60 = vld [vmem:[%s2230_s1 + $0x34] sm:$0xf0] }
  0x2f   :  { %804 = vmatpush.bf16.msrb.mxu3 %v1206_v0  ;;  %706 = vmatpush.bf16.msrb.mxu1 %v1198_v4  ;;  %v1042_v62 = vor.u32 %v1286_v60, %v1041_v59  ;;  %v1033_v0 = vld [vmem:[%s2230_s1 + $0x10] sm:$0xf]  ;;  %v1281_v4 = vld [vmem:[%s2230_s1 + $0x14] sm:$0xf] }
  0x30   :  { %v1034_v3 = vor.u32 %v1285_v1, %v1033_v0  ;;  %v1038_v7 = vor.u32 %v1281_v4, %v1035_v6 }
  0x31   :  { %658 = vmatpush.bf16.msrb.mxu0 %v1162_v14 }
  0x32   :  { %756 = vmatpush.bf16.msrb.mxu2 %v1170_v9  ;;  %v1808_v9 = vld [vmem:[%s2231_s0 + $0x38] sm:$0xff] }
  0x33   :  { %805 = vmatpush.bf16.msrb.mxu3 %v1174_v13  ;;  %707 = vmatpush.bf16.msrb.mxu1 %v1166_v17 }
  0x34   :  { %472 = vmatmul.bf16.gmra.mxu0 %v1634_v5  ;;  %521 = vmatmul.bf16.gmra.mxu1 %v1634_v5 }
  0x35   :  { %570 = vmatmul.bf16.gmra.mxu2 %v1634_v5  ;;  %659 = vmatpush.bf16.msrb.mxu0 %v1130_v27 }
  0x36   :  { %619 = vmatmul.bf16.gmra.mxu3 %v1634_v5  ;;  %757 = vmatpush.bf16.msrb.mxu2 %v1138_v22 }
  0x37   :  { %806 = vmatpush.bf16.msrb.mxu3 %v1142_v26  ;;  %708 = vmatpush.bf16.msrb.mxu1 %v1134_v30 }
  0x39   :  { %660 = vmatpush.bf16.msrb.mxu0 %v1098_v41 }
  0x3a   :  { %758 = vmatpush.bf16.msrb.mxu2 %v1106_v36 }
  0x3b   :  { %807 = vmatpush.bf16.msrb.mxu3 %v1110_v40  ;;  %709 = vmatpush.bf16.msrb.mxu1 %v1102_v44 }
  0x3d   :  { %661 = vmatpush.bf16.msrb.mxu0 %v1066_v54 }
  0x3e   :  { %759 = vmatpush.bf16.msrb.mxu2 %v1074_v49 }
  0x3f   :  { %808 = vmatpush.bf16.msrb.mxu3 %v1078_v53  ;;  %710 = vmatpush.bf16.msrb.mxu1 %v1070_v57 }
  0x41   :  { %662 = vmatpush.bf16.msrb.mxu0 %v1034_v3 }
  0x42   :  { %760 = vmatpush.bf16.msrb.mxu2 %v1042_v62 }
  0x43   :  { %809 = vmatpush.bf16.msrb.mxu3 %v1046_v2  ;;  %711 = vmatpush.bf16.msrb.mxu1 %v1038_v7 }
  0x44   :  { %477 = vmatmul.bf16.gmra.mxu0 %v1667_v18  ;;  %526 = vmatmul.bf16.gmra.mxu1 %v1667_v18 }
  0x45   :  { %575 = vmatmul.bf16.gmra.mxu2 %v1667_v18 }
  0x46   :  { %624 = vmatmul.bf16.gmra.mxu3 %v1667_v18 }
  0x54   :  { %482 = vmatmul.bf16.gmra.mxu0 %v1700_v31  ;;  %531 = vmatmul.bf16.gmra.mxu1 %v1700_v31 }
  0x55   :  { %580 = vmatmul.bf16.gmra.mxu2 %v1700_v31 }
  0x56   :  { %629 = vmatmul.bf16.gmra.mxu3 %v1700_v31 }
  0x64   :  { %487 = vmatmul.bf16.gmra.mxu0 %v1733_v45  ;;  %536 = vmatmul.bf16.gmra.mxu1 %v1733_v45 }
  0x65   :  { %585 = vmatmul.bf16.gmra.mxu2 %v1733_v45 }
  0x66   :  { %634 = vmatmul.bf16.gmra.mxu3 %v1733_v45 }
  0x74   :  { %492 = vmatmul.bf16.gmra.mxu0 %v1766_v58  ;;  %541 = vmatmul.bf16.gmra.mxu1 %v1766_v58 }
  0x75   :  { %590 = vmatmul.bf16.gmra.mxu2 %v1766_v58 }
  0x76   :  { %639 = vmatmul.bf16.gmra.mxu3 %v1766_v58 }
  0x84   :  { %497 = vmatmul.bf16.gmra.mxu0 %v1799_v8  ;;  %546 = vmatmul.bf16.gmra.mxu1 %v1799_v8 }
  0x85   :  { %595 = vmatmul.bf16.gmra.mxu2 %v1799_v8 }
  0x86   :  { %644 = vmatmul.bf16.gmra.mxu3 %v1799_v8 }
  0x94   :  { %502 = vmatmul.bf16.gmra.mxu0 %v1808_v9  ;;  %551 = vmatmul.bf16.gmra.mxu1 %v1808_v9 }
  0x95   :  { %600 = vmatmul.bf16.gmra.mxu2 %v1808_v9 }
  0x96   :  { %649 = vmatmul.bf16.gmra.mxu3 %v1808_v9 }
  0xa1   :  { %v468_v10 = vpop.f32.mrf.mxu0  ;;  %v517_v11 = vpop.f32.mrf.mxu1 }
  0xa2   :  { %851 = vst [vmem:[%s2232_s2] sm:$0xff] %v468_v10 }
  0xa3   :  { %852 = vst [vmem:[%s2232_s2 + $0x8] sm:$0xff] %v517_v11 }
  0xa4   :  { %663 = vmatmul.bf16.vlgmr.msrb.gmra.mxu0 %v1565_v35  ;;  %712 = vmatmul.bf16.vlgmr.msrb.gmra.mxu1 %v1565_v35 }
  0xa5   :  { %761 = vmatmul.bf16.vlgmr.msrb.gmra.mxu2 %v1565_v35 }
  0xa6   :  { %810 = vmatmul.bf16.vlgmr.msrb.gmra.mxu3 %v1565_v35 }
  0xa8   :  { %v566_v12 = vpop.f32.mrf.mxu2 }
  0xa9   :  { %853 = vst [vmem:[%s2232_s2 + $0x10] sm:$0xff] %v566_v12  ;;  %v615_v13 = vpop.f32.mrf.mxu3  ;;  %v470_v14 = vpop.f32.mrf.mxu0 }
  0xaa   :  { %854 = vst [vmem:[%s2232_s2 + $0x18] sm:$0xff] %v615_v13  ;;  %v519_v15 = vpop.f32.mrf.mxu1 }
  0xab   :  { %859 = vst [vmem:[%s2232_s2 + $0x40] sm:$0xff] %v470_v14 }
  0xac   :  { %860 = vst [vmem:[%s2232_s2 + $0x48] sm:$0xff] %v519_v15 }
  0xb0   :  { %v568_v35 = vpop.f32.mrf.mxu2 }
  0xb1   :  { %861 = vst [vmem:[%s2232_s2 + $0x50] sm:$0xff] %v568_v35  ;;  %v617_v16 = vpop.f32.mrf.mxu3  ;;  %v473_v17 = vpop.f32.mrf.mxu0 }
  0xb2   :  { %862 = vst [vmem:[%s2232_s2 + $0x58] sm:$0xff] %v617_v16  ;;  %v522_v19 = vpop.f32.mrf.mxu1 }
  0xb3   :  { %867 = vst [vmem:[%s2232_s2 + $0x80] sm:$0xff] %v473_v17 }
  0xb4   :  { %868 = vst [vmem:[%s2232_s2 + $0x88] sm:$0xff] %v522_v19  ;;  %668 = vmatmul.bf16.gmra.mxu0 %v1634_v5  ;;  %717 = vmatmul.bf16.gmra.mxu1 %v1634_v5 }
  0xb5   :  { %766 = vmatmul.bf16.gmra.mxu2 %v1634_v5 }
  0xb6   :  { %815 = vmatmul.bf16.gmra.mxu3 %v1634_v5 }
  0xb8   :  { %v571_v20 = vpop.f32.mrf.mxu2 }
  0xb9   :  { %869 = vst [vmem:[%s2232_s2 + $0x90] sm:$0xff] %v571_v20  ;;  %v620_v21 = vpop.f32.mrf.mxu3  ;;  %v475_v22 = vpop.f32.mrf.mxu0 }
  0xba   :  { %870 = vst [vmem:[%s2232_s2 + $0x98] sm:$0xff] %v620_v21  ;;  %v524_v23 = vpop.f32.mrf.mxu1 }
  0xbb   :  { %875 = vst [vmem:[%s2232_s2 + $0xc0] sm:$0xff] %v475_v22 }
  0xbc   :  { %876 = vst [vmem:[%s2232_s2 + $0xc8] sm:$0xff] %v524_v23 }
  0xc0   :  { %v573_v5 = vpop.f32.mrf.mxu2 }
  0xc1   :  { %877 = vst [vmem:[%s2232_s2 + $0xd0] sm:$0xff] %v573_v5  ;;  %v622_v24 = vpop.f32.mrf.mxu3  ;;  %v478_v25 = vpop.f32.mrf.mxu0 }
  0xc2   :  { %878 = vst [vmem:[%s2232_s2 + $0xd8] sm:$0xff] %v622_v24  ;;  %v527_v26 = vpop.f32.mrf.mxu1 }
  0xc3   :  { %883 = vst [vmem:[%s2232_s2 + $0x100] sm:$0xff] %v478_v25 }
  0xc4   :  { %884 = vst [vmem:[%s2232_s2 + $0x108] sm:$0xff] %v527_v26  ;;  %673 = vmatmul.bf16.gmra.mxu0 %v1667_v18  ;;  %722 = vmatmul.bf16.gmra.mxu1 %v1667_v18 }
  0xc5   :  { %771 = vmatmul.bf16.gmra.mxu2 %v1667_v18 }
  0xc6   :  { %820 = vmatmul.bf16.gmra.mxu3 %v1667_v18 }
  0xc8   :  { %v576_v27 = vpop.f32.mrf.mxu2 }
  0xc9   :  { %885 = vst [vmem:[%s2232_s2 + $0x110] sm:$0xff] %v576_v27  ;;  %v625_v28 = vpop.f32.mrf.mxu3  ;;  %v480_v29 = vpop.f32.mrf.mxu0 }
  0xca   :  { %886 = vst [vmem:[%s2232_s2 + $0x118] sm:$0xff] %v625_v28  ;;  %v529_v30 = vpop.f32.mrf.mxu1 }
  0xcb   :  { %891 = vst [vmem:[%s2232_s2 + $0x140] sm:$0xff] %v480_v29 }
  0xcc   :  { %892 = vst [vmem:[%s2232_s2 + $0x148] sm:$0xff] %v529_v30 }
  0xd0   :  { %v578_v18 = vpop.f32.mrf.mxu2 }
  0xd1   :  { %893 = vst [vmem:[%s2232_s2 + $0x150] sm:$0xff] %v578_v18  ;;  %v627_v32 = vpop.f32.mrf.mxu3  ;;  %v483_v33 = vpop.f32.mrf.mxu0 }
  0xd2   :  { %894 = vst [vmem:[%s2232_s2 + $0x158] sm:$0xff] %v627_v32  ;;  %v532_v34 = vpop.f32.mrf.mxu1 }
  0xd3   :  { %899 = vst [vmem:[%s2232_s2 + $0x180] sm:$0xff] %v483_v33 }
  0xd4   :  { %900 = vst [vmem:[%s2232_s2 + $0x188] sm:$0xff] %v532_v34  ;;  %678 = vmatmul.bf16.gmra.mxu0 %v1700_v31  ;;  %727 = vmatmul.bf16.gmra.mxu1 %v1700_v31 }
  0xd5   :  { %776 = vmatmul.bf16.gmra.mxu2 %v1700_v31 }
  0xd6   :  { %825 = vmatmul.bf16.gmra.mxu3 %v1700_v31 }
  0xd8   :  { %v581_v36 = vpop.f32.mrf.mxu2 }
  0xd9   :  { %901 = vst [vmem:[%s2232_s2 + $0x190] sm:$0xff] %v581_v36  ;;  %v630_v37 = vpop.f32.mrf.mxu3  ;;  %v485_v38 = vpop.f32.mrf.mxu0 }
  0xda   :  { %902 = vst [vmem:[%s2232_s2 + $0x198] sm:$0xff] %v630_v37  ;;  %v534_v39 = vpop.f32.mrf.mxu1 }
  0xdb   :  { %907 = vst [vmem:[%s2232_s2 + $0x1c0] sm:$0xff] %v485_v38 }
  0xdc   :  { %908 = vst [vmem:[%s2232_s2 + $0x1c8] sm:$0xff] %v534_v39 }
  0xe0   :  { %v583_v31 = vpop.f32.mrf.mxu2 }
  0xe1   :  { %909 = vst [vmem:[%s2232_s2 + $0x1d0] sm:$0xff] %v583_v31  ;;  %v632_v40 = vpop.f32.mrf.mxu3  ;;  %v488_v41 = vpop.f32.mrf.mxu0 }
  0xe2   :  { %910 = vst [vmem:[%s2232_s2 + $0x1d8] sm:$0xff] %v632_v40  ;;  %v537_v42 = vpop.f32.mrf.mxu1 }
  0xe3   :  { %915 = vst [vmem:[%s2232_s2 + $0x200] sm:$0xff] %v488_v41 }
  0xe4   :  { %916 = vst [vmem:[%s2232_s2 + $0x208] sm:$0xff] %v537_v42  ;;  %683 = vmatmul.bf16.gmra.mxu0 %v1733_v45  ;;  %732 = vmatmul.bf16.gmra.mxu1 %v1733_v45 }
  0xe5   :  { %781 = vmatmul.bf16.gmra.mxu2 %v1733_v45 }
  0xe6   :  { %830 = vmatmul.bf16.gmra.mxu3 %v1733_v45 }
  0xe8   :  { %v586_v43 = vpop.f32.mrf.mxu2 }
  0xe9   :  { %917 = vst [vmem:[%s2232_s2 + $0x210] sm:$0xff] %v586_v43  ;;  %v635_v44 = vpop.f32.mrf.mxu3  ;;  %v490_v46 = vpop.f32.mrf.mxu0 }
  0xea   :  { %918 = vst [vmem:[%s2232_s2 + $0x218] sm:$0xff] %v635_v44  ;;  %v539_v47 = vpop.f32.mrf.mxu1 }
  0xeb   :  { %923 = vst [vmem:[%s2232_s2 + $0x240] sm:$0xff] %v490_v46 }
  0xec   :  { %924 = vst [vmem:[%s2232_s2 + $0x248] sm:$0xff] %v539_v47 }
  0xf0   :  { %v588_v45 = vpop.f32.mrf.mxu2 }
  0xf1   :  { %925 = vst [vmem:[%s2232_s2 + $0x250] sm:$0xff] %v588_v45  ;;  %v637_v48 = vpop.f32.mrf.mxu3  ;;  %v493_v49 = vpop.f32.mrf.mxu0 }
  0xf2   :  { %926 = vst [vmem:[%s2232_s2 + $0x258] sm:$0xff] %v637_v48  ;;  %v542_v50 = vpop.f32.mrf.mxu1 }
  0xf3   :  { %931 = vst [vmem:[%s2232_s2 + $0x280] sm:$0xff] %v493_v49 }
  0xf4   :  { %932 = vst [vmem:[%s2232_s2 + $0x288] sm:$0xff] %v542_v50  ;;  %688 = vmatmul.bf16.gmra.mxu0 %v1766_v58  ;;  %737 = vmatmul.bf16.gmra.mxu1 %v1766_v58 }
  0xf5   :  { %786 = vmatmul.bf16.gmra.mxu2 %v1766_v58 }
  0xf6   :  { %835 = vmatmul.bf16.gmra.mxu3 %v1766_v58 }
  0xf8   :  { %v591_v51 = vpop.f32.mrf.mxu2 }
  0xf9   :  { %933 = vst [vmem:[%s2232_s2 + $0x290] sm:$0xff] %v591_v51  ;;  %v640_v52 = vpop.f32.mrf.mxu3  ;;  %v495_v53 = vpop.f32.mrf.mxu0 }
  0xfa   :  { %934 = vst [vmem:[%s2232_s2 + $0x298] sm:$0xff] %v640_v52  ;;  %v544_v54 = vpop.f32.mrf.mxu1 }
  0xfb   :  { %939 = vst [vmem:[%s2232_s2 + $0x2c0] sm:$0xff] %v495_v53 }
  0xfc   :  { %940 = vst [vmem:[%s2232_s2 + $0x2c8] sm:$0xff] %v544_v54 }
 0x100   :  { %v593_v55 = vpop.f32.mrf.mxu2 }
 0x101   :  { %941 = vst [vmem:[%s2232_s2 + $0x2d0] sm:$0xff] %v593_v55  ;;  %v642_v56 = vpop.f32.mrf.mxu3  ;;  %v498_v57 = vpop.f32.mrf.mxu0 }
 0x102   :  { %942 = vst [vmem:[%s2232_s2 + $0x2d8] sm:$0xff] %v642_v56  ;;  %v547_v58 = vpop.f32.mrf.mxu1 }
 0x103   :  { %947 = vst [vmem:[%s2232_s2 + $0x300] sm:$0xff] %v498_v57 }
 0x104   :  { %948 = vst [vmem:[%s2232_s2 + $0x308] sm:$0xff] %v547_v58  ;;  %693 = vmatmul.bf16.gmra.mxu0 %v1799_v8  ;;  %742 = vmatmul.bf16.gmra.mxu1 %v1799_v8 }
 0x105   :  { %791 = vmatmul.bf16.gmra.mxu2 %v1799_v8 }
 0x106   :  { %840 = vmatmul.bf16.gmra.mxu3 %v1799_v8 }
 0x108   :  { %v596_v59 = vpop.f32.mrf.mxu2 }
 0x109   :  { %949 = vst [vmem:[%s2232_s2 + $0x310] sm:$0xff] %v596_v59  ;;  %v645_v60 = vpop.f32.mrf.mxu3  ;;  %v500_v61 = vpop.f32.mrf.mxu0 }
 0x10a   :  { %950 = vst [vmem:[%s2232_s2 + $0x318] sm:$0xff] %v645_v60  ;;  %v549_v62 = vpop.f32.mrf.mxu1 }
 0x10b   :  { %955 = vst [vmem:[%s2232_s2 + $0x340] sm:$0xff] %v500_v61 }
 0x10c   :  { %956 = vst [vmem:[%s2232_s2 + $0x348] sm:$0xff] %v549_v62 }
 0x110   :  { %v598_v63 = vpop.f32.mrf.mxu2 }
 0x111   :  { %957 = vst [vmem:[%s2232_s2 + $0x350] sm:$0xff] %v598_v63  ;;  %v647_v0 = vpop.f32.mrf.mxu3  ;;  %v503_v1 = vpop.f32.mrf.mxu0 }
 0x112   :  { %958 = vst [vmem:[%s2232_s2 + $0x358] sm:$0xff] %v647_v0  ;;  %v552_v2 = vpop.f32.mrf.mxu1 }
 0x113   :  { %963 = vst [vmem:[%s2232_s2 + $0x380] sm:$0xff] %v503_v1 }
 0x114   :  { %964 = vst [vmem:[%s2232_s2 + $0x388] sm:$0xff] %v552_v2  ;;  %698 = vmatmul.bf16.gmra.mxu0 %v1808_v9  ;;  %747 = vmatmul.bf16.gmra.mxu1 %v1808_v9 }
 0x115   :  { %796 = vmatmul.bf16.gmra.mxu2 %v1808_v9 }
 0x116   :  { %845 = vmatmul.bf16.gmra.mxu3 %v1808_v9 }
 0x118   :  { %v601_v3 = vpop.f32.mrf.mxu2 }
 0x119   :  { %965 = vst [vmem:[%s2232_s2 + $0x390] sm:$0xff] %v601_v3  ;;  %v650_v4 = vpop.f32.mrf.mxu3  ;;  %v505_v6 = vpop.f32.mrf.mxu0 }
 0x11a   :  { %966 = vst [vmem:[%s2232_s2 + $0x398] sm:$0xff] %v650_v4  ;;  %v554_v7 = vpop.f32.mrf.mxu1 }
 0x11b   :  { %971 = vst [vmem:[%s2232_s2 + $0x3c0] sm:$0xff] %v505_v6 }
 0x11c   :  { %972 = vst [vmem:[%s2232_s2 + $0x3c8] sm:$0xff] %v554_v7 }
 0x120   :  { %v603_v8 = vpop.f32.mrf.mxu2 }
 0x121   :  { %973 = vst [vmem:[%s2232_s2 + $0x3d0] sm:$0xff] %v603_v8  ;;  %v652_v9 = vpop.f32.mrf.mxu3  ;;  %v664_v10 = vpop.f32.mrf.mxu0 }
 0x122   :  { %974 = vst [vmem:[%s2232_s2 + $0x3d8] sm:$0xff] %v652_v9  ;;  %v713_v11 = vpop.f32.mrf.mxu1 }
 0x123   :  { %855 = vst [vmem:[%s2232_s2 + $0x20] sm:$0xff] %v664_v10 }
 0x124   :  { %856 = vst [vmem:[%s2232_s2 + $0x28] sm:$0xff] %v713_v11 }
 0x128   :  { %v762_v12 = vpop.f32.mrf.mxu2 }
 0x129   :  { %857 = vst [vmem:[%s2232_s2 + $0x30] sm:$0xff] %v762_v12  ;;  %v811_v13 = vpop.f32.mrf.mxu3  ;;  %v666_v14 = vpop.f32.mrf.mxu0 }
 0x12a   :  { %858 = vst [vmem:[%s2232_s2 + $0x38] sm:$0xff] %v811_v13  ;;  %v715_v15 = vpop.f32.mrf.mxu1 }
 0x12b   :  { %863 = vst [vmem:[%s2232_s2 + $0x60] sm:$0xff] %v666_v14 }
 0x12c   :  { %864 = vst [vmem:[%s2232_s2 + $0x68] sm:$0xff] %v715_v15 }
 0x130   :  { %v764_v35 = vpop.f32.mrf.mxu2 }
 0x131   :  { %865 = vst [vmem:[%s2232_s2 + $0x70] sm:$0xff] %v764_v35  ;;  %v813_v16 = vpop.f32.mrf.mxu3  ;;  %v669_v17 = vpop.f32.mrf.mxu0 }
 0x132   :  { %866 = vst [vmem:[%s2232_s2 + $0x78] sm:$0xff] %v813_v16  ;;  %v718_v19 = vpop.f32.mrf.mxu1 }
 0x133   :  { %871 = vst [vmem:[%s2232_s2 + $0xa0] sm:$0xff] %v669_v17 }
 0x134   :  { %872 = vst [vmem:[%s2232_s2 + $0xa8] sm:$0xff] %v718_v19 }
 0x138   :  { %v767_v20 = vpop.f32.mrf.mxu2 }
 0x139   :  { %873 = vst [vmem:[%s2232_s2 + $0xb0] sm:$0xff] %v767_v20  ;;  %v816_v21 = vpop.f32.mrf.mxu3  ;;  %v671_v22 = vpop.f32.mrf.mxu0 }
 0x13a   :  { %874 = vst [vmem:[%s2232_s2 + $0xb8] sm:$0xff] %v816_v21  ;;  %v720_v23 = vpop.f32.mrf.mxu1 }
 0x13b   :  { %879 = vst [vmem:[%s2232_s2 + $0xe0] sm:$0xff] %v671_v22 }
 0x13c   :  { %880 = vst [vmem:[%s2232_s2 + $0xe8] sm:$0xff] %v720_v23 }
 0x140   :  { %v769_v5 = vpop.f32.mrf.mxu2 }
 0x141   :  { %881 = vst [vmem:[%s2232_s2 + $0xf0] sm:$0xff] %v769_v5  ;;  %v818_v24 = vpop.f32.mrf.mxu3  ;;  %v674_v25 = vpop.f32.mrf.mxu0 }
 0x142   :  { %882 = vst [vmem:[%s2232_s2 + $0xf8] sm:$0xff] %v818_v24  ;;  %v723_v26 = vpop.f32.mrf.mxu1 }
 0x143   :  { %887 = vst [vmem:[%s2232_s2 + $0x120] sm:$0xff] %v674_v25 }
 0x144   :  { %888 = vst [vmem:[%s2232_s2 + $0x128] sm:$0xff] %v723_v26 }
 0x148   :  { %v772_v27 = vpop.f32.mrf.mxu2 }
 0x149   :  { %889 = vst [vmem:[%s2232_s2 + $0x130] sm:$0xff] %v772_v27  ;;  %v821_v28 = vpop.f32.mrf.mxu3  ;;  %v676_v29 = vpop.f32.mrf.mxu0 }
 0x14a   :  { %890 = vst [vmem:[%s2232_s2 + $0x138] sm:$0xff] %v821_v28  ;;  %v725_v30 = vpop.f32.mrf.mxu1 }
 0x14b   :  { %895 = vst [vmem:[%s2232_s2 + $0x160] sm:$0xff] %v676_v29 }
 0x14c   :  { %896 = vst [vmem:[%s2232_s2 + $0x168] sm:$0xff] %v725_v30 }
 0x150   :  { %v774_v18 = vpop.f32.mrf.mxu2 }
 0x151   :  { %897 = vst [vmem:[%s2232_s2 + $0x170] sm:$0xff] %v774_v18  ;;  %v823_v32 = vpop.f32.mrf.mxu3  ;;  %v679_v33 = vpop.f32.mrf.mxu0 }
 0x152   :  { %898 = vst [vmem:[%s2232_s2 + $0x178] sm:$0xff] %v823_v32  ;;  %v728_v34 = vpop.f32.mrf.mxu1 }
 0x153   :  { %903 = vst [vmem:[%s2232_s2 + $0x1a0] sm:$0xff] %v679_v33 }
 0x154   :  { %904 = vst [vmem:[%s2232_s2 + $0x1a8] sm:$0xff] %v728_v34 }
 0x158   :  { %v777_v36 = vpop.f32.mrf.mxu2 }
 0x159   :  { %905 = vst [vmem:[%s2232_s2 + $0x1b0] sm:$0xff] %v777_v36  ;;  %v826_v37 = vpop.f32.mrf.mxu3  ;;  %v681_v38 = vpop.f32.mrf.mxu0 }
 0x15a   :  { %906 = vst [vmem:[%s2232_s2 + $0x1b8] sm:$0xff] %v826_v37  ;;  %v730_v39 = vpop.f32.mrf.mxu1 }
 0x15b   :  { %911 = vst [vmem:[%s2232_s2 + $0x1e0] sm:$0xff] %v681_v38 }
 0x15c   :  { %912 = vst [vmem:[%s2232_s2 + $0x1e8] sm:$0xff] %v730_v39 }
 0x160   :  { %v779_v31 = vpop.f32.mrf.mxu2 }
 0x161   :  { %913 = vst [vmem:[%s2232_s2 + $0x1f0] sm:$0xff] %v779_v31  ;;  %v828_v40 = vpop.f32.mrf.mxu3  ;;  %v684_v41 = vpop.f32.mrf.mxu0 }
 0x162   :  { %914 = vst [vmem:[%s2232_s2 + $0x1f8] sm:$0xff] %v828_v40  ;;  %v733_v42 = vpop.f32.mrf.mxu1 }
 0x163   :  { %919 = vst [vmem:[%s2232_s2 + $0x220] sm:$0xff] %v684_v41 }
 0x164   :  { %920 = vst [vmem:[%s2232_s2 + $0x228] sm:$0xff] %v733_v42 }
 0x168   :  { %v782_v43 = vpop.f32.mrf.mxu2 }
 0x169   :  { %921 = vst [vmem:[%s2232_s2 + $0x230] sm:$0xff] %v782_v43  ;;  %v831_v44 = vpop.f32.mrf.mxu3  ;;  %v686_v46 = vpop.f32.mrf.mxu0 }
 0x16a   :  { %922 = vst [vmem:[%s2232_s2 + $0x238] sm:$0xff] %v831_v44  ;;  %v735_v47 = vpop.f32.mrf.mxu1 }
 0x16b   :  { %927 = vst [vmem:[%s2232_s2 + $0x260] sm:$0xff] %v686_v46 }
 0x16c   :  { %928 = vst [vmem:[%s2232_s2 + $0x268] sm:$0xff] %v735_v47 }
 0x170   :  { %v784_v45 = vpop.f32.mrf.mxu2 }
 0x171   :  { %929 = vst [vmem:[%s2232_s2 + $0x270] sm:$0xff] %v784_v45  ;;  %v833_v48 = vpop.f32.mrf.mxu3  ;;  %v689_v49 = vpop.f32.mrf.mxu0 }
 0x172   :  { %930 = vst [vmem:[%s2232_s2 + $0x278] sm:$0xff] %v833_v48  ;;  %v738_v50 = vpop.f32.mrf.mxu1 }
 0x173   :  { %935 = vst [vmem:[%s2232_s2 + $0x2a0] sm:$0xff] %v689_v49 }
 0x174   :  { %936 = vst [vmem:[%s2232_s2 + $0x2a8] sm:$0xff] %v738_v50 }
 0x178   :  { %v787_v51 = vpop.f32.mrf.mxu2 }
 0x179   :  { %937 = vst [vmem:[%s2232_s2 + $0x2b0] sm:$0xff] %v787_v51  ;;  %v836_v52 = vpop.f32.mrf.mxu3  ;;  %v691_v53 = vpop.f32.mrf.mxu0 }
 0x17a   :  { %938 = vst [vmem:[%s2232_s2 + $0x2b8] sm:$0xff] %v836_v52  ;;  %v740_v54 = vpop.f32.mrf.mxu1 }
 0x17b   :  { %943 = vst [vmem:[%s2232_s2 + $0x2e0] sm:$0xff] %v691_v53 }
 0x17c   :  { %944 = vst [vmem:[%s2232_s2 + $0x2e8] sm:$0xff] %v740_v54 }
 0x180   :  { %v789_v55 = vpop.f32.mrf.mxu2 }
 0x181   :  { %945 = vst [vmem:[%s2232_s2 + $0x2f0] sm:$0xff] %v789_v55  ;;  %v838_v56 = vpop.f32.mrf.mxu3  ;;  %v694_v57 = vpop.f32.mrf.mxu0 }
 0x182   :  { %946 = vst [vmem:[%s2232_s2 + $0x2f8] sm:$0xff] %v838_v56  ;;  %v743_v58 = vpop.f32.mrf.mxu1 }
 0x183   :  { %951 = vst [vmem:[%s2232_s2 + $0x320] sm:$0xff] %v694_v57 }
 0x184   :  { %952 = vst [vmem:[%s2232_s2 + $0x328] sm:$0xff] %v743_v58 }
 0x188   :  { %v792_v59 = vpop.f32.mrf.mxu2 }
 0x189   :  { %953 = vst [vmem:[%s2232_s2 + $0x330] sm:$0xff] %v792_v59  ;;  %v841_v60 = vpop.f32.mrf.mxu3  ;;  %v696_v61 = vpop.f32.mrf.mxu0 }
 0x18a   :  { %954 = vst [vmem:[%s2232_s2 + $0x338] sm:$0xff] %v841_v60  ;;  %v745_v62 = vpop.f32.mrf.mxu1 }
 0x18b   :  { %959 = vst [vmem:[%s2232_s2 + $0x360] sm:$0xff] %v696_v61 }
 0x18c   :  { %960 = vst [vmem:[%s2232_s2 + $0x368] sm:$0xff] %v745_v62 }
 0x190   :  { %v794_v63 = vpop.f32.mrf.mxu2 }
 0x191   :  { %961 = vst [vmem:[%s2232_s2 + $0x370] sm:$0xff] %v794_v63  ;;  %v843_v0 = vpop.f32.mrf.mxu3  ;;  %v699_v1 = vpop.f32.mrf.mxu0 }
 0x192   :  { %962 = vst [vmem:[%s2232_s2 + $0x378] sm:$0xff] %v843_v0  ;;  %v748_v2 = vpop.f32.mrf.mxu1 }
 0x193   :  { %967 = vst [vmem:[%s2232_s2 + $0x3a0] sm:$0xff] %v699_v1 }
 0x194   :  { %968 = vst [vmem:[%s2232_s2 + $0x3a8] sm:$0xff] %v748_v2 }
 0x198   :  { %v797_v3 = vpop.f32.mrf.mxu2 }
 0x199   :  { %969 = vst [vmem:[%s2232_s2 + $0x3b0] sm:$0xff] %v797_v3  ;;  %v846_v4 = vpop.f32.mrf.mxu3  ;;  %v701_v6 = vpop.f32.mrf.mxu0 }
 0x19a   :  { %970 = vst [vmem:[%s2232_s2 + $0x3b8] sm:$0xff] %v846_v4  ;;  %v750_v7 = vpop.f32.mrf.mxu1 }
 0x19b   :  { %975 = vst [vmem:[%s2232_s2 + $0x3e0] sm:$0xff] %v701_v6 }
 0x19c   :  { %976 = vst [vmem:[%s2232_s2 + $0x3e8] sm:$0xff] %v750_v7 }
 0x1a0   :  { %v799_v8 = vpop.f32.mrf.mxu2 }
 0x1a1   :  { %977 = vst [vmem:[%s2232_s2 + $0x3f0] sm:$0xff] %v799_v8  ;;  %v848_v9 = vpop.f32.mrf.mxu3 }
 0x1a2   :  { %978 = vst [vmem:[%s2232_s2 + $0x3f8] sm:$0xff] %v848_v9 }

// kernel: decoder_bev_forward.15
= control target key start
LH: loop header
LB: loop body
LE: loop exit
PB: predicated region body
PF: predicated region fallthrough
CT: control target
= control target key end

     0   :  { %s1293_s9 = smov 0   ;;  %s1640_s0 = inlined_call_operand.vmem [shape: bf16[1024,128], index: 0, kind: input, shape index: {}]   ;;  %s1641_s1 = inlined_call_operand.vmem [shape: bf16[128,192], index: 1, kind: input, shape index: {}]   ;;  %s1642_s2 = inlined_call_operand.vmem [shape: f32[1024,192], index: 2, kind: output, shape index: {}]  }
   0x1 LB: > { %s994_s10 = sadd.s32 4294967295, %s1276_s9   ;;  %p998_p0 = scmp.ge.s32.totalorder %s1276_s9, 1  ;;  %s1276_s9 = sphi %s1293_s9, %s12_s9  }
   0x2   : > { %p113_p1 = scmp.lt.s32.totalorder %s1276_s9, 3 }
   0x4   : > { %p114_p2 = pnand %p998_p0, %p113_p1 }
   0x5   : > { %s999_s17 = sshll.u32 (!%p114_p2), %s994_s10, 6 }
   0x6   : > { %117 = sbr.rel (%p114_p2) target bundleno = 427 (0x1ab), region = 28  ;;  %p137_p3 = scmp.lt.s32.totalorder (!%p114_p2), %s999_s17, 127 }
   0xb   : > { %v1062_v0 = vld [vmem:[%s1641_s1 + $0x70] sm:$0xf]  ;;  %v1086_v1 = vld [vmem:[%s1641_s1 + $0x74] sm:$0xf0]  ;;  %v1085_v2 = vld [vmem:[%s1641_s1 + $0x74] sm:$0xf] }
   0xc   : > { %v1063_v3 = vor.u32 %v1086_v1, %v1062_v0  ;;  %v1064_v4 = vld [vmem:[%s1641_s1 + $0x78] sm:$0xf0]  ;;  %v1054_v5 = vld [vmem:[%s1641_s1 + $0x60] sm:$0xf]  ;;  %v1084_v6 = vld [vmem:[%s1641_s1 + $0x64] sm:$0xf0] }
   0xd   : > { %v1067_v7 = vor.u32 %v1085_v2, %v1064_v4  ;;  %v1083_v8 = vld [vmem:[%s1641_s1 + $0x64] sm:$0xf]  ;;  %v1056_v9 = vld [vmem:[%s1641_s1 + $0x68] sm:$0xf0]  ;;  %v1055_v10 = vor.u32 %v1084_v6, %v1054_v5  ;;  %v1046_v12 = vld [vmem:[%s1641_s1 + $0x50] sm:$0xf] }
   0xe   : > { %469 = vmatpush.bf16.msra.mxu0 %v1063_v3  ;;  %1246 = vmatpush.bf16.msra.mxu2 %v1063_v3  ;;  %v1059_v11 = vor.u32 %v1083_v8, %v1056_v9  ;;  %v1082_v13 = vld [vmem:[%s1641_s1 + $0x54] sm:$0xf0]  ;;  %v1081_v14 = vld [vmem:[%s1641_s1 + $0x54] sm:$0xf]  ;;  %v1048_v15 = vld [vmem:[%s1641_s1 + $0x58] sm:$0xf0] }
   0xf   : > { %638 = vmatpush.bf16.msra.mxu1 %v1067_v7  ;;  %1254 = vmatpush.bf16.msra.mxu3 %v1067_v7  ;;  %v1047_v16 = vor.u32 %v1082_v13, %v1046_v12  ;;  %v1051_v17 = vor.u32 %v1081_v14, %v1048_v15  ;;  %v1038_v18 = vld [vmem:[%s1641_s1 + $0x40] sm:$0xf]  ;;  %v1080_v19 = vld [vmem:[%s1641_s1 + $0x44] sm:$0xf0]  ;;  %v1079_v20 = vld [vmem:[%s1641_s1 + $0x44] sm:$0xf] }
  0x10   : > { %v1040_v21 = vld [vmem:[%s1641_s1 + $0x48] sm:$0xf0]  ;;  %v1039_v22 = vor.u32 %v1080_v19, %v1038_v18  ;;  %v1030_v24 = vld [vmem:[%s1641_s1 + $0x30] sm:$0xf]  ;;  %v1078_v25 = vld [vmem:[%s1641_s1 + $0x34] sm:$0xf0] }
  0x11   : > { %v1043_v23 = vor.u32 %v1079_v20, %v1040_v21  ;;  %v1077_v26 = vld [vmem:[%s1641_s1 + $0x34] sm:$0xf]  ;;  %v1032_v27 = vld [vmem:[%s1641_s1 + $0x38] sm:$0xf0]  ;;  %s1644_s17 = smov (!%p137_p3, %s999_s17), 127  ;;  %v1031_v28 = vor.u32 %v1078_v25, %v1030_v24  ;;  %vm808_vm0 = vcmask 523264  }
  0x12   : > { %470 = vmatpush.bf16.msra.mxu0 %v1055_v10  ;;  %1247 = vmatpush.bf16.msra.mxu2 %v1055_v10  ;;  %s1000_s25 = sshll.u32 %s1644_s17, 2  ;;  %v1035_v29 = vor.u32 %v1077_v26, %v1032_v27  ;;  %v1022_v30 = vld [vmem:[%s1641_s1 + $0x20] sm:$0xf]  ;;  %v1076_v31 = vld [vmem:[%s1641_s1 + $0x24] sm:$0xf0]  ;;  %s1070_s27 = sshll.u32 %s1644_s17, 4 }
  0x13   : > { %639 = vmatpush.bf16.msra.mxu1 %v1059_v11  ;;  %1255 = vmatpush.bf16.msra.mxu3 %v1059_v11  ;;  %s1375_s4 = scalar_lea.vmem %s1640_s0, %s1000_s25  ;;  %v1075_v32 = vld [vmem:[%s1641_s1 + $0x24] sm:$0xf]  ;;  %v1024_v33 = vld [vmem:[%s1641_s1 + $0x28] sm:$0xf0]  ;;  %v1023_v34 = vor.u32 %v1076_v31, %v1022_v30  ;;  %v1014_v38 = vld [vmem:[%s1641_s1 + $0x10] sm:$0xf]  ;;  %s1429_s30 = scalar_lea.vmem %s1642_s2, %s1070_s27 }
  0x14   : > { %v1088_v35 = vld [vmem:[%s1375_s4] sm:$0xff]   ;;  %v1027_v37 = vor.u32 %v1075_v32, %v1024_v33  ;;  %v1074_v39 = vld [vmem:[%s1641_s1 + $0x14] sm:$0xf0]  ;;  %v1073_v40 = vld [vmem:[%s1641_s1 + $0x14] sm:$0xf] }
  0x15   : > { %v1230_v36 = vld [vmem:[%s1375_s4 + $0x80] sm:$0xff]   ;;  %v1016_v41 = vld [vmem:[%s1641_s1 + $0x18] sm:$0xf0]  ;;  %v1089_v42 = vunpack.c.l.bf16 %v1088_v35  ;;  %v1090_v43 = vunpack.c.h.bf16 %v1088_v35  ;;  %v1015_v46 = vor.u32 %v1074_v39, %v1014_v38  ;;  %v1072_v49 = vld [vmem:[%s1641_s1 + $0x4] sm:$0xf0] }
  0x16   : > { %471 = vmatpush.bf16.msra.mxu0 %v1047_v16  ;;  %1248 = vmatpush.bf16.msra.mxu2 %v1047_v16  ;;  %v1153_v44 = vunpack.c.l.bf16 %v1230_v36  ;;  %v1154_v45 = vunpack.c.h.bf16 %v1230_v36  ;;  %v1019_v47 = vor.u32 %v1073_v40, %v1016_v41  ;;  %v1006_v48 = vld [vmem:[%s1641_s1] sm:$0xf]  ;;  %v1071_v50 = vld [vmem:[%s1641_s1 + $0x4] sm:$0xf]  ;;  %v1008_v51 = vld [vmem:[%s1641_s1 + $0x8] sm:$0xf0] }
  0x17   : > { %640 = vmatpush.bf16.msra.mxu1 %v1051_v17  ;;  %1256 = vmatpush.bf16.msra.mxu3 %v1051_v17  ;;  %v277_v52 = vmax.f32 %v1089_v42, 0.0  ;;  %v278_v53 = vmax.f32 %v1090_v43, 0.0  ;;  %v1007_v56 = vor.u32 %v1072_v49, %v1006_v48  ;;  %v1011_v57 = vor.u32 %v1071_v50, %v1008_v51  ;;  %v1215_v60 = vld [vmem:[%s1375_s4 + $0x8] sm:$0xff]   ;;  %v1216_v8 = vld [vmem:[%s1375_s4 + $0x10] sm:$0xff]   ;;  %v1217_v20 = vld [vmem:[%s1375_s4 + $0x18] sm:$0xff]  }
  0x18   : > { %v309_v54 = vmax.f32 %v1153_v44, 0.0  ;;  %v310_v55 = vmax.f32 %v1154_v45, 0.0  ;;  %v1231_v61 = vld [vmem:[%s1375_s4 + $0x88] sm:$0xff]   ;;  %v1093_v62 = vunpack.c.l.bf16 %v1215_v60  ;;  %v1094_v63 = vunpack.c.h.bf16 %v1215_v60  ;;  %v1232_v9 = vld [vmem:[%s1375_s4 + $0x90] sm:$0xff]   ;;  %v1233_v21 = vld [vmem:[%s1375_s4 + $0x98] sm:$0xff]  }
  0x19   : > { %v341_v58 = vpack.c.bf16 %v278_v53, %v277_v52  ;;  %v1157_v0 = vunpack.c.l.bf16 %v1231_v61  ;;  %v1158_v1 = vunpack.c.h.bf16 %v1231_v61  ;;  %v1097_v10 = vunpack.c.l.bf16 %v1216_v8  ;;  %v1218_v32 = vld [vmem:[%s1375_s4 + $0x20] sm:$0xff]   ;;  %v1219_v44 = vld [vmem:[%s1375_s4 + $0x28] sm:$0xff]  }
  0x1a   : > { %472 = vmatpush.bf16.msra.mxu0 %v1039_v22  ;;  %1249 = vmatpush.bf16.msra.mxu2 %v1039_v22  ;;  %v357_v59 = vpack.c.bf16 %v310_v55, %v309_v54  ;;  %v279_v2 = vmax.f32 %v1093_v62, 0.0  ;;  %v280_v3 = vmax.f32 %v1094_v63, 0.0  ;;  %v1098_v11 = vunpack.c.h.bf16 %v1216_v8  ;;  %v1234_v33 = vld [vmem:[%s1375_s4 + $0xa0] sm:$0xff]   ;;  %v1235_v45 = vld [vmem:[%s1375_s4 + $0xa8] sm:$0xff]  }
  0x1b   : > { %641 = vmatpush.bf16.msra.mxu1 %v1043_v23  ;;  %1257 = vmatpush.bf16.msra.mxu3 %v1043_v23  ;;  %v311_v4 = vmax.f32 %v1157_v0, 0.0  ;;  %v312_v5 = vmax.f32 %v1158_v1, 0.0  ;;  %v1161_v12 = vunpack.c.l.bf16 %v1232_v9  ;;  %v1162_v13 = vunpack.c.h.bf16 %v1232_v9 }
  0x1c   : > { %v342_v6 = vpack.c.bf16 %v280_v3, %v279_v2  ;;  %v281_v14 = vmax.f32 %v1097_v10, 0.0  ;;  %v282_v15 = vmax.f32 %v1098_v11, 0.0  ;;  %v1101_v22 = vunpack.c.l.bf16 %v1217_v20 }
  0x1d   : > { %v358_v7 = vpack.c.bf16 %v312_v5, %v311_v4  ;;  %v313_v16 = vmax.f32 %v1161_v12, 0.0  ;;  %v314_v17 = vmax.f32 %v1162_v13, 0.0  ;;  %v1102_v23 = vunpack.c.h.bf16 %v1217_v20  ;;  %v1221_v4 = vld [vmem:[%s1375_s4 + $0x38] sm:$0xff]  }
  0x1e   : > { %473 = vmatpush.bf16.msra.mxu0 %v1031_v28  ;;  %1250 = vmatpush.bf16.msra.mxu2 %v1031_v28  ;;  %v343_v18 = vpack.c.bf16 %v282_v15, %v281_v14  ;;  %v1165_v24 = vunpack.c.l.bf16 %v1233_v21  ;;  %v1166_v25 = vunpack.c.h.bf16 %v1233_v21  ;;  %v283_v26 = vmax.f32 %v1101_v22, 0.0  ;;  %v1237_v5 = vld [vmem:[%s1375_s4 + $0xb8] sm:$0xff]  }
  0x1f   : > { %642 = vmatpush.bf16.msra.mxu1 %v1035_v29  ;;  %1258 = vmatpush.bf16.msra.mxu3 %v1035_v29  ;;  %v359_v19 = vpack.c.bf16 %v314_v17, %v313_v16  ;;  %v284_v27 = vmax.f32 %v1102_v23, 0.0  ;;  %v1106_v35 = vunpack.c.h.bf16 %v1218_v32  ;;  %v1169_v36 = vunpack.c.l.bf16 %v1234_v33  ;;  %v1222_v16 = vld [vmem:[%s1375_s4 + $0x40] sm:$0xff]  }
  0x20   : > { %v315_v28 = vmax.f32 %v1165_v24, 0.0  ;;  %v316_v29 = vmax.f32 %v1166_v25, 0.0  ;;  %v1173_v48 = vunpack.c.l.bf16 %v1235_v45  ;;  %v1174_v49 = vunpack.c.h.bf16 %v1235_v45  ;;  %v1238_v17 = vld [vmem:[%s1375_s4 + $0xc0] sm:$0xff]  }
  0x21   : > { %v344_v30 = vpack.c.bf16 %v284_v27, %v283_v26  ;;  %v286_v39 = vmax.f32 %v1106_v35, 0.0  ;;  %v317_v40 = vmax.f32 %v1169_v36, 0.0  ;;  %v1181_v8 = vunpack.c.l.bf16 %v1237_v5 }
  0x22   : > { %474 = vmatpush.bf16.msra.mxu0 %v1023_v34  ;;  %1251 = vmatpush.bf16.msra.mxu2 %v1023_v34  ;;  %v360_v31 = vpack.c.bf16 %v316_v29, %v315_v28  ;;  %v1105_v34 = vunpack.c.l.bf16 %v1218_v32  ;;  %v319_v52 = vmax.f32 %v1173_v48, 0.0  ;;  %v320_v53 = vmax.f32 %v1174_v49, 0.0 }
  0x23   : > { %643 = vmatpush.bf16.msra.mxu1 %v1027_v37  ;;  %1259 = vmatpush.bf16.msra.mxu3 %v1027_v37  ;;  %v1170_v37 = vunpack.c.h.bf16 %v1234_v33  ;;  %v1182_v9 = vunpack.c.h.bf16 %v1237_v5  ;;  %v323_v12 = vmax.f32 %v1181_v8, 0.0  ;;  %v1185_v20 = vunpack.c.l.bf16 %v1238_v17 }
  0x24   : > { %v285_v38 = vmax.f32 %v1105_v34, 0.0  ;;  %v362_v55 = vpack.c.bf16 %v320_v53, %v319_v52  ;;  %v1186_v21 = vunpack.c.h.bf16 %v1238_v17 }
  0x25   : > { %v318_v41 = vmax.f32 %v1170_v37, 0.0  ;;  %v324_v13 = vmax.f32 %v1182_v9, 0.0  ;;  %v325_v24 = vmax.f32 %v1185_v20, 0.0 }
  0x26   : > { %475 = vmatpush.bf16.msra.mxu0 %v1015_v46  ;;  %1252 = vmatpush.bf16.msra.mxu2 %v1015_v46  ;;  %v345_v42 = vpack.c.bf16 %v286_v39, %v285_v38  ;;  %v1109_v46 = vunpack.c.l.bf16 %v1219_v44  ;;  %v326_v25 = vmax.f32 %v1186_v21, 0.0 }
  0x27   : > { %644 = vmatpush.bf16.msra.mxu1 %v1019_v47  ;;  %1260 = vmatpush.bf16.msra.mxu3 %v1019_v47  ;;  %v361_v43 = vpack.c.bf16 %v318_v41, %v317_v40  ;;  %v1110_v47 = vunpack.c.h.bf16 %v1219_v44  ;;  %v364_v15 = vpack.c.bf16 %v324_v13, %v323_v12 }
  0x28   : > { %v287_v50 = vmax.f32 %v1109_v46, 0.0  ;;  %v365_v27 = vpack.c.bf16 %v326_v25, %v325_v24 }
  0x29   : > { %v288_v51 = vmax.f32 %v1110_v47, 0.0 }
  0x2a   : > { %476 = vmatpush.bf16.msra.mxu0 %v1007_v56  ;;  %1253 = vmatpush.bf16.msra.mxu2 %v1007_v56  ;;  %v1220_v56 = vld [vmem:[%s1375_s4 + $0x30] sm:$0xff]  }
  0x2b   : > { %645 = vmatpush.bf16.msra.mxu1 %v1011_v57  ;;  %1261 = vmatpush.bf16.msra.mxu3 %v1011_v57  ;;  %v346_v54 = vpack.c.bf16 %v288_v51, %v287_v50  ;;  %v1236_v57 = vld [vmem:[%s1375_s4 + $0xb0] sm:$0xff]  }
  0x2c   : > { %v1177_v60 = vunpack.c.l.bf16 %v1236_v57  ;;  %v1178_v61 = vunpack.c.h.bf16 %v1236_v57  ;;  %v1224_v50 = vld [vmem:[%s1375_s4 + $0x50] sm:$0xff]  }
  0x2d   : > { %477 = vmatmul.bf16.vlgmr.msra.gmra.mxu0 %v341_v58  ;;  %557 = vmatmul.bf16.vlgmr.msra.gmra.mxu2 %v357_v59  ;;  %v1240_v51 = vld [vmem:[%s1375_s4 + $0xd0] sm:$0xff]  }
  0x2e   : > { %646 = vmatmul.bf16.vlgmr.msra.gmra.mxu1 %v341_v58  ;;  %726 = vmatmul.bf16.vlgmr.msra.gmra.mxu3 %v357_v59  ;;  %v1113_v58 = vunpack.c.l.bf16 %v1220_v56  ;;  %v1114_v59 = vunpack.c.h.bf16 %v1220_v56  ;;  %v321_v0 = vmax.f32 %v1177_v60, 0.0  ;;  %v322_v1 = vmax.f32 %v1178_v61, 0.0 }
  0x2f   : > { %v1193_v56 = vunpack.c.l.bf16 %v1240_v51  ;;  %v1194_v57 = vunpack.c.h.bf16 %v1240_v51 }
  0x30   : > { %v289_v62 = vmax.f32 %v1113_v58, 0.0  ;;  %v290_v63 = vmax.f32 %v1114_v59, 0.0  ;;  %v363_v3 = vpack.c.bf16 %v322_v1, %v321_v0 }
  0x32   : > { %v347_v2 = vpack.c.bf16 %v290_v63, %v289_v62  ;;  %v329_v62 = vmax.f32 %v1193_v56, 0.0  ;;  %v330_v63 = vmax.f32 %v1194_v57, 0.0 }
  0x3d   : > { %482 = vmatmul.bf16.gmra.mxu0 %v342_v6  ;;  %562 = vmatmul.bf16.gmra.mxu2 %v358_v7 }
  0x3e   : > { %651 = vmatmul.bf16.gmra.mxu1 %v342_v6  ;;  %731 = vmatmul.bf16.gmra.mxu3 %v358_v7  ;;  %v1117_v6 = vunpack.c.l.bf16 %v1221_v4  ;;  %v1118_v7 = vunpack.c.h.bf16 %v1221_v4 }
  0x40   : > { %v291_v10 = vmax.f32 %v1117_v6, 0.0  ;;  %v292_v11 = vmax.f32 %v1118_v7, 0.0  ;;  %v1225_v6 = vld [vmem:[%s1375_s4 + $0x58] sm:$0xff]  }
  0x41   : > { %v1241_v7 = vld [vmem:[%s1375_s4 + $0xd8] sm:$0xff]  }
  0x42   : > { %v348_v14 = vpack.c.bf16 %v292_v11, %v291_v10  ;;  %v1133_v10 = vunpack.c.l.bf16 %v1225_v6  ;;  %v1134_v11 = vunpack.c.h.bf16 %v1225_v6  ;;  %v1197_v12 = vunpack.c.l.bf16 %v1241_v7 }
  0x43   : > { %v1198_v13 = vunpack.c.h.bf16 %v1241_v7 }
  0x44   : > { %v300_v17 = vmax.f32 %v1134_v11, 0.0 }
  0x4d   : > { %487 = vmatmul.bf16.gmra.mxu0 %v343_v18  ;;  %567 = vmatmul.bf16.gmra.mxu2 %v359_v19 }
  0x4e   : > { %656 = vmatmul.bf16.gmra.mxu1 %v343_v18  ;;  %736 = vmatmul.bf16.gmra.mxu3 %v359_v19  ;;  %v1121_v18 = vunpack.c.l.bf16 %v1222_v16  ;;  %v1122_v19 = vunpack.c.h.bf16 %v1222_v16  ;;  %v299_v16 = vmax.f32 %v1133_v10, 0.0 }
  0x50   : > { %v293_v22 = vmax.f32 %v1121_v18, 0.0  ;;  %v294_v23 = vmax.f32 %v1122_v19, 0.0  ;;  %v331_v18 = vmax.f32 %v1197_v12, 0.0  ;;  %v332_v19 = vmax.f32 %v1198_v13, 0.0 }
  0x52   : > { %v349_v26 = vpack.c.bf16 %v294_v23, %v293_v22  ;;  %v352_v22 = vpack.c.bf16 %v300_v17, %v299_v16  ;;  %v368_v23 = vpack.c.bf16 %v332_v19, %v331_v18 }
  0x5d   : > { %492 = vmatmul.bf16.gmra.mxu0 %v344_v30  ;;  %572 = vmatmul.bf16.gmra.mxu2 %v360_v31 }
  0x5e   : > { %661 = vmatmul.bf16.gmra.mxu1 %v344_v30  ;;  %741 = vmatmul.bf16.gmra.mxu3 %v360_v31  ;;  %v1223_v30 = vld [vmem:[%s1375_s4 + $0x48] sm:$0xff]  }
  0x5f   : > { %v1239_v31 = vld [vmem:[%s1375_s4 + $0xc8] sm:$0xff]   ;;  %v1125_v34 = vunpack.c.l.bf16 %v1223_v30  ;;  %v1126_v35 = vunpack.c.h.bf16 %v1223_v30 }
  0x60   : > { %v1189_v36 = vunpack.c.l.bf16 %v1239_v31  ;;  %v1190_v37 = vunpack.c.h.bf16 %v1239_v31 }
  0x61   : > { %v295_v40 = vmax.f32 %v1125_v34, 0.0  ;;  %v296_v41 = vmax.f32 %v1126_v35, 0.0 }
  0x63   : > { %v350_v46 = vpack.c.bf16 %v296_v41, %v295_v40 }
  0x6d   : > { %497 = vmatmul.bf16.gmra.mxu0 %v345_v42  ;;  %577 = vmatmul.bf16.gmra.mxu2 %v361_v43 }
  0x6e   : > { %666 = vmatmul.bf16.gmra.mxu1 %v345_v42  ;;  %746 = vmatmul.bf16.gmra.mxu3 %v361_v43  ;;  %v327_v42 = vmax.f32 %v1189_v36, 0.0  ;;  %v328_v43 = vmax.f32 %v1190_v37, 0.0 }
  0x70   : > { %v366_v47 = vpack.c.bf16 %v328_v43, %v327_v42 }
  0x7d   : > { %502 = vmatmul.bf16.gmra.mxu0 %v346_v54  ;;  %582 = vmatmul.bf16.gmra.mxu2 %v362_v55 }
  0x7e   : > { %671 = vmatmul.bf16.gmra.mxu1 %v346_v54  ;;  %751 = vmatmul.bf16.gmra.mxu3 %v362_v55  ;;  %v1129_v54 = vunpack.c.l.bf16 %v1224_v50  ;;  %v1130_v55 = vunpack.c.h.bf16 %v1224_v50 }
  0x80   : > { %v297_v60 = vmax.f32 %v1129_v54, 0.0  ;;  %v298_v61 = vmax.f32 %v1130_v55, 0.0 }
  0x8d   : > { %507 = vmatmul.bf16.gmra.mxu0 %v347_v2  ;;  %587 = vmatmul.bf16.gmra.mxu2 %v363_v3 }
  0x8e   : > { %676 = vmatmul.bf16.gmra.mxu1 %v347_v2  ;;  %756 = vmatmul.bf16.gmra.mxu3 %v363_v3  ;;  %v351_v2 = vpack.c.bf16 %v298_v61, %v297_v60  ;;  %v367_v3 = vpack.c.bf16 %v330_v63, %v329_v62 }
  0x9d   : > { %512 = vmatmul.bf16.gmra.mxu0 %v348_v14  ;;  %592 = vmatmul.bf16.gmra.mxu2 %v364_v15 }
  0x9e   : > { %681 = vmatmul.bf16.gmra.mxu1 %v348_v14  ;;  %761 = vmatmul.bf16.gmra.mxu3 %v364_v15 }
  0xaa   : > { %v478_v28 = vpop.f32.mrf.mxu0 }
  0xab   : > { %807 = vst [vmem:[%s1429_s30] sm:$0xff] %v478_v28  ;;  %v647_v29 = vpop.f32.mrf.mxu1 }
  0xac   : > { %809 = vst.msk [vmem:[%s1429_s30 + $0x8] sm:$0xff] %vm808_vm0, %v647_v29 }
  0xad   : > { %517 = vmatmul.bf16.gmra.mxu0 %v349_v26  ;;  %597 = vmatmul.bf16.gmra.mxu2 %v365_v27 }
  0xae   : > { %686 = vmatmul.bf16.gmra.mxu1 %v349_v26  ;;  %766 = vmatmul.bf16.gmra.mxu3 %v365_v27  ;;  %v1226_v26 = vld [vmem:[%s1375_s4 + $0x60] sm:$0xff]  }
  0xaf   : > { %v1242_v27 = vld [vmem:[%s1375_s4 + $0xe0] sm:$0xff]   ;;  %v1137_v30 = vunpack.c.l.bf16 %v1226_v26  ;;  %v1138_v31 = vunpack.c.h.bf16 %v1226_v26 }
  0xb0   : > { %v558_v32 = vpop.f32.mrf.mxu2 }
  0xb1   : > { %872 = vst [vmem:[%s1429_s30 + $0x200] sm:$0xff] %v558_v32  ;;  %v727_v33 = vpop.f32.mrf.mxu3  ;;  %v1201_v32 = vunpack.c.l.bf16 %v1242_v27  ;;  %v301_v36 = vmax.f32 %v1137_v30, 0.0  ;;  %v302_v37 = vmax.f32 %v1138_v31, 0.0 }
  0xb2   : > { %873 = vst.msk [vmem:[%s1429_s30 + $0x208] sm:$0xff] %vm808_vm0, %v727_v33  ;;  %v480_v38 = vpop.f32.mrf.mxu0  ;;  %v1202_v33 = vunpack.c.h.bf16 %v1242_v27 }
  0xb3   : > { %810 = vst [vmem:[%s1429_s30 + $0x10] sm:$0xff] %v480_v38  ;;  %v649_v39 = vpop.f32.mrf.mxu1  ;;  %v333_v38 = vmax.f32 %v1201_v32, 0.0  ;;  %v353_v42 = vpack.c.bf16 %v302_v37, %v301_v36 }
  0xb4   : > { %811 = vst.msk [vmem:[%s1429_s30 + $0x18] sm:$0xff] %vm808_vm0, %v649_v39  ;;  %v334_v39 = vmax.f32 %v1202_v33, 0.0 }
  0xb6   : > { %v369_v43 = vpack.c.bf16 %v334_v39, %v333_v38 }
  0xb8   : > { %v560_v44 = vpop.f32.mrf.mxu2 }
  0xb9   : > { %874 = vst [vmem:[%s1429_s30 + $0x210] sm:$0xff] %v560_v44  ;;  %v729_v45 = vpop.f32.mrf.mxu3 }
  0xba   : > { %875 = vst.msk [vmem:[%s1429_s30 + $0x218] sm:$0xff] %vm808_vm0, %v729_v45  ;;  %v483_v48 = vpop.f32.mrf.mxu0 }
  0xbb   : > { %812 = vst [vmem:[%s1429_s30 + $0x20] sm:$0xff] %v483_v48  ;;  %v652_v49 = vpop.f32.mrf.mxu1 }
  0xbc   : > { %813 = vst.msk [vmem:[%s1429_s30 + $0x28] sm:$0xff] %vm808_vm0, %v652_v49 }
  0xbd   : > { %522 = vmatmul.bf16.gmra.mxu0 %v350_v46  ;;  %602 = vmatmul.bf16.gmra.mxu2 %v366_v47 }
  0xbe   : > { %691 = vmatmul.bf16.gmra.mxu1 %v350_v46  ;;  %771 = vmatmul.bf16.gmra.mxu3 %v366_v47  ;;  %v1227_v46 = vld [vmem:[%s1375_s4 + $0x68] sm:$0xff]  }
  0xbf   : > { %v1243_v47 = vld [vmem:[%s1375_s4 + $0xe8] sm:$0xff]   ;;  %v1141_v50 = vunpack.c.l.bf16 %v1227_v46  ;;  %v1142_v51 = vunpack.c.h.bf16 %v1227_v46 }
  0xc0   : > { %v563_v52 = vpop.f32.mrf.mxu2 }
  0xc1   : > { %876 = vst [vmem:[%s1429_s30 + $0x220] sm:$0xff] %v563_v52  ;;  %v732_v53 = vpop.f32.mrf.mxu3  ;;  %v1205_v52 = vunpack.c.l.bf16 %v1243_v47  ;;  %v303_v56 = vmax.f32 %v1141_v50, 0.0  ;;  %v304_v57 = vmax.f32 %v1142_v51, 0.0 }
  0xc2   : > { %877 = vst.msk [vmem:[%s1429_s30 + $0x228] sm:$0xff] %vm808_vm0, %v732_v53  ;;  %v485_v58 = vpop.f32.mrf.mxu0  ;;  %v1206_v53 = vunpack.c.h.bf16 %v1243_v47 }
  0xc3   : > { %814 = vst [vmem:[%s1429_s30 + $0x30] sm:$0xff] %v485_v58  ;;  %v654_v59 = vpop.f32.mrf.mxu1  ;;  %v335_v58 = vmax.f32 %v1205_v52, 0.0  ;;  %v354_v62 = vpack.c.bf16 %v304_v57, %v303_v56 }
  0xc4   : > { %815 = vst.msk [vmem:[%s1429_s30 + $0x38] sm:$0xff] %vm808_vm0, %v654_v59  ;;  %v336_v59 = vmax.f32 %v1206_v53, 0.0 }
  0xc6   : > { %v370_v63 = vpack.c.bf16 %v336_v59, %v335_v58 }
  0xc8   : > { %v565_v0 = vpop.f32.mrf.mxu2 }
  0xc9   : > { %878 = vst [vmem:[%s1429_s30 + $0x230] sm:$0xff] %v565_v0  ;;  %v734_v1 = vpop.f32.mrf.mxu3 }
  0xca   : > { %879 = vst.msk [vmem:[%s1429_s30 + $0x238] sm:$0xff] %vm808_vm0, %v734_v1  ;;  %v488_v4 = vpop.f32.mrf.mxu0 }
  0xcb   : > { %816 = vst [vmem:[%s1429_s30 + $0x40] sm:$0xff] %v488_v4  ;;  %v657_v5 = vpop.f32.mrf.mxu1 }
  0xcc   : > { %817 = vst.msk [vmem:[%s1429_s30 + $0x48] sm:$0xff] %vm808_vm0, %v657_v5 }
  0xcd   : > { %527 = vmatmul.bf16.gmra.mxu0 %v351_v2  ;;  %607 = vmatmul.bf16.gmra.mxu2 %v367_v3 }
  0xce   : > { %696 = vmatmul.bf16.gmra.mxu1 %v351_v2  ;;  %776 = vmatmul.bf16.gmra.mxu3 %v367_v3  ;;  %v1228_v2 = vld [vmem:[%s1375_s4 + $0x70] sm:$0xff]  }
  0xcf   : > { %v1244_v3 = vld [vmem:[%s1375_s4 + $0xf0] sm:$0xff]   ;;  %v1145_v6 = vunpack.c.l.bf16 %v1228_v2  ;;  %v1146_v7 = vunpack.c.h.bf16 %v1228_v2 }
  0xd0   : > { %v568_v8 = vpop.f32.mrf.mxu2 }
  0xd1   : > { %880 = vst [vmem:[%s1429_s30 + $0x240] sm:$0xff] %v568_v8  ;;  %v737_v9 = vpop.f32.mrf.mxu3  ;;  %v1209_v8 = vunpack.c.l.bf16 %v1244_v3  ;;  %v305_v12 = vmax.f32 %v1145_v6, 0.0  ;;  %v306_v13 = vmax.f32 %v1146_v7, 0.0 }
  0xd2   : > { %881 = vst.msk [vmem:[%s1429_s30 + $0x248] sm:$0xff] %vm808_vm0, %v737_v9  ;;  %v490_v14 = vpop.f32.mrf.mxu0  ;;  %v1210_v9 = vunpack.c.h.bf16 %v1244_v3 }
  0xd3   : > { %818 = vst [vmem:[%s1429_s30 + $0x50] sm:$0xff] %v490_v14  ;;  %v659_v15 = vpop.f32.mrf.mxu1  ;;  %v337_v14 = vmax.f32 %v1209_v8, 0.0  ;;  %v355_v18 = vpack.c.bf16 %v306_v13, %v305_v12 }
  0xd4   : > { %819 = vst.msk [vmem:[%s1429_s30 + $0x58] sm:$0xff] %vm808_vm0, %v659_v15  ;;  %v338_v15 = vmax.f32 %v1210_v9, 0.0 }
  0xd6   : > { %v371_v19 = vpack.c.bf16 %v338_v15, %v337_v14 }
  0xd8   : > { %v570_v20 = vpop.f32.mrf.mxu2 }
  0xd9   : > { %882 = vst [vmem:[%s1429_s30 + $0x250] sm:$0xff] %v570_v20  ;;  %v739_v21 = vpop.f32.mrf.mxu3 }
  0xda   : > { %883 = vst.msk [vmem:[%s1429_s30 + $0x258] sm:$0xff] %vm808_vm0, %v739_v21  ;;  %v493_v24 = vpop.f32.mrf.mxu0 }
  0xdb   : > { %820 = vst [vmem:[%s1429_s30 + $0x60] sm:$0xff] %v493_v24  ;;  %v662_v25 = vpop.f32.mrf.mxu1 }
  0xdc   : > { %821 = vst.msk [vmem:[%s1429_s30 + $0x68] sm:$0xff] %vm808_vm0, %v662_v25 }
  0xdd   : > { %532 = vmatmul.bf16.gmra.mxu0 %v352_v22  ;;  %612 = vmatmul.bf16.gmra.mxu2 %v368_v23 }
  0xde   : > { %701 = vmatmul.bf16.gmra.mxu1 %v352_v22  ;;  %781 = vmatmul.bf16.gmra.mxu3 %v368_v23  ;;  %v1229_v22 = vld [vmem:[%s1375_s4 + $0x78] sm:$0xff]  }
  0xdf   : > { %v1245_v23 = vld [vmem:[%s1375_s4 + $0xf8] sm:$0xff]   ;;  %v1149_v26 = vunpack.c.l.bf16 %v1229_v22  ;;  %v1150_v27 = vunpack.c.h.bf16 %v1229_v22 }
  0xe0   : > { %v573_v28 = vpop.f32.mrf.mxu2 }
  0xe1   : > { %884 = vst [vmem:[%s1429_s30 + $0x260] sm:$0xff] %v573_v28  ;;  %v742_v29 = vpop.f32.mrf.mxu3  ;;  %v1213_v28 = vunpack.c.l.bf16 %v1245_v23  ;;  %v307_v32 = vmax.f32 %v1149_v26, 0.0  ;;  %v308_v33 = vmax.f32 %v1150_v27, 0.0 }
  0xe2   : > { %885 = vst.msk [vmem:[%s1429_s30 + $0x268] sm:$0xff] %vm808_vm0, %v742_v29  ;;  %v495_v34 = vpop.f32.mrf.mxu0  ;;  %v1214_v29 = vunpack.c.h.bf16 %v1245_v23 }
  0xe3   : > { %822 = vst [vmem:[%s1429_s30 + $0x70] sm:$0xff] %v495_v34  ;;  %v664_v35 = vpop.f32.mrf.mxu1  ;;  %v339_v34 = vmax.f32 %v1213_v28, 0.0  ;;  %v356_v38 = vpack.c.bf16 %v308_v33, %v307_v32 }
  0xe4   : > { %823 = vst.msk [vmem:[%s1429_s30 + $0x78] sm:$0xff] %vm808_vm0, %v664_v35  ;;  %v340_v35 = vmax.f32 %v1214_v29, 0.0 }
  0xe6   : > { %v372_v39 = vpack.c.bf16 %v340_v35, %v339_v34 }
  0xe8   : > { %v575_v40 = vpop.f32.mrf.mxu2 }
  0xe9   : > { %886 = vst [vmem:[%s1429_s30 + $0x270] sm:$0xff] %v575_v40  ;;  %v744_v41 = vpop.f32.mrf.mxu3 }
  0xea   : > { %887 = vst.msk [vmem:[%s1429_s30 + $0x278] sm:$0xff] %vm808_vm0, %v744_v41  ;;  %v498_v44 = vpop.f32.mrf.mxu0 }
  0xeb   : > { %824 = vst [vmem:[%s1429_s30 + $0x80] sm:$0xff] %v498_v44  ;;  %v667_v45 = vpop.f32.mrf.mxu1 }
  0xec   : > { %825 = vst.msk [vmem:[%s1429_s30 + $0x88] sm:$0xff] %vm808_vm0, %v667_v45 }
  0xed   : > { %537 = vmatmul.bf16.gmra.mxu0 %v353_v42  ;;  %617 = vmatmul.bf16.gmra.mxu2 %v369_v43 }
  0xee   : > { %706 = vmatmul.bf16.gmra.mxu1 %v353_v42  ;;  %786 = vmatmul.bf16.gmra.mxu3 %v369_v43 }
  0xf0   : > { %v578_v48 = vpop.f32.mrf.mxu2 }
  0xf1   : > { %888 = vst [vmem:[%s1429_s30 + $0x280] sm:$0xff] %v578_v48  ;;  %v747_v49 = vpop.f32.mrf.mxu3 }
  0xf2   : > { %889 = vst.msk [vmem:[%s1429_s30 + $0x288] sm:$0xff] %vm808_vm0, %v747_v49  ;;  %v500_v54 = vpop.f32.mrf.mxu0 }
  0xf3   : > { %826 = vst [vmem:[%s1429_s30 + $0x90] sm:$0xff] %v500_v54  ;;  %v669_v55 = vpop.f32.mrf.mxu1 }
  0xf4   : > { %827 = vst.msk [vmem:[%s1429_s30 + $0x98] sm:$0xff] %vm808_vm0, %v669_v55 }
  0xf8   : > { %v580_v60 = vpop.f32.mrf.mxu2 }
  0xf9   : > { %890 = vst [vmem:[%s1429_s30 + $0x290] sm:$0xff] %v580_v60  ;;  %v749_v61 = vpop.f32.mrf.mxu3 }
  0xfa   : > { %891 = vst.msk [vmem:[%s1429_s30 + $0x298] sm:$0xff] %vm808_vm0, %v749_v61  ;;  %v503_v0 = vpop.f32.mrf.mxu0 }
  0xfb   : > { %828 = vst [vmem:[%s1429_s30 + $0xa0] sm:$0xff] %v503_v0  ;;  %v672_v1 = vpop.f32.mrf.mxu1 }
  0xfc   : > { %829 = vst.msk [vmem:[%s1429_s30 + $0xa8] sm:$0xff] %vm808_vm0, %v672_v1 }
  0xfd   : > { %542 = vmatmul.bf16.gmra.mxu0 %v354_v62  ;;  %622 = vmatmul.bf16.gmra.mxu2 %v370_v63 }
  0xfe   : > { %711 = vmatmul.bf16.gmra.mxu1 %v354_v62  ;;  %791 = vmatmul.bf16.gmra.mxu3 %v370_v63 }
 0x100   : > { %v583_v4 = vpop.f32.mrf.mxu2 }
 0x101   : > { %892 = vst [vmem:[%s1429_s30 + $0x2a0] sm:$0xff] %v583_v4  ;;  %v752_v5 = vpop.f32.mrf.mxu3 }
 0x102   : > { %893 = vst.msk [vmem:[%s1429_s30 + $0x2a8] sm:$0xff] %vm808_vm0, %v752_v5  ;;  %v505_v10 = vpop.f32.mrf.mxu0 }
 0x103   : > { %830 = vst [vmem:[%s1429_s30 + $0xb0] sm:$0xff] %v505_v10  ;;  %v674_v11 = vpop.f32.mrf.mxu1 }
 0x104   : > { %831 = vst.msk [vmem:[%s1429_s30 + $0xb8] sm:$0xff] %vm808_vm0, %v674_v11 }
 0x108   : > { %v585_v16 = vpop.f32.mrf.mxu2 }
 0x109   : > { %894 = vst [vmem:[%s1429_s30 + $0x2b0] sm:$0xff] %v585_v16  ;;  %v754_v17 = vpop.f32.mrf.mxu3 }
 0x10a   : > { %895 = vst.msk [vmem:[%s1429_s30 + $0x2b8] sm:$0xff] %vm808_vm0, %v754_v17  ;;  %v508_v20 = vpop.f32.mrf.mxu0 }
 0x10b   : > { %832 = vst [vmem:[%s1429_s30 + $0xc0] sm:$0xff] %v508_v20  ;;  %v677_v21 = vpop.f32.mrf.mxu1 }
 0x10c   : > { %833 = vst.msk [vmem:[%s1429_s30 + $0xc8] sm:$0xff] %vm808_vm0, %v677_v21 }
 0x10d   : > { %547 = vmatmul.bf16.gmra.mxu0 %v355_v18  ;;  %627 = vmatmul.bf16.gmra.mxu2 %v371_v19 }
 0x10e   : > { %716 = vmatmul.bf16.gmra.mxu1 %v355_v18  ;;  %796 = vmatmul.bf16.gmra.mxu3 %v371_v19 }
 0x110   : > { %v588_v24 = vpop.f32.mrf.mxu2 }
 0x111   : > { %896 = vst [vmem:[%s1429_s30 + $0x2c0] sm:$0xff] %v588_v24  ;;  %v757_v25 = vpop.f32.mrf.mxu3 }
 0x112   : > { %897 = vst.msk [vmem:[%s1429_s30 + $0x2c8] sm:$0xff] %vm808_vm0, %v757_v25  ;;  %v510_v30 = vpop.f32.mrf.mxu0 }
 0x113   : > { %834 = vst [vmem:[%s1429_s30 + $0xd0] sm:$0xff] %v510_v30  ;;  %v679_v31 = vpop.f32.mrf.mxu1 }
 0x114   : > { %835 = vst.msk [vmem:[%s1429_s30 + $0xd8] sm:$0xff] %vm808_vm0, %v679_v31 }
 0x118   : > { %v590_v36 = vpop.f32.mrf.mxu2 }
 0x119   : > { %898 = vst [vmem:[%s1429_s30 + $0x2d0] sm:$0xff] %v590_v36  ;;  %v759_v37 = vpop.f32.mrf.mxu3 }
 0x11a   : > { %899 = vst.msk [vmem:[%s1429_s30 + $0x2d8] sm:$0xff] %vm808_vm0, %v759_v37  ;;  %v513_v40 = vpop.f32.mrf.mxu0 }
 0x11b   : > { %836 = vst [vmem:[%s1429_s30 + $0xe0] sm:$0xff] %v513_v40  ;;  %v682_v41 = vpop.f32.mrf.mxu1 }
 0x11c   : > { %837 = vst.msk [vmem:[%s1429_s30 + $0xe8] sm:$0xff] %vm808_vm0, %v682_v41 }
 0x11d   : > { %552 = vmatmul.bf16.gmra.mxu0 %v356_v38  ;;  %632 = vmatmul.bf16.gmra.mxu2 %v372_v39 }
 0x11e   : > { %721 = vmatmul.bf16.gmra.mxu1 %v356_v38  ;;  %801 = vmatmul.bf16.gmra.mxu3 %v372_v39 }
 0x120   : > { %v593_v42 = vpop.f32.mrf.mxu2 }
 0x121   : > { %900 = vst [vmem:[%s1429_s30 + $0x2e0] sm:$0xff] %v593_v42  ;;  %v762_v43 = vpop.f32.mrf.mxu3 }
 0x122   : > { %901 = vst.msk [vmem:[%s1429_s30 + $0x2e8] sm:$0xff] %vm808_vm0, %v762_v43  ;;  %v515_v44 = vpop.f32.mrf.mxu0 }
 0x123   : > { %838 = vst [vmem:[%s1429_s30 + $0xf0] sm:$0xff] %v515_v44  ;;  %v684_v45 = vpop.f32.mrf.mxu1 }
 0x124   : > { %839 = vst.msk [vmem:[%s1429_s30 + $0xf8] sm:$0xff] %vm808_vm0, %v684_v45 }
 0x128   : > { %v595_v46 = vpop.f32.mrf.mxu2 }
 0x129   : > { %902 = vst [vmem:[%s1429_s30 + $0x2f0] sm:$0xff] %v595_v46  ;;  %v764_v47 = vpop.f32.mrf.mxu3 }
 0x12a   : > { %903 = vst.msk [vmem:[%s1429_s30 + $0x2f8] sm:$0xff] %vm808_vm0, %v764_v47  ;;  %v518_v48 = vpop.f32.mrf.mxu0 }
 0x12b   : > { %840 = vst [vmem:[%s1429_s30 + $0x100] sm:$0xff] %v518_v48  ;;  %v687_v49 = vpop.f32.mrf.mxu1 }
 0x12c   : > { %841 = vst.msk [vmem:[%s1429_s30 + $0x108] sm:$0xff] %vm808_vm0, %v687_v49 }
 0x130   : > { %v598_v50 = vpop.f32.mrf.mxu2 }
 0x131   : > { %904 = vst [vmem:[%s1429_s30 + $0x300] sm:$0xff] %v598_v50  ;;  %v767_v51 = vpop.f32.mrf.mxu3 }
 0x132   : > { %905 = vst.msk [vmem:[%s1429_s30 + $0x308] sm:$0xff] %vm808_vm0, %v767_v51  ;;  %v520_v52 = vpop.f32.mrf.mxu0 }
 0x133   : > { %842 = vst [vmem:[%s1429_s30 + $0x110] sm:$0xff] %v520_v52  ;;  %v689_v53 = vpop.f32.mrf.mxu1 }
 0x134   : > { %843 = vst.msk [vmem:[%s1429_s30 + $0x118] sm:$0xff] %vm808_vm0, %v689_v53 }
 0x138   : > { %v600_v54 = vpop.f32.mrf.mxu2 }
 0x139   : > { %906 = vst [vmem:[%s1429_s30 + $0x310] sm:$0xff] %v600_v54  ;;  %v769_v55 = vpop.f32.mrf.mxu3 }
 0x13a   : > { %907 = vst.msk [vmem:[%s1429_s30 + $0x318] sm:$0xff] %vm808_vm0, %v769_v55  ;;  %v523_v56 = vpop.f32.mrf.mxu0 }
 0x13b   : > { %844 = vst [vmem:[%s1429_s30 + $0x120] sm:$0xff] %v523_v56  ;;  %v692_v57 = vpop.f32.mrf.mxu1 }
 0x13c   : > { %845 = vst.msk [vmem:[%s1429_s30 + $0x128] sm:$0xff] %vm808_vm0, %v692_v57 }
 0x140   : > { %v603_v58 = vpop.f32.mrf.mxu2 }
 0x141   : > { %908 = vst [vmem:[%s1429_s30 + $0x320] sm:$0xff] %v603_v58  ;;  %v772_v59 = vpop.f32.mrf.mxu3 }
 0x142   : > { %909 = vst.msk [vmem:[%s1429_s30 + $0x328] sm:$0xff] %vm808_vm0, %v772_v59  ;;  %v525_v60 = vpop.f32.mrf.mxu0 }
 0x143   : > { %846 = vst [vmem:[%s1429_s30 + $0x130] sm:$0xff] %v525_v60  ;;  %v694_v61 = vpop.f32.mrf.mxu1 }
 0x144   : > { %847 = vst.msk [vmem:[%s1429_s30 + $0x138] sm:$0xff] %vm808_vm0, %v694_v61 }
 0x148   : > { %v605_v62 = vpop.f32.mrf.mxu2 }
 0x149   : > { %910 = vst [vmem:[%s1429_s30 + $0x330] sm:$0xff] %v605_v62  ;;  %v774_v63 = vpop.f32.mrf.mxu3 }
 0x14a   : > { %911 = vst.msk [vmem:[%s1429_s30 + $0x338] sm:$0xff] %vm808_vm0, %v774_v63  ;;  %v528_v0 = vpop.f32.mrf.mxu0 }
 0x14b   : > { %848 = vst [vmem:[%s1429_s30 + $0x140] sm:$0xff] %v528_v0  ;;  %v697_v1 = vpop.f32.mrf.mxu1 }
 0x14c   : > { %849 = vst.msk [vmem:[%s1429_s30 + $0x148] sm:$0xff] %vm808_vm0, %v697_v1 }
 0x150   : > { %v608_v2 = vpop.f32.mrf.mxu2 }
 0x151   : > { %912 = vst [vmem:[%s1429_s30 + $0x340] sm:$0xff] %v608_v2  ;;  %v777_v3 = vpop.f32.mrf.mxu3 }
 0x152   : > { %913 = vst.msk [vmem:[%s1429_s30 + $0x348] sm:$0xff] %vm808_vm0, %v777_v3  ;;  %v530_v4 = vpop.f32.mrf.mxu0 }
 0x153   : > { %850 = vst [vmem:[%s1429_s30 + $0x150] sm:$0xff] %v530_v4  ;;  %v699_v5 = vpop.f32.mrf.mxu1 }
 0x154   : > { %851 = vst.msk [vmem:[%s1429_s30 + $0x158] sm:$0xff] %vm808_vm0, %v699_v5 }
 0x158   : > { %v610_v6 = vpop.f32.mrf.mxu2 }
 0x159   : > { %914 = vst [vmem:[%s1429_s30 + $0x350] sm:$0xff] %v610_v6  ;;  %v779_v7 = vpop.f32.mrf.mxu3 }
 0x15a   : > { %915 = vst.msk [vmem:[%s1429_s30 + $0x358] sm:$0xff] %vm808_vm0, %v779_v7  ;;  %v533_v8 = vpop.f32.mrf.mxu0 }
 0x15b   : > { %852 = vst [vmem:[%s1429_s30 + $0x160] sm:$0xff] %v533_v8  ;;  %v702_v9 = vpop.f32.mrf.mxu1 }
 0x15c   : > { %853 = vst.msk [vmem:[%s1429_s30 + $0x168] sm:$0xff] %vm808_vm0, %v702_v9 }
 0x160   : > { %v613_v10 = vpop.f32.mrf.mxu2 }
 0x161   : > { %916 = vst [vmem:[%s1429_s30 + $0x360] sm:$0xff] %v613_v10  ;;  %v782_v11 = vpop.f32.mrf.mxu3 }
 0x162   : > { %917 = vst.msk [vmem:[%s1429_s30 + $0x368] sm:$0xff] %vm808_vm0, %v782_v11  ;;  %v535_v12 = vpop.f32.mrf.mxu0 }
 0x163   : > { %854 = vst [vmem:[%s1429_s30 + $0x170] sm:$0xff] %v535_v12  ;;  %v704_v13 = vpop.f32.mrf.mxu1 }
 0x164   : > { %855 = vst.msk [vmem:[%s1429_s30 + $0x178] sm:$0xff] %vm808_vm0, %v704_v13 }
 0x168   : > { %v615_v14 = vpop.f32.mrf.mxu2 }
 0x169   : > { %918 = vst [vmem:[%s1429_s30 + $0x370] sm:$0xff] %v615_v14  ;;  %v784_v15 = vpop.f32.mrf.mxu3 }
 0x16a   : > { %919 = vst.msk [vmem:[%s1429_s30 + $0x378] sm:$0xff] %vm808_vm0, %v784_v15  ;;  %v538_v16 = vpop.f32.mrf.mxu0 }
 0x16b   : > { %856 = vst [vmem:[%s1429_s30 + $0x180] sm:$0xff] %v538_v16  ;;  %v707_v17 = vpop.f32.mrf.mxu1 }
 0x16c   : > { %857 = vst.msk [vmem:[%s1429_s30 + $0x188] sm:$0xff] %vm808_vm0, %v707_v17 }
 0x170   : > { %v618_v18 = vpop.f32.mrf.mxu2 }
 0x171   : > { %920 = vst [vmem:[%s1429_s30 + $0x380] sm:$0xff] %v618_v18  ;;  %v787_v19 = vpop.f32.mrf.mxu3 }
 0x172   : > { %921 = vst.msk [vmem:[%s1429_s30 + $0x388] sm:$0xff] %vm808_vm0, %v787_v19  ;;  %v540_v20 = vpop.f32.mrf.mxu0 }
 0x173   : > { %858 = vst [vmem:[%s1429_s30 + $0x190] sm:$0xff] %v540_v20  ;;  %v709_v21 = vpop.f32.mrf.mxu1 }
 0x174   : > { %859 = vst.msk [vmem:[%s1429_s30 + $0x198] sm:$0xff] %vm808_vm0, %v709_v21 }
 0x178   : > { %v620_v22 = vpop.f32.mrf.mxu2 }
 0x179   : > { %922 = vst [vmem:[%s1429_s30 + $0x390] sm:$0xff] %v620_v22  ;;  %v789_v23 = vpop.f32.mrf.mxu3 }
 0x17a   : > { %923 = vst.msk [vmem:[%s1429_s30 + $0x398] sm:$0xff] %vm808_vm0, %v789_v23  ;;  %v543_v24 = vpop.f32.mrf.mxu0 }
 0x17b   : > { %860 = vst [vmem:[%s1429_s30 + $0x1a0] sm:$0xff] %v543_v24  ;;  %v712_v25 = vpop.f32.mrf.mxu1 }
 0x17c   : > { %861 = vst.msk [vmem:[%s1429_s30 + $0x1a8] sm:$0xff] %vm808_vm0, %v712_v25 }
 0x180   : > { %v623_v26 = vpop.f32.mrf.mxu2 }
 0x181   : > { %924 = vst [vmem:[%s1429_s30 + $0x3a0] sm:$0xff] %v623_v26  ;;  %v792_v27 = vpop.f32.mrf.mxu3 }
 0x182   : > { %925 = vst.msk [vmem:[%s1429_s30 + $0x3a8] sm:$0xff] %vm808_vm0, %v792_v27  ;;  %v545_v28 = vpop.f32.mrf.mxu0 }
 0x183   : > { %862 = vst [vmem:[%s1429_s30 + $0x1b0] sm:$0xff] %v545_v28  ;;  %v714_v29 = vpop.f32.mrf.mxu1 }
 0x184   : > { %863 = vst.msk [vmem:[%s1429_s30 + $0x1b8] sm:$0xff] %vm808_vm0, %v714_v29 }
 0x188   : > { %v625_v30 = vpop.f32.mrf.mxu2 }
 0x189   : > { %926 = vst [vmem:[%s1429_s30 + $0x3b0] sm:$0xff] %v625_v30  ;;  %v794_v31 = vpop.f32.mrf.mxu3 }
 0x18a   : > { %927 = vst.msk [vmem:[%s1429_s30 + $0x3b8] sm:$0xff] %vm808_vm0, %v794_v31  ;;  %v548_v32 = vpop.f32.mrf.mxu0 }
 0x18b   : > { %864 = vst [vmem:[%s1429_s30 + $0x1c0] sm:$0xff] %v548_v32  ;;  %v717_v33 = vpop.f32.mrf.mxu1 }
 0x18c   : > { %865 = vst.msk [vmem:[%s1429_s30 + $0x1c8] sm:$0xff] %vm808_vm0, %v717_v33 }
 0x190   : > { %v628_v34 = vpop.f32.mrf.mxu2 }
 0x191   : > { %928 = vst [vmem:[%s1429_s30 + $0x3c0] sm:$0xff] %v628_v34  ;;  %v797_v35 = vpop.f32.mrf.mxu3 }
 0x192   : > { %929 = vst.msk [vmem:[%s1429_s30 + $0x3c8] sm:$0xff] %vm808_vm0, %v797_v35  ;;  %v550_v36 = vpop.f32.mrf.mxu0 }
 0x193   : > { %866 = vst [vmem:[%s1429_s30 + $0x1d0] sm:$0xff] %v550_v36  ;;  %v719_v37 = vpop.f32.mrf.mxu1 }
 0x194   : > { %867 = vst.msk [vmem:[%s1429_s30 + $0x1d8] sm:$0xff] %vm808_vm0, %v719_v37 }
 0x198   : > { %v630_v38 = vpop.f32.mrf.mxu2 }
 0x199   : > { %930 = vst [vmem:[%s1429_s30 + $0x3d0] sm:$0xff] %v630_v38  ;;  %v799_v39 = vpop.f32.mrf.mxu3 }
 0x19a   : > { %931 = vst.msk [vmem:[%s1429_s30 + $0x3d8] sm:$0xff] %vm808_vm0, %v799_v39  ;;  %v553_v40 = vpop.f32.mrf.mxu0 }
 0x19b   : > { %868 = vst [vmem:[%s1429_s30 + $0x1e0] sm:$0xff] %v553_v40  ;;  %v722_v41 = vpop.f32.mrf.mxu1 }
 0x19c   : > { %869 = vst.msk [vmem:[%s1429_s30 + $0x1e8] sm:$0xff] %vm808_vm0, %v722_v41 }
 0x1a0   : > { %v633_v42 = vpop.f32.mrf.mxu2 }
 0x1a1   : > { %932 = vst [vmem:[%s1429_s30 + $0x3e0] sm:$0xff] %v633_v42  ;;  %v802_v43 = vpop.f32.mrf.mxu3 }
 0x1a2   : > { %933 = vst.msk [vmem:[%s1429_s30 + $0x3e8] sm:$0xff] %vm808_vm0, %v802_v43  ;;  %v555_v44 = vpop.f32.mrf.mxu0 }
 0x1a3   : > { %870 = vst [vmem:[%s1429_s30 + $0x1f0] sm:$0xff] %v555_v44  ;;  %v724_v45 = vpop.f32.mrf.mxu1 }
 0x1a4   : > { %871 = vst.msk [vmem:[%s1429_s30 + $0x1f8] sm:$0xff] %vm808_vm0, %v724_v45 }
 0x1a8   : > { %v635_v46 = vpop.f32.mrf.mxu2 }
 0x1a9   : > { %934 = vst [vmem:[%s1429_s30 + $0x3f0] sm:$0xff] %v635_v46  ;;  %v804_v47 = vpop.f32.mrf.mxu3 }
 0x1aa   : > { %935 = vst.msk [vmem:[%s1429_s30 + $0x3f8] sm:$0xff] %vm808_vm0, %v804_v47 }
 0x1ab PF: > { %s12_s9 = sadd.s32 1, %s1276_s9  }
 0x1ac   : > { %p9_p4 = scmp.ge.s32.totalorder %s12_s9, 4  }
 0x1ae   :  { %11 = sbr.rel (!%p9_p4) target bundleno = 1 (0x1), region = 58 }

</bundles_post_ra>
